<compile_context>
chip_gen: v7x
topology: tpu7x:2x2x1
jax: 0.10.0
libtpu: 0.0.40
codegen_flags: <defaults>
</compile_context>

<pallas_src>
import functools

import jax
import jax.numpy as jnp
from jax.experimental import pallas as pl
from jax.experimental.pallas import tpu as pltpu


def bottleneck_kernel(x_ref, w1_ref, b1_ref, w2_ref, b2_ref, w3_ref, b3_ref,
                      mask_ref, out_ref, *, W):
    """One grid step: R = block_b*H*W pixel rows, channels on lanes."""
    f32 = jnp.float32
    bf16 = jnp.bfloat16
    n_rows = x_ref.shape[0]

    x = x_ref[...]                                            # (R, Cin) f32

    # ---- conv1 (1x1); BN1 scale folded into w1 columns; bias + ReLU ----
    h1 = jnp.dot(x.astype(bf16), w1_ref[...], preferred_element_type=f32)
    h1 = jnp.maximum(h1 + b1_ref[...], 0.0)                   # (R, P)

    # ---- conv2 (3x3, pad=1, stride=1): nine accumulated MXU matmuls over
    # row-rolled taps.  Zero padding / cross-image leakage handled by
    # precomputed 0/1 row masks (no iota, no div, no selects, no concat). ----
    m = mask_ref[...]                                         # (R, 4) f32
    top, bot = m[:, 0:1], m[:, 1:2]
    left, right = m[:, 2:3], m[:, 3:4]

    h2 = None
    for dy in (-1, 0, 1):
        if dy == 0:
            h1_dy = h1
        else:
            h1_dy = pltpu.roll(h1, (-dy * W) % n_rows, 0)
            h1_dy = h1_dy * (top if dy == -1 else bot)
        for dx in (-1, 0, 1):
            if dx == 0:
                tap = h1_dy
            else:
                tap = pltpu.roll(h1_dy, (-dx) % n_rows, 0)
                tap = tap * (left if dx == -1 else right)
            k = (dy + 1) * 3 + (dx + 1)
            c = jnp.dot(tap.astype(bf16), w2_ref[k],
                        preferred_element_type=f32)           # (R, P)
            h2 = c if h2 is None else h2 + c
    h2 = jnp.maximum(h2 + b2_ref[...], 0.0)                   # (R, P)

    # ---- conv3 (1x1); BN3 scale folded; bias + identity residual + ReLU ----
    h3 = jnp.dot(h2.astype(bf16), w3_ref[...], preferred_element_type=f32)
    out_ref[...] = jnp.maximum(h3 + b3_ref[...] + x, 0.0)     # (R, Cin)


def fold_bn(gamma, beta, mean, var, eps=1e-5):
    scale = gamma / jnp.sqrt(var + eps)
    bias = beta - mean * scale
    return scale.reshape(1, -1), bias.reshape(1, -1)


def prepare_folded(params):
    """Fold BN scales into the conv weights in f32, then cast to bf16."""
    P = params["w1"].shape[1]
    w1f = (params["w1"] * params["s1"]).astype(jnp.bfloat16)            # (Cin, P)
    w2f = (params["w2"] * params["s2"].reshape(1, 1, 1, -1))            # (3,3,P,P)
    w2f = w2f.reshape(9, P, P).astype(jnp.bfloat16)                     # tap-major
    w3f = (params["w3"] * params["s3"]).astype(jnp.bfloat16)            # (P, Cin)
    return w1f, w2f, w3f, params["b1"], params["b2"], params["b3"]


def _pick_images_per_block(n, hw, cin, p, budget_bytes=8 << 20):
    """Largest divisor of n that (a) keeps >=2 grid steps when n >= 2 (both
    v7x TensorCores busy) and (b) keeps the per-step working set (double
    buffered in/out blocks + f32 intermediates) within a conservative VMEM
    budget (well under v7x's 64 MiB)."""
    best = 1
    for d in range(1, n + 1):
        if n % d:
            continue
        if n >= 2 and n // d < 2:
            continue
        per_step = d * hw * (4 * cin * 4 + 12 * p * 4)
        if per_step <= budget_bytes:
            best = d
    return best


def bottleneck_forward(x_nchw, params, *, images_per_block=None):
    """NCHW in/out (PyTorch convention).  Internally NHWC flattened to
    (N*H*W, Cin) so contractions and the residual run in one 2-D
    channel-last view with zero in-kernel relayout reshapes."""
    x = jnp.transpose(x_nchw, (0, 2, 3, 1)).astype(jnp.float32)   # NHWC
    N, H, W, Cin = x.shape
    P = params["w1"].shape[1]
    HW = H * W

    w1f, w2f, w3f, b1, b2, b3 = prepare_folded(params)

    block_b = (images_per_block if images_per_block is not None
               else _pick_images_per_block(N, HW, Cin, P))
    assert N % block_b == 0, "images_per_block must divide the batch"
    R = block_b * HW                                # pixel rows per grid step

    x2d = x.reshape(N * HW, Cin)                    # contiguous merge -> free

    # Static 0/1 border masks per block row: [top_ok, bottom_ok, left_ok,
    # right_ok].  Built once here so the kernel does no iota / div / compares.
    rows = jnp.arange(R)
    hw_in_img = rows % HW
    hrow = hw_in_img // W
    wcol = hw_in_img % W
    masks = jnp.stack(
        [hrow >= 1, hrow <= H - 2, wcol >= 1, wcol <= W - 2],
        axis=1).astype(jnp.float32)                              # (R, 4)

    def full_spec(shape):
        return pl.BlockSpec(shape, lambda n: (0,) * len(shape))

    kernel = functools.partial(bottleneck_kernel, W=W)

    flops = 2 * N * HW * (Cin * P + 9 * P * P + P * Cin) + 8 * N * HW * Cin
    bytes_accessed = (2 * N * HW * Cin * 4                       # x + out (f32)
                      + (Cin * P + 9 * P * P + P * Cin) * 2      # bf16 weights
                      + (2 * P + Cin) * 4 + R * 4 * 4)           # biases, masks
    cost = pl.CostEstimate(flops=int(flops), transcendentals=0,
                           bytes_accessed=int(bytes_accessed))

    # Per-step VMEM: double-buffered x/out blocks + weights + f32 temps.
    vmem_est = (4 * R * Cin * 4 + 12 * R * P * 4 + R * 4 * 4
                + 2 * (Cin * P + 9 * P * P + P * Cin) * 2)
    vmem_limit = int(min(max(2 * vmem_est, 8 << 20), 48 << 20))

    out2d = pl.pallas_call(
        kernel,
        out_shape=jax.ShapeDtypeStruct((N * HW, Cin), jnp.float32),
        grid_spec=pltpu.PrefetchScalarGridSpec(
            num_scalar_prefetch=0,
            grid=(N // block_b,),
            in_specs=[
                pl.BlockSpec((R, Cin), lambda n: (n, 0)),    # x rows
                full_spec((Cin, P)),                         # w1 (scale folded)
                full_spec((1, P)),                           # b1
                full_spec((9, P, P)),                        # w2 (scale folded)
                full_spec((1, P)),                           # b2
                full_spec((P, Cin)),                         # w3 (scale folded)
                full_spec((1, Cin)),                         # b3
                full_spec((R, 4)),                           # border masks
            ],
            out_specs=pl.BlockSpec((R, Cin), lambda n: (n, 0)),
        ),
        compiler_params=pltpu.CompilerParams(
            dimension_semantics=("parallel",),
            vmem_limit_bytes=vmem_limit),
        cost_estimate=cost,
    )(x2d, w1f, b1, w2f, b2, w3f, b3, masks)

    out = out2d.reshape(N, H, W, Cin)
    return jnp.transpose(out, (0, 3, 1, 2))                  # back to NCHW


def ref_forward(x_nchw, params):
    """Pure-JAX reference (lax.conv) using the same BN-folded bf16 weights
    and f32 accumulation as the kernel, so the comparison is tight."""
    f32 = jnp.float32
    w1f, w2f, w3f, b1, b2, b3 = prepare_folded(params)
    P = params["w1"].shape[1]
    x = jnp.transpose(x_nchw, (0, 2, 3, 1)).astype(f32)      # NHWC

    def conv(v, w, pad):
        return jax.lax.conv_general_dilated(
            v.astype(jnp.bfloat16), w, (1, 1), pad,
            dimension_numbers=("NHWC", "HWIO", "NHWC"),
            preferred_element_type=f32)

    h = jnp.maximum(conv(x, w1f[None, None], "VALID") + b1[0], 0.0)
    h = jnp.maximum(conv(h, w2f.reshape(3, 3, P, P), [(1, 1), (1, 1)]) + b2[0],
                    0.0)
    h = conv(h, w3f[None, None], "VALID") + b3[0]
    out = jnp.maximum(h + x, 0.0)
    return jnp.transpose(out, (0, 3, 1, 2))


def make_params(key, inplanes, planes):
    ks = jax.random.split(key, 16)
    w1 = 0.1 * jax.random.normal(ks[0], (inplanes, planes), jnp.float32)
    w2 = 0.1 * jax.random.normal(ks[1], (3, 3, planes, planes), jnp.float32)
    w3 = 0.1 * jax.random.normal(ks[2], (planes, inplanes), jnp.float32)

    def bn(kg, kb, km, kv, c):
        gamma = jax.random.uniform(kg, (c,), jnp.float32, 0.5, 1.5)
        beta = 0.1 * jax.random.normal(kb, (c,), jnp.float32)
        mean = 0.1 * jax.random.normal(km, (c,), jnp.float32)
        var = jax.random.uniform(kv, (c,), jnp.float32, 0.5, 1.5)
        return fold_bn(gamma, beta, mean, var)

    s1, b1 = bn(ks[3], ks[4], ks[5], ks[6], planes)
    s2, b2 = bn(ks[7], ks[8], ks[9], ks[10], planes)
    s3, b3 = bn(ks[11], ks[12], ks[13], ks[14], inplanes)

    return dict(w1=w1, w2=w2, w3=w3, s1=s1, b1=b1, s2=s2, b2=b2, s3=s3, b3=b3)


if __name__ == "__main__":
    key = jax.random.PRNGKey(0)
    inplanes, planes = 64, 16          # planes * expansion == inplanes
    N, H, W = 2, 16, 16

    kx, kp = jax.random.split(key)
    x = jax.random.normal(kx, (N, inplanes, H, W), jnp.float32)   # NCHW input
    params = make_params(kp, inplanes, planes)

    out = jax.block_until_ready(bottleneck_forward(x, params))
    ref = ref_forward(x, params)

    assert out.shape == (N, inplanes, H, W)
    max_err = jnp.max(jnp.abs(out - ref))
    assert jnp.allclose(out, ref, atol=2e-3, rtol=2e-3), \
        f"max abs err = {max_err}"

    print("KERNEL_OK")
</pallas_src>

<mosaic_0001>
module attributes {stable_mosaic.version = 11 : i64} {
  func.func @bottleneck_kernel(%arg0: i32, %arg1: memref<256x64xf32, #tpu.memory_space<vmem>>, %arg2: memref<64x16xbf16, #tpu.memory_space<vmem>>, %arg3: memref<1x16xf32, #tpu.memory_space<vmem>>, %arg4: memref<9x16x16xbf16, #tpu.memory_space<vmem>>, %arg5: memref<1x16xf32, #tpu.memory_space<vmem>>, %arg6: memref<16x64xbf16, #tpu.memory_space<vmem>>, %arg7: memref<1x64xf32, #tpu.memory_space<vmem>>, %arg8: memref<256x4xf32, #tpu.memory_space<vmem>>, %arg9: memref<256x64xf32, #tpu.memory_space<vmem>>) attributes {dimension_semantics = [#tpu.dimension_semantics<parallel>], iteration_bounds = array<i64: 2>, scalar_prefetch = 0 : i64, scratch_operands = 0 : i64, tpu.core_type = #tpu.core_type<tc>, window_params = [{transform_indices = @transform_0, window_bounds = array<i64: 256, 64>}, {pipeline_mode = #tpu.pipeline_mode<synchronous>, transform_indices = @transform_1, window_bounds = array<i64: 64, 16>}, {pipeline_mode = #tpu.pipeline_mode<synchronous>, transform_indices = @transform_2, window_bounds = array<i64: 1, 16>}, {pipeline_mode = #tpu.pipeline_mode<synchronous>, transform_indices = @transform_3, window_bounds = array<i64: 9, 16, 16>}, {pipeline_mode = #tpu.pipeline_mode<synchronous>, transform_indices = @transform_4, window_bounds = array<i64: 1, 16>}, {pipeline_mode = #tpu.pipeline_mode<synchronous>, transform_indices = @transform_5, window_bounds = array<i64: 16, 64>}, {pipeline_mode = #tpu.pipeline_mode<synchronous>, transform_indices = @transform_6, window_bounds = array<i64: 1, 64>}, {pipeline_mode = #tpu.pipeline_mode<synchronous>, transform_indices = @transform_7, window_bounds = array<i64: 256, 4>}, {transform_indices = @transform_8, window_bounds = array<i64: 256, 64>}]} {
    %c0 = arith.constant 0 : index
    %c0_0 = arith.constant 0 : index
    %0 = vector.load %arg1[%c0, %c0_0] : memref<256x64xf32, #tpu.memory_space<vmem>>, vector<256x64xf32>
    %1 = arith.truncf %0 : vector<256x64xf32> to vector<256x64xbf16>
    %c0_1 = arith.constant 0 : index
    %c0_2 = arith.constant 0 : index
    %2 = vector.load %arg2[%c0_1, %c0_2] : memref<64x16xbf16, #tpu.memory_space<vmem>>, vector<64x16xbf16>
    %cst = arith.constant dense<0.000000e+00> : vector<256x16xf32>
    %3 = tpu.matmul %1, %2, %cst {dimension_numbers = #tpu.dot_dimension_numbers<[1], [0], [0], [1], [0, 0, 1, 1], [], []>} : vector<256x64xbf16>, vector<64x16xbf16>, vector<256x16xf32> -> vector<256x16xf32>
    %c0_3 = arith.constant 0 : index
    %c0_4 = arith.constant 0 : index
    %4 = vector.load %arg3[%c0_3, %c0_4] : memref<1x16xf32, #tpu.memory_space<vmem>>, vector<1x16xf32>
    %5 = vector.broadcast %4 : vector<1x16xf32> to vector<256x16xf32>
    %6 = arith.addf %3, %5 : vector<256x16xf32>
    %cst_5 = arith.constant 0.000000e+00 : f32
    %7 = vector.broadcast %cst_5 : f32 to vector<256x16xf32>
    %8 = arith.maximumf %6, %7 : vector<256x16xf32>
    %c0_6 = arith.constant 0 : index
    %c0_7 = arith.constant 0 : index
    %9 = vector.load %arg8[%c0_6, %c0_7] : memref<256x4xf32, #tpu.memory_space<vmem>>, vector<256x4xf32>
    %10 = vector.extract_strided_slice %9 {offsets = [0, 0], sizes = [256, 1], strides = [1, 1]} : vector<256x4xf32> to vector<256x1xf32>
    %11 = vector.extract_strided_slice %9 {offsets = [0, 1], sizes = [256, 1], strides = [1, 1]} : vector<256x4xf32> to vector<256x1xf32>
    %12 = vector.extract_strided_slice %9 {offsets = [0, 2], sizes = [256, 1], strides = [1, 1]} : vector<256x4xf32> to vector<256x1xf32>
    %13 = vector.extract_strided_slice %9 {offsets = [0, 3], sizes = [256, 1], strides = [1, 1]} : vector<256x4xf32> to vector<256x1xf32>
    %c16_i32 = arith.constant 16 : i32
    %14 = tpu.dynamic_rotate %8 by %c16_i32 dim 0 : vector<256x16xf32>, i32 -> vector<256x16xf32>
    %15 = vector.broadcast %10 : vector<256x1xf32> to vector<256x16xf32>
    %16 = arith.mulf %14, %15 : vector<256x16xf32>
    %c1_i32 = arith.constant 1 : i32
    %17 = tpu.dynamic_rotate %16 by %c1_i32 dim 0 : vector<256x16xf32>, i32 -> vector<256x16xf32>
    %18 = vector.broadcast %12 : vector<256x1xf32> to vector<256x16xf32>
    %19 = arith.mulf %17, %18 : vector<256x16xf32>
    %20 = arith.truncf %19 : vector<256x16xf32> to vector<256x16xbf16>
    %c0_8 = arith.constant 0 : index
    %c0_9 = arith.constant 0 : index
    %c0_10 = arith.constant 0 : index
    %21 = vector.load %arg4[%c0_8, %c0_9, %c0_10] : memref<9x16x16xbf16, #tpu.memory_space<vmem>>, vector<1x16x16xbf16>
    %22 = vector.shape_cast %21 : vector<1x16x16xbf16> to vector<16x16xbf16>
    %cst_11 = arith.constant dense<0.000000e+00> : vector<256x16xf32>
    %23 = tpu.matmul %20, %22, %cst_11 {dimension_numbers = #tpu.dot_dimension_numbers<[1], [0], [0], [1], [0, 0, 1, 1], [], []>} : vector<256x16xbf16>, vector<16x16xbf16>, vector<256x16xf32> -> vector<256x16xf32>
    %24 = arith.truncf %16 : vector<256x16xf32> to vector<256x16xbf16>
    %c1 = arith.constant 1 : index
    %c0_12 = arith.constant 0 : index
    %c0_13 = arith.constant 0 : index
    %25 = vector.load %arg4[%c1, %c0_12, %c0_13] : memref<9x16x16xbf16, #tpu.memory_space<vmem>>, vector<1x16x16xbf16>
    %26 = vector.shape_cast %25 : vector<1x16x16xbf16> to vector<16x16xbf16>
    %cst_14 = arith.constant dense<0.000000e+00> : vector<256x16xf32>
    %27 = tpu.matmul %24, %26, %cst_14 {dimension_numbers = #tpu.dot_dimension_numbers<[1], [0], [0], [1], [0, 0, 1, 1], [], []>} : vector<256x16xbf16>, vector<16x16xbf16>, vector<256x16xf32> -> vector<256x16xf32>
    %28 = arith.addf %23, %27 : vector<256x16xf32>
    %c255_i32 = arith.constant 255 : i32
    %29 = tpu.dynamic_rotate %16 by %c255_i32 dim 0 : vector<256x16xf32>, i32 -> vector<256x16xf32>
    %30 = vector.broadcast %13 : vector<256x1xf32> to vector<256x16xf32>
    %31 = arith.mulf %29, %30 : vector<256x16xf32>
    %32 = arith.truncf %31 : vector<256x16xf32> to vector<256x16xbf16>
    %c2 = arith.constant 2 : index
    %c0_15 = arith.constant 0 : index
    %c0_16 = arith.constant 0 : index
    %33 = vector.load %arg4[%c2, %c0_15, %c0_16] : memref<9x16x16xbf16, #tpu.memory_space<vmem>>, vector<1x16x16xbf16>
    %34 = vector.shape_cast %33 : vector<1x16x16xbf16> to vector<16x16xbf16>
    %cst_17 = arith.constant dense<0.000000e+00> : vector<256x16xf32>
    %35 = tpu.matmul %32, %34, %cst_17 {dimension_numbers = #tpu.dot_dimension_numbers<[1], [0], [0], [1], [0, 0, 1, 1], [], []>} : vector<256x16xbf16>, vector<16x16xbf16>, vector<256x16xf32> -> vector<256x16xf32>
    %36 = arith.addf %28, %35 : vector<256x16xf32>
    %c1_i32_18 = arith.constant 1 : i32
    %37 = tpu.dynamic_rotate %8 by %c1_i32_18 dim 0 : vector<256x16xf32>, i32 -> vector<256x16xf32>
    %38 = vector.broadcast %12 : vector<256x1xf32> to vector<256x16xf32>
    %39 = arith.mulf %37, %38 : vector<256x16xf32>
    %40 = arith.truncf %39 : vector<256x16xf32> to vector<256x16xbf16>
    %c3 = arith.constant 3 : index
    %c0_19 = arith.constant 0 : index
    %c0_20 = arith.constant 0 : index
    %41 = vector.load %arg4[%c3, %c0_19, %c0_20] : memref<9x16x16xbf16, #tpu.memory_space<vmem>>, vector<1x16x16xbf16>
    %42 = vector.shape_cast %41 : vector<1x16x16xbf16> to vector<16x16xbf16>
    %cst_21 = arith.constant dense<0.000000e+00> : vector<256x16xf32>
    %43 = tpu.matmul %40, %42, %cst_21 {dimension_numbers = #tpu.dot_dimension_numbers<[1], [0], [0], [1], [0, 0, 1, 1], [], []>} : vector<256x16xbf16>, vector<16x16xbf16>, vector<256x16xf32> -> vector<256x16xf32>
    %44 = arith.addf %36, %43 : vector<256x16xf32>
    %45 = arith.truncf %8 : vector<256x16xf32> to vector<256x16xbf16>
    %c4 = arith.constant 4 : index
    %c0_22 = arith.constant 0 : index
    %c0_23 = arith.constant 0 : index
    %46 = vector.load %arg4[%c4, %c0_22, %c0_23] : memref<9x16x16xbf16, #tpu.memory_space<vmem>>, vector<1x16x16xbf16>
    %47 = vector.shape_cast %46 : vector<1x16x16xbf16> to vector<16x16xbf16>
    %cst_24 = arith.constant dense<0.000000e+00> : vector<256x16xf32>
    %48 = tpu.matmul %45, %47, %cst_24 {dimension_numbers = #tpu.dot_dimension_numbers<[1], [0], [0], [1], [0, 0, 1, 1], [], []>} : vector<256x16xbf16>, vector<16x16xbf16>, vector<256x16xf32> -> vector<256x16xf32>
    %49 = arith.addf %44, %48 : vector<256x16xf32>
    %c255_i32_25 = arith.constant 255 : i32
    %50 = tpu.dynamic_rotate %8 by %c255_i32_25 dim 0 : vector<256x16xf32>, i32 -> vector<256x16xf32>
    %51 = vector.broadcast %13 : vector<256x1xf32> to vector<256x16xf32>
    %52 = arith.mulf %50, %51 : vector<256x16xf32>
    %53 = arith.truncf %52 : vector<256x16xf32> to vector<256x16xbf16>
    %c5 = arith.constant 5 : index
    %c0_26 = arith.constant 0 : index
    %c0_27 = arith.constant 0 : index
    %54 = vector.load %arg4[%c5, %c0_26, %c0_27] : memref<9x16x16xbf16, #tpu.memory_space<vmem>>, vector<1x16x16xbf16>
    %55 = vector.shape_cast %54 : vector<1x16x16xbf16> to vector<16x16xbf16>
    %cst_28 = arith.constant dense<0.000000e+00> : vector<256x16xf32>
    %56 = tpu.matmul %53, %55, %cst_28 {dimension_numbers = #tpu.dot_dimension_numbers<[1], [0], [0], [1], [0, 0, 1, 1], [], []>} : vector<256x16xbf16>, vector<16x16xbf16>, vector<256x16xf32> -> vector<256x16xf32>
    %57 = arith.addf %49, %56 : vector<256x16xf32>
    %c240_i32 = arith.constant 240 : i32
    %58 = tpu.dynamic_rotate %8 by %c240_i32 dim 0 : vector<256x16xf32>, i32 -> vector<256x16xf32>
    %59 = vector.broadcast %11 : vector<256x1xf32> to vector<256x16xf32>
    %60 = arith.mulf %58, %59 : vector<256x16xf32>
    %c1_i32_29 = arith.constant 1 : i32
    %61 = tpu.dynamic_rotate %60 by %c1_i32_29 dim 0 : vector<256x16xf32>, i32 -> vector<256x16xf32>
    %62 = vector.broadcast %12 : vector<256x1xf32> to vector<256x16xf32>
    %63 = arith.mulf %61, %62 : vector<256x16xf32>
    %64 = arith.truncf %63 : vector<256x16xf32> to vector<256x16xbf16>
    %c6 = arith.constant 6 : index
    %c0_30 = arith.constant 0 : index
    %c0_31 = arith.constant 0 : index
    %65 = vector.load %arg4[%c6, %c0_30, %c0_31] : memref<9x16x16xbf16, #tpu.memory_space<vmem>>, vector<1x16x16xbf16>
    %66 = vector.shape_cast %65 : vector<1x16x16xbf16> to vector<16x16xbf16>
    %cst_32 = arith.constant dense<0.000000e+00> : vector<256x16xf32>
    %67 = tpu.matmul %64, %66, %cst_32 {dimension_numbers = #tpu.dot_dimension_numbers<[1], [0], [0], [1], [0, 0, 1, 1], [], []>} : vector<256x16xbf16>, vector<16x16xbf16>, vector<256x16xf32> -> vector<256x16xf32>
    %68 = arith.addf %57, %67 : vector<256x16xf32>
    %69 = arith.truncf %60 : vector<256x16xf32> to vector<256x16xbf16>
    %c7 = arith.constant 7 : index
    %c0_33 = arith.constant 0 : index
    %c0_34 = arith.constant 0 : index
    %70 = vector.load %arg4[%c7, %c0_33, %c0_34] : memref<9x16x16xbf16, #tpu.memory_space<vmem>>, vector<1x16x16xbf16>
    %71 = vector.shape_cast %70 : vector<1x16x16xbf16> to vector<16x16xbf16>
    %cst_35 = arith.constant dense<0.000000e+00> : vector<256x16xf32>
    %72 = tpu.matmul %69, %71, %cst_35 {dimension_numbers = #tpu.dot_dimension_numbers<[1], [0], [0], [1], [0, 0, 1, 1], [], []>} : vector<256x16xbf16>, vector<16x16xbf16>, vector<256x16xf32> -> vector<256x16xf32>
    %73 = arith.addf %68, %72 : vector<256x16xf32>
    %c255_i32_36 = arith.constant 255 : i32
    %74 = tpu.dynamic_rotate %60 by %c255_i32_36 dim 0 : vector<256x16xf32>, i32 -> vector<256x16xf32>
    %75 = vector.broadcast %13 : vector<256x1xf32> to vector<256x16xf32>
    %76 = arith.mulf %74, %75 : vector<256x16xf32>
    %77 = arith.truncf %76 : vector<256x16xf32> to vector<256x16xbf16>
    %c8 = arith.constant 8 : index
    %c0_37 = arith.constant 0 : index
    %c0_38 = arith.constant 0 : index
    %78 = vector.load %arg4[%c8, %c0_37, %c0_38] : memref<9x16x16xbf16, #tpu.memory_space<vmem>>, vector<1x16x16xbf16>
    %79 = vector.shape_cast %78 : vector<1x16x16xbf16> to vector<16x16xbf16>
    %cst_39 = arith.constant dense<0.000000e+00> : vector<256x16xf32>
    %80 = tpu.matmul %77, %79, %cst_39 {dimension_numbers = #tpu.dot_dimension_numbers<[1], [0], [0], [1], [0, 0, 1, 1], [], []>} : vector<256x16xbf16>, vector<16x16xbf16>, vector<256x16xf32> -> vector<256x16xf32>
    %81 = arith.addf %73, %80 : vector<256x16xf32>
    %c0_40 = arith.constant 0 : index
    %c0_41 = arith.constant 0 : index
    %82 = vector.load %arg5[%c0_40, %c0_41] : memref<1x16xf32, #tpu.memory_space<vmem>>, vector<1x16xf32>
    %83 = vector.broadcast %82 : vector<1x16xf32> to vector<256x16xf32>
    %84 = arith.addf %81, %83 : vector<256x16xf32>
    %cst_42 = arith.constant 0.000000e+00 : f32
    %85 = vector.broadcast %cst_42 : f32 to vector<256x16xf32>
    %86 = arith.maximumf %84, %85 : vector<256x16xf32>
    %87 = arith.truncf %86 : vector<256x16xf32> to vector<256x16xbf16>
    %c0_43 = arith.constant 0 : index
    %c0_44 = arith.constant 0 : index
    %88 = vector.load %arg6[%c0_43, %c0_44] : memref<16x64xbf16, #tpu.memory_space<vmem>>, vector<16x64xbf16>
    %cst_45 = arith.constant dense<0.000000e+00> : vector<256x64xf32>
    %89 = tpu.matmul %87, %88, %cst_45 {dimension_numbers = #tpu.dot_dimension_numbers<[1], [0], [0], [1], [0, 0, 1, 1], [], []>} : vector<256x16xbf16>, vector<16x64xbf16>, vector<256x64xf32> -> vector<256x64xf32>
    %c0_46 = arith.constant 0 : index
    %c0_47 = arith.constant 0 : index
    %90 = vector.load %arg7[%c0_46, %c0_47] : memref<1x64xf32, #tpu.memory_space<vmem>>, vector<1x64xf32>
    %91 = vector.broadcast %90 : vector<1x64xf32> to vector<256x64xf32>
    %92 = arith.addf %89, %91 : vector<256x64xf32>
    %93 = arith.addf %92, %0 : vector<256x64xf32>
    %cst_48 = arith.constant 0.000000e+00 : f32
    %94 = vector.broadcast %cst_48 : f32 to vector<256x64xf32>
    %95 = arith.maximumf %93, %94 : vector<256x64xf32>
    %c0_49 = arith.constant 0 : index
    %c0_50 = arith.constant 0 : index
    %96 = vector.load %arg9[%c0_49, %c0_50] : memref<256x64xf32, #tpu.memory_space<vmem>>, vector<256x64xf32>
    tpu.vector_store %arg9[%c0_49, %c0_50], %95 {strides = array<i32>} : memref<256x64xf32, #tpu.memory_space<vmem>>, vector<256x64xf32>,
    return
  }
  func.func @transform_0(%arg0: i32) -> (i32, i32) {
    %c0_i32 = arith.constant 0 : i32
    %c0_i32_0 = arith.constant 0 : i32
    return %arg0, %c0_i32 : i32, i32
  }
  func.func @transform_1(%arg0: i32) -> (i32, i32) {
    %c0_i32 = arith.constant 0 : i32
    %c0_i32_0 = arith.constant 0 : i32
    %c0_i32_1 = arith.constant 0 : i32
    return %c0_i32, %c0_i32_0 : i32, i32
  }
  func.func @transform_2(%arg0: i32) -> (i32, i32) {
    %c0_i32 = arith.constant 0 : i32
    %c0_i32_0 = arith.constant 0 : i32
    %c0_i32_1 = arith.constant 0 : i32
    return %c0_i32, %c0_i32_0 : i32, i32
  }
  func.func @transform_3(%arg0: i32) -> (i32, i32, i32) {
    %c0_i32 = arith.constant 0 : i32
    %c0_i32_0 = arith.constant 0 : i32
    %c0_i32_1 = arith.constant 0 : i32
    %c0_i32_2 = arith.constant 0 : i32
    return %c0_i32, %c0_i32_0, %c0_i32_1 : i32, i32, i32
  }
  func.func @transform_4(%arg0: i32) -> (i32, i32) {
    %c0_i32 = arith.constant 0 : i32
    %c0_i32_0 = arith.constant 0 : i32
    %c0_i32_1 = arith.constant 0 : i32
    return %c0_i32, %c0_i32_0 : i32, i32
  }
  func.func @transform_5(%arg0: i32) -> (i32, i32) {
    %c0_i32 = arith.constant 0 : i32
    %c0_i32_0 = arith.constant 0 : i32
    %c0_i32_1 = arith.constant 0 : i32
    return %c0_i32, %c0_i32_0 : i32, i32
  }
  func.func @transform_6(%arg0: i32) -> (i32, i32) {
    %c0_i32 = arith.constant 0 : i32
    %c0_i32_0 = arith.constant 0 : i32
    %c0_i32_1 = arith.constant 0 : i32
    return %c0_i32, %c0_i32_0 : i32, i32
  }
  func.func @transform_7(%arg0: i32) -> (i32, i32) {
    %c0_i32 = arith.constant 0 : i32
    %c0_i32_0 = arith.constant 0 : i32
    %c0_i32_1 = arith.constant 0 : i32
    return %c0_i32, %c0_i32_0 : i32, i32
  }
  func.func @transform_8(%arg0: i32) -> (i32, i32) {
    %c0_i32 = arith.constant 0 : i32
    %c0_i32_0 = arith.constant 0 : i32
    return %arg0, %c0_i32 : i32, i32
  }
}

</mosaic_0001>

<bundles_post_ra>
// kernel: tpu_custom_call.1
= control target key start
LH: loop header
LB: loop body
LE: loop exit
PB: predicated region body
PF: predicated region fallthrough
CT: control target
= control target key end

     0   :  { %s5872_s27 = smov 0   ;;  %s8899_s0 = inlined_call_operand.vmem [shape: f32[512,64], index: 0, kind: input, shape index: {}]   ;;  %s8900_s1 = inlined_call_operand.vmem [shape: bf16[64,16], index: 1, kind: input, shape index: {}]   ;;  %s8901_s2 = inlined_call_operand.vmem [shape: f32[1,16], index: 2, kind: input, shape index: {}]   ;;  %s8902_s3 = inlined_call_operand.vmem [shape: bf16[9,16,16], index: 3, kind: input, shape index: {}]   ;;  %s8903_s4 = inlined_call_operand.vmem [shape: f32[1,16], index: 4, kind: input, shape index: {}]   ;;  %s8904_s5 = inlined_call_operand.vmem [shape: bf16[16,64], index: 5, kind: input, shape index: {}]   ;;  %s8905_s6 = inlined_call_operand.vmem [shape: f32[1,64], index: 6, kind: input, shape index: {}]   ;;  %s8906_s7 = inlined_call_operand.vmem [shape: f32[256,4], index: 7, kind: input, shape index: {}]   ;;  %s8907_s8 = inlined_call_operand.vmem [shape: f32[512,64], index: 8, kind: output, shape index: {}]  }
   0x1 LB: > { %s4652_s28 = sadd.s32 4294967295, %s5821_s27   ;;  %p4656_p0 = scmp.ge.s32.totalorder %s5821_s27, 1  ;;  %s5821_s27 = sphi %s5872_s27, %s18_s27  }
   0x2   : > { %p263_p1 = scmp.lt.s32.totalorder %s5821_s27, 3 }
   0x4   : > { %p264_p2 = pnand %p4656_p0, %p263_p1 }
   0x6   : > { %267 = sbr.rel (%p264_p2) target bundleno = 1103 (0x44f), region = 52 }
   0xd   : > { %v5883_v0 = vld [vmem:[%s8906_s7 + $0x70] sm:$0xff]  ;;  %v5888_v1 = vld [vmem:[%s8906_s7 + $0x60] sm:$0xff]  ;;  %s4657_s11 = sshll.u32 %s4652_s28, 5  ;;  %v8908_v2 = vmov 2   ;;  %v5900_v4 = vld [vmem:[%s8906_s7 + $0x78] sm:$0xff]  ;;  %vm397_vm0 = vcmask 523264  }
   0xe   : > { %5713 = vset.pattern.permute.xlu1 %v8908_v2  ;;  %5712 = vset.pattern.permute.xlu0 %v8908_v2  ;;  %v5758_v3 = vld [vmem:[%s8900_s1] sm:$0xff]   ;;  %p298_p3 = scmp.lt.s32.totalorder %s4657_s11, 63  ;;  %v5905_v5 = vld [vmem:[%s8906_s7 + $0x68] sm:$0xff]  ;;  %v5760_v7 = vld [vmem:[%s8900_s1 + $0x10] sm:$0xff]   ;;  %v5824_v54 = vmov 0   ;;  %v8912_v60 = vmov 3  }
   0xf   : > { %987 = vperm.xlu1 %5713, %v5883_v0   ;;  %979 = vperm.xlu0 %5712, %v5888_v1   ;;  %v5759_v6 = vld [vmem:[%s8900_s1 + $0x8] sm:$0xff]   ;;  %v5933_v9 = vld [vmem:[%s8906_s7 + $0x80] sm:$0xff]  ;;  %v5761_v13 = vld [vmem:[%s8900_s1 + $0x18] sm:$0xff]   ;;  %vm1133_vm3 = vcmask 130048  }
  0x10   : > { %5062 = vmatprep.subr.bf16.mxu0 %v5758_v3  ;;  %s9861_s11 = smov (!%p298_p3, %s4657_s11), 63  ;;  %v5921_v8 = vld [vmem:[%s8906_s7 + $0x88] sm:$0xff]  ;;  %v5945_v14 = vld [vmem:[%s8906_s7 + $0x98] sm:$0xff]  ;;  %v5950_v15 = vld [vmem:[%s8906_s7 + $0x90] sm:$0xff] }
  0x11   : > { %5063 = vmatpush3.bf16.msra.mxu0 %v5758_v3  ;;  %s4658_s22 = sshll.u32 %s9861_s11, 3  ;;  %v5962_v20 = vld [vmem:[%s8906_s7 + $0xa8] sm:$0xff]  ;;  %v5967_v21 = vld [vmem:[%s8906_s7 + $0xa0] sm:$0xff]  ;;  %v5975_v24 = vld [vmem:[%s8906_s7 + $0xb8] sm:$0xff] }
  0x12   : > { %5064 = vmatprep.subr.bf16.mxu0 %v5759_v6  ;;  %s5928_s28 = scalar_lea.vmem %s8899_s0, %s4658_s22  ;;  %v5980_v25 = vld [vmem:[%s8906_s7 + $0xb0] sm:$0xff]  ;;  %v5992_v30 = vld [vmem:[%s8906_s7 + $0xc8] sm:$0xff]  ;;  %v5997_v31 = vld [vmem:[%s8906_s7 + $0xc0] sm:$0xff]  ;;  %s8770_s25 = scalar_lea.vmem %s8907_s8, %s4658_s22 }
  0x13   : > { %991 = vperm.xlu1 %5713, %v5900_v4   ;;  %983 = vperm.xlu0 %5712, %v5905_v5   ;;  %v310_v10 = vld [vmem:[%s5928_s28] sm:$0xff]  ;;  %v311_v11 = vld [vmem:[%s5928_s28 + $0x8] sm:$0xff]  ;;  %v312_v16 = vld [vmem:[%s5928_s28 + $0x10] sm:$0xff] }
  0x14   : > { %v342_v12 = vpack.c.bf16 %v311_v11, %v310_v10  ;;  %v313_v17 = vld [vmem:[%s5928_s28 + $0x18] sm:$0xff]  ;;  %v314_v18 = vld [vmem:[%s5928_s28 + $0x20] sm:$0xff]  ;;  %v315_v19 = vld [vmem:[%s5928_s28 + $0x28] sm:$0xff] }
  0x15   : > { %5065 = vmatpush3.bf16.msra.mxu0 %v5759_v6  ;;  %v343_v22 = vpack.c.bf16 %v313_v17, %v312_v16  ;;  %v344_v23 = vpack.c.bf16 %v315_v19, %v314_v18  ;;  %v316_v26 = vld [vmem:[%s5928_s28 + $0x30] sm:$0xff]  ;;  %v317_v27 = vld [vmem:[%s5928_s28 + $0x38] sm:$0xff]  ;;  %v318_v28 = vld [vmem:[%s5928_s28 + $0x40] sm:$0xff] }
  0x16   : > { %5066 = vmatprep.subr.bf16.mxu0 %v5760_v7  ;;  %5070 = vmatprep.mubr.msk.bf16.mxu0 %vm397_vm0, %v342_v12  ;;  %v319_v29 = vld [vmem:[%s5928_s28 + $0x48] sm:$0xff]  ;;  %v345_v32 = vpack.c.bf16 %v317_v27, %v316_v26  ;;  %v6002_v34 = vld [vmem:[%s8906_s7 + $0xd8] sm:$0xff]  ;;  %v6007_v35 = vld [vmem:[%s8906_s7 + $0xd0] sm:$0xff] }
  0x17   : > { %999 = vperm.xlu1 %5713, %v5921_v8   ;;  %995 = vperm.xlu0 %5712, %v5933_v9   ;;  %v346_v33 = vpack.c.bf16 %v319_v29, %v318_v28  ;;  %v320_v36 = vld [vmem:[%s5928_s28 + $0x50] sm:$0xff]  ;;  %v321_v37 = vld [vmem:[%s5928_s28 + $0x58] sm:$0xff]  ;;  %v322_v38 = vld [vmem:[%s5928_s28 + $0x60] sm:$0xff] }
  0x18   : > { %v323_v39 = vld [vmem:[%s5928_s28 + $0x68] sm:$0xff]  ;;  %v6025_v41 = vld [vmem:[%s8906_s7 + $0xe0] sm:$0xff]  ;;  %v347_v42 = vpack.c.bf16 %v321_v37, %v320_v36  ;;  %v6035_v44 = vld [vmem:[%s8906_s7 + $0xf8] sm:$0xff] }
  0x19   : > { %5067 = vmatpush3.bf16.msra.mxu0 %v5760_v7  ;;  %v6020_v40 = vld [vmem:[%s8906_s7 + $0xe8] sm:$0xff]  ;;  %v348_v43 = vpack.c.bf16 %v323_v39, %v322_v38  ;;  %v6040_v45 = vld [vmem:[%s8906_s7 + $0xf0] sm:$0xff]  ;;  %v325_v47 = vld [vmem:[%s5928_s28 + $0x78] sm:$0xff] }
  0x1a   : > { %5068 = vmatprep.subr.bf16.mxu0 %v5761_v13  ;;  %v324_v46 = vld [vmem:[%s5928_s28 + $0x70] sm:$0xff]  ;;  %v326_v48 = vld [vmem:[%s5928_s28 + $0x80] sm:$0xff]  ;;  %v327_v49 = vld [vmem:[%s5928_s28 + $0x88] sm:$0xff] }
  0x1b   : > { %1007 = vperm.xlu1 %5713, %v5945_v14   ;;  %1003 = vperm.xlu0 %5712, %v5950_v15   ;;  %v6052_v50 = vld [vmem:[%s8906_s7 + $0x8] sm:$0xff]  ;;  %v6057_v51 = vld [vmem:[%s8906_s7] sm:$0xff]  ;;  %v349_v52 = vpack.c.bf16 %v325_v47, %v324_v46  ;;  %v350_v53 = vpack.c.bf16 %v327_v49, %v326_v48  ;;  %v328_v56 = vld [vmem:[%s5928_s28 + $0x90] sm:$0xff]  ;;  %v8910_v49 = vmov 1  }
  0x1c   : > { %v6067_v55 = vld [vmem:[%s8906_s7 + $0x20] sm:$0xff]  ;;  %v329_v57 = vld [vmem:[%s5928_s28 + $0x98] sm:$0xff]  ;;  %v331_v59 = vld [vmem:[%s5928_s28 + $0xa8] sm:$0xff] }
  0x1d   : > { %5069 = vmatpush3.bf16.msra.mxu0 %v5761_v13  ;;  %v330_v58 = vld [vmem:[%s5928_s28 + $0xa0] sm:$0xff]  ;;  %v351_v62 = vpack.c.bf16 %v329_v57, %v328_v56  ;;  %v6085_v3 = vld [vmem:[%s8906_s7 + $0x10] sm:$0xff]  ;;  %v333_v7 = vld [vmem:[%s5928_s28 + $0xb8] sm:$0xff] }
  0x1e   : > { %v6080_v61 = vld [vmem:[%s8906_s7 + $0x40] sm:$0xff]  ;;  %v352_v63 = vpack.c.bf16 %v331_v59, %v330_v58  ;;  %v332_v6 = vld [vmem:[%s5928_s28 + $0xb0] sm:$0xff]  ;;  %v6097_v10 = vld [vmem:[%s8906_s7 + $0x18] sm:$0xff] }
  0x1f   : > { %1015 = vperm.xlu1 %5713, %v5962_v20   ;;  %1011 = vperm.xlu0 %5712, %v5967_v21   ;;  %v334_v11 = vld [vmem:[%s5928_s28 + $0xc0] sm:$0xff]  ;;  %v335_v12 = vld [vmem:[%s5928_s28 + $0xc8] sm:$0xff]  ;;  %v353_v13 = vpack.c.bf16 %v333_v7, %v332_v6  ;;  %v336_v17 = vld [vmem:[%s5928_s28 + $0xd0] sm:$0xff] }
  0x20   : > { %5071 = vmatmul.mubr.msk.bf16.vlgmr.msra.gmra.mrb[0].mxu0 %vm397_vm0, %v343_v22  ;;  %v354_v16 = vpack.c.bf16 %v335_v12, %v334_v11  ;;  %v337_v18 = vld [vmem:[%s5928_s28 + $0xd8] sm:$0xff]  ;;  %v338_v19 = vld [vmem:[%s5928_s28 + $0xe0] sm:$0xff]  ;;  %v339_v22 = vld [vmem:[%s5928_s28 + $0xe8] sm:$0xff] }
  0x21   : > { %5074 = vmatprep.mubr.msk.bf16.mxu0 %vm397_vm0, %v344_v23  ;;  %v6116_v23 = vld [vmem:[%s8906_s7 + $0x28] sm:$0xff]  ;;  %v355_v26 = vpack.c.bf16 %v337_v18, %v336_v17  ;;  %v356_v27 = vpack.c.bf16 %v339_v22, %v338_v19  ;;  %v340_v28 = vld [vmem:[%s5928_s28 + $0xf0] sm:$0xff]  ;;  %v341_v29 = vld [vmem:[%s5928_s28 + $0xf8] sm:$0xff] }
  0x22   : > { %v6141_v36 = vld [vmem:[%s8906_s7 + $0x38] sm:$0xff]  ;;  %v6151_v37 = vld [vmem:[%s8906_s7 + $0x48] sm:$0xff]  ;;  %v6160_v38 = vld [vmem:[%s8906_s7 + $0x50] sm:$0xff] }
  0x23   : > { %1023 = vperm.xlu1 %5713, %v5975_v24   ;;  %1019 = vperm.xlu0 %5712, %v5980_v25   ;;  %v6171_v39 = vld [vmem:[%s8906_s7 + $0x58] sm:$0xff]  ;;  %v6226_v56 = vld [vmem:[%s8902_s3 + $0x20] sm:$0xff]   ;;  %v5764_v18 = vld [vmem:[%s8902_s3 + $0x8] sm:$0xff]  }
  0x24   : > { %v5762_v48 = vld [vmem:[%s8902_s3 + $0x18] sm:$0xff]   ;;  %5102 = vmatprep.subr.bf16.mxu0 %v5764_v18 }
  0x25   : > { %5442 = vmatprep.subr.bf16.mxu1 %v5762_v48  ;;  %5103 = vmatpush3.bf16.msra.mxu0 %v5764_v18 }
  0x26   : > { %5443 = vmatpush3.bf16.msra.mxu1 %v5762_v48 }
  0x27   : > { %1031 = vperm.xlu1 %5713, %v5992_v30   ;;  %1027 = vperm.xlu0 %5712, %v5997_v31  }
  0x28   : > { %5075 = vmatmul.mubr.msk.bf16.gmra.mrb[4].mxu0 %vm397_vm0, %v345_v32  ;;  %v357_v32 = vpack.c.bf16 %v341_v29, %v340_v28  ;;  %5238 = vmatprep.subr.bf16.mxu1 %v6226_v56 }
  0x29   : > { %5078 = vmatprep.mubr.msk.bf16.mxu0 %vm397_vm0, %v346_v33  ;;  %v6131_v33 = vld [vmem:[%s8906_s7 + $0x30] sm:$0xff] }
  0x2b   : > { %1039 = vperm.xlu1 %5713, %v6002_v34   ;;  %1035 = vperm.xlu0 %5712, %v6007_v35  }
  0x2f   : > { %1047 = vperm.xlu1 %5713, %v6020_v40   ;;  %1043 = vperm.xlu0 %5712, %v6025_v41  }
  0x30   : > { %5079 = vmatmul.mubr.msk.bf16.gmra.mrb[8].mxu0 %vm397_vm0, %v347_v42 }
  0x31   : > { %5082 = vmatprep.mubr.msk.bf16.mxu0 %vm397_vm0, %v348_v43 }
  0x33   : > { %1055 = vperm.xlu1 %5713, %v6035_v44   ;;  %1051 = vperm.xlu0 %5712, %v6040_v45  }
  0x37   : > { %5715 = vset.pattern.permute.xlu1 %v5824_v54  ;;  %5714 = vset.pattern.permute.xlu0 %v5824_v54 }
  0x38   : > { %678 = vperm.xlu1 %5715, %v6052_v50   ;;  %673 = vperm.xlu0 %5714, %v6057_v51  }
  0x39   : > { %5083 = vmatmul.mubr.msk.bf16.gmra.mrb[12].mxu0 %vm397_vm0, %v349_v52 }
  0x3a   : > { %5086 = vmatprep.mubr.msk.bf16.mxu0 %vm397_vm0, %v350_v53 }
  0x3c   : > { %5716 = vset.pattern.permute.xlu1 %v8912_v60  ;;  %693 = vperm.xlu0 %5714, %v6067_v55  }
  0x3d   : > { %1624 = vperm.xlu1 %5716, %v6057_v51  }
  0x40   : > { %713 = vperm.xlu0 %5714, %v6080_v61  }
  0x41   : > { %5087 = vmatmul.mubr.msk.bf16.gmra.mrb[16].mxu0 %vm397_vm0, %v351_v62  ;;  %5717 = vset.pattern.permute.xlu1 %v5824_v54 }
  0x42   : > { %683 = vperm.xlu1 %5717, %v6085_v3   ;;  %5090 = vmatprep.mubr.msk.bf16.mxu0 %vm397_vm0, %v352_v63 }
  0x44   : > { %733 = vperm.xlu0 %5714, %v5888_v1  }
  0x46   : > { %688 = vperm.xlu1 %5717, %v6097_v10  }
  0x48   : > { %753 = vperm.xlu0 %5714, %v5933_v9  }
  0x49   : > { %5091 = vmatmul.mubr.msk.bf16.gmra.mrb[20].mxu0 %vm397_vm0, %v353_v13 }
  0x4a   : > { %5718 = vset.pattern.permute.xlu1 %v8912_v60  ;;  %5094 = vmatprep.mubr.msk.bf16.mxu0 %vm397_vm0, %v354_v16 }
  0x4b   : > { %1636 = vperm.xlu1 %5718, %v6097_v10  }
  0x4c   : > { %773 = vperm.xlu0 %5714, %v5967_v21  }
  0x4f   : > { %5719 = vset.pattern.permute.xlu1 %v5824_v54 }
  0x50   : > { %698 = vperm.xlu1 %5719, %v6116_v23   ;;  %793 = vperm.xlu0 %5714, %v5997_v31  }
  0x51   : > { %5095 = vmatmul.mubr.msk.bf16.gmra.mrb[24].mxu0 %vm397_vm0, %v355_v26 }
  0x52   : > { %5098 = vmatprep.mubr.msk.bf16.mxu0 %vm397_vm0, %v356_v27 }
  0x54   : > { %5720 = vset.pattern.permute.xlu1 %v8912_v60  ;;  %813 = vperm.xlu0 %5714, %v6025_v41  }
  0x55   : > { %1640 = vperm.xlu1 %5720, %v6067_v55  }
  0x58   : > { %5743 = vset.pattern.permute.xlu0 %v8912_v60 }
  0x59   : > { %5099 = vmatmul.mubr.msk.bf16.gmra.mrb[28].mxu0 %vm397_vm0, %v357_v32  ;;  %5721 = vset.pattern.permute.xlu1 %v5824_v54 }
  0x5a   : > { %1628 = vperm.xlu0 %5743, %v6052_v50   ;;  %703 = vperm.xlu1 %5721, %v6131_v33  }
  0x5e   : > { %1632 = vperm.xlu0 %5743, %v6085_v3   ;;  %708 = vperm.xlu1 %5721, %v6141_v36  }
  0x62   : > { %1644 = vperm.xlu0 %5743, %v6116_v23   ;;  %5722 = vset.pattern.permute.xlu1 %v8912_v60 }
  0x63   : > { %1652 = vperm.xlu1 %5722, %v6141_v36  }
  0x66   : > { %1648 = vperm.xlu0 %5743, %v6131_v33  }
  0x67   : > { %5723 = vset.pattern.permute.xlu1 %v5824_v54 }
  0x68   : > { %718 = vperm.xlu1 %5723, %v6151_v37  }
  0x6a   : > { %1660 = vperm.xlu0 %5743, %v6151_v37  }
  0x6c   : > { %5724 = vset.pattern.permute.xlu1 %v8912_v60 }
  0x6d   : > { %1656 = vperm.xlu1 %5724, %v6080_v61  }
  0x6e   : > { %1664 = vperm.xlu0 %5743, %v6160_v38  }
  0x71   : > { %5725 = vset.pattern.permute.xlu1 %v5824_v54 }
  0x72   : > { %1676 = vperm.xlu0 %5743, %v5905_v5   ;;  %723 = vperm.xlu1 %5725, %v6160_v38  }
  0x76   : > { %1680 = vperm.xlu0 %5743, %v5883_v0   ;;  %728 = vperm.xlu1 %5725, %v6171_v39  }
  0x7a   : > { %1692 = vperm.xlu0 %5743, %v5921_v8   ;;  %5726 = vset.pattern.permute.xlu1 %v8912_v60 }
  0x7b   : > { %1668 = vperm.xlu1 %5726, %v6171_v39  }
  0x7e   : > { %1696 = vperm.xlu0 %5743, %v5950_v15  }
  0x7f   : > { %5727 = vset.pattern.permute.xlu1 %v5824_v54 }
  0x80   : > { %738 = vperm.xlu1 %5727, %v5905_v5  }
  0x82   : > { %1708 = vperm.xlu0 %5743, %v5962_v20  }
  0x84   : > { %5728 = vset.pattern.permute.xlu1 %v8912_v60 }
  0x85   : > { %1672 = vperm.xlu1 %5728, %v5888_v1  }
  0x86   : > { %1712 = vperm.xlu0 %5743, %v5980_v25  }
  0x89   : > { %5729 = vset.pattern.permute.xlu1 %v5824_v54 }
  0x8a   : > { %1724 = vperm.xlu0 %5743, %v5992_v30   ;;  %743 = vperm.xlu1 %5729, %v5883_v0  }
  0x8e   : > { %1728 = vperm.xlu0 %5743, %v6007_v35   ;;  %v6189_v42 = vpop.permute.xlu1 %987  ;;  %748 = vperm.xlu1 %5729, %v5900_v4   ;;  %v6192_v43 = vpop.permute.xlu0 %979 }
  0x8f   : > { %9177 = vst [vmem:[#allocation2_spill] sm:$0xff] %v6189_v42  ;;  %9178 = vst [vmem:[#allocation3_spill] sm:$0xff] %v6192_v43 }
  0x92   : > { %1740 = vperm.xlu0 %5743, %v6020_v40   ;;  %v6195_v46 = vpop.permute.xlu1 %991  ;;  %5730 = vset.pattern.permute.xlu1 %v8912_v60  ;;  %v6198_v1 = vpop.permute.xlu0 %983 }
  0x93   : > { %9179 = vst [vmem:[#allocation4_spill] sm:$0xff] %v6195_v46  ;;  %9180 = vst [vmem:[#allocation5_spill] sm:$0xff] %v6198_v1  ;;  %1684 = vperm.xlu1 %5730, %v5900_v4  }
  0x96   : > { %1744 = vperm.xlu0 %5743, %v6040_v45   ;;  %v6202_v0 = vpop.permute.xlu1 %999  ;;  %v6204_v47 = vpop.permute.xlu0 %995 }
  0x97   : > { %9181 = vst [vmem:[#allocation6_spill] sm:$0xff] %v6202_v0  ;;  %9182 = vst [vmem:[#allocation7_spill] sm:$0xff] %v6204_v47  ;;  %5731 = vset.pattern.permute.xlu1 %v5824_v54 }
  0x98   : > { %758 = vperm.xlu1 %5731, %v5921_v8  }
  0x9a   : > { %5748 = vset.pattern.permute.xlu0 %v8910_v49  ;;  %v6212_v52 = vpop.permute.xlu1 %1007  ;;  %v6214_v4 = vpop.permute.xlu0 %1003 }
  0x9b   : > { %9183 = vst [vmem:[#allocation8_spill] sm:$0xff] %v6212_v52  ;;  %9184 = vst [vmem:[#allocation9_spill] sm:$0xff] %v6214_v4  ;;  %3040 = vperm.xlu0 %5748, %v6057_v51  }
  0x9c   : > { %5732 = vset.pattern.permute.xlu1 %v8912_v60 }
  0x9d   : > { %1688 = vperm.xlu1 %5732, %v5933_v9  }
  0x9e   : > { %v6219_v8 = vpop.permute.xlu1 %1015  ;;  %v6221_v53 = vpop.permute.xlu0 %1011 }
  0x9f   : > { %9185 = vst [vmem:[#allocation10_spill] sm:$0xff] %v6219_v8  ;;  %9186 = vst [vmem:[#allocation11_spill] sm:$0xff] %v6221_v53  ;;  %3048 = vperm.xlu0 %5748, %v6085_v3  }
  0xa1   : > { %5733 = vset.pattern.permute.xlu1 %v5824_v54 }
  0xa2   : > { %v6231_v57 = vpop.permute.xlu1 %1023  ;;  %763 = vperm.xlu1 %5733, %v5950_v15   ;;  %v6234_v58 = vpop.permute.xlu0 %1019 }
  0xa3   : > { %9187 = vst [vmem:[#allocation12_spill] sm:$0xff] %v6231_v57  ;;  %9188 = vst [vmem:[#allocation13_spill] sm:$0xff] %v6234_v58  ;;  %3060 = vperm.xlu0 %5748, %v6116_v23  }
  0xa6   : > { %v6237_v59 = vpop.permute.xlu1 %1031  ;;  %768 = vperm.xlu1 %5733, %v5945_v14   ;;  %v6240_v62 = vpop.permute.xlu0 %1027 }
  0xa7   : > { %9189 = vst [vmem:[#allocation14_spill] sm:$0xff] %v6237_v59  ;;  %9190 = vst [vmem:[#allocation15_spill] sm:$0xff] %v6240_v62  ;;  %3076 = vperm.xlu0 %5748, %v6151_v37  }
  0xaa   : > { %v6243_v63 = vpop.permute.xlu1 %1039  ;;  %5734 = vset.pattern.permute.xlu1 %v8912_v60  ;;  %v6246_v6 = vpop.permute.xlu0 %1035 }
  0xab   : > { %9191 = vst [vmem:[#allocation16_spill] sm:$0xff] %v6243_v63  ;;  %9192 = vst [vmem:[#allocation17_spill] sm:$0xff] %v6246_v6  ;;  %5754 = vset.pattern.permute.xlu0 %v8908_v2  ;;  %1700 = vperm.xlu1 %5734, %v5945_v14  }
  0xac   : > { %931 = vperm.xlu0 %5754, %v6057_v51  }
  0xae   : > { %v6251_v7 = vpop.permute.xlu1 %1047  ;;  %v6253_v11 = vpop.permute.xlu0 %1043 }
  0xaf   : > { %9193 = vst [vmem:[#allocation18_spill] sm:$0xff] %v6251_v7  ;;  %9194 = vst [vmem:[#allocation19_spill] sm:$0xff] %v6253_v11  ;;  %5735 = vset.pattern.permute.xlu1 %v5824_v54 }
  0xb0   : > { %943 = vperm.xlu0 %5754, %v6097_v10   ;;  %778 = vperm.xlu1 %5735, %v5962_v20  }
  0xb2   : > { %v6258_v12 = vpop.permute.xlu0 %1051  ;;  %v6260_v13 = vpop.permute.xlu1 %1055 }
  0xb3   : > { %9195 = vst [vmem:[#allocation20_spill] sm:$0xff] %v6258_v12  ;;  %9196 = vst [vmem:[#allocation21_spill] sm:$0xff] %v6260_v13  ;;  %v9229_v13 = vmov 2  }
  0xb4   : > { %947 = vperm.xlu0 %5754, %v6067_v55   ;;  %5736 = vset.pattern.permute.xlu1 %v8912_v60 }
  0xb5   : > { %1704 = vperm.xlu1 %5736, %v5967_v21  }
  0xb7   : > { %v6265_v14 = vpop.permute.xlu0 %673  ;;  %v6267_v51 = vpop.permute.xlu1 %678 }
  0xb8   : > { %9197 = vst [vmem:[#allocation22_spill] sm:$0xff] %v6265_v14  ;;  %9198 = vst [vmem:[#allocation23_spill] sm:$0xff] %v6267_v51  ;;  %959 = vperm.xlu0 %5754, %v6141_v36  }
  0xb9   : > { %5737 = vset.pattern.permute.xlu1 %v5824_v54 }
  0xba   : > { %783 = vperm.xlu1 %5737, %v5980_v25  }
  0xbb   : > { %v6272_v20 = vpop.permute.xlu0 %693 }
  0xbc   : > { %963 = vperm.xlu0 %5754, %v6080_v61   ;;  %v6275_v16 = vpop.permute.xlu1 %1624 }
  0xbd   : > { %9199 = vst [vmem:[#allocation24_spill] sm:$0xff] %v6275_v16 }
  0xbe   : > { %788 = vperm.xlu1 %5737, %v5975_v24  }
  0xbf   : > { %v6278_v17 = vpop.permute.xlu0 %713 }
  0xc0   : > { %975 = vperm.xlu0 %5754, %v6171_v39  }
  0xc1   : > { %v6284_v19 = vpop.permute.xlu1 %683 }
  0xc2   : > { %5738 = vset.pattern.permute.xlu1 %v8912_v60 }
  0xc3   : > { %1716 = vperm.xlu1 %5738, %v5975_v24   ;;  %v6288_v22 = vpop.permute.xlu0 %733 }
  0xc4   : > { %9200 = vst [vmem:[#allocation25_spill] sm:$0xff] %v6288_v22  ;;  %5757 = vset.pattern.permute.xlu0 %v8910_v49 }
  0xc5   : > { %3092 = vperm.xlu0 %5757, %v5905_v5   ;;  %v6292_v26 = vpop.permute.xlu1 %688 }
  0xc7   : > { %5739 = vset.pattern.permute.xlu1 %v5824_v54  ;;  %v6295_v27 = vpop.permute.xlu0 %753 }
  0xc8   : > { %798 = vperm.xlu1 %5739, %v5992_v30  }
  0xc9   : > { %3104 = vperm.xlu0 %5757, %v5933_v9  }
  0xca   : > { %v6299_v28 = vpop.permute.xlu1 %1636 }
  0xcb   : > { %9201 = vst [vmem:[#allocation26_spill] sm:$0xff] %v6299_v28  ;;  %v6301_v24 = vpop.permute.xlu0 %773 }
  0xcc   : > { %5740 = vset.pattern.permute.xlu1 %v8912_v60 }
  0xcd   : > { %3112 = vperm.xlu0 %5757, %v5950_v15   ;;  %1720 = vperm.xlu1 %5740, %v5997_v31  }
  0xcf   : > { %v6306_v5 = vpop.permute.xlu0 %793  ;;  %v6308_v29 = vpop.permute.xlu1 %698 }
  0xd0   : > { %9202 = vst [vmem:[#allocation27_spill] sm:$0xff] %v6306_v5 }
  0xd1   : > { %3120 = vperm.xlu0 %5757, %v5967_v21   ;;  %5741 = vset.pattern.permute.xlu1 %v5824_v54 }
  0xd2   : > { %803 = vperm.xlu1 %5741, %v6007_v35  }
  0xd3   : > { %v6313_v9 = vpop.permute.xlu0 %813 }
  0xd4   : > { %v6315_v30 = vpop.permute.xlu1 %1640 }
  0xd5   : > { %9203 = vst [vmem:[#allocation28_spill] sm:$0xff] %v6315_v30  ;;  %3128 = vperm.xlu0 %5757, %v5980_v25  }
  0xd6   : > { %808 = vperm.xlu1 %5741, %v6002_v34  }
  0xd9   : > { %3136 = vperm.xlu0 %5757, %v5997_v31   ;;  %v6320_v15 = vpop.permute.xlu0 %1628  ;;  %v6322_v32 = vpop.permute.xlu1 %703 }
  0xda   : > { %9204 = vst [vmem:[#allocation29_spill] sm:$0xff] %v6320_v15  ;;  %5742 = vset.pattern.permute.xlu1 %v8912_v60  ;;  %v9219_v15 = vmov 1  }
  0xdb   : > { %1732 = vperm.xlu1 %5742, %v6002_v34  }
  0xdd   : > { %3144 = vperm.xlu0 %5757, %v6007_v35   ;;  %v6327_v21 = vpop.permute.xlu0 %1632  ;;  %v6329_v48 = vpop.permute.xlu1 %708 }
  0xde   : > { %9205 = vst [vmem:[#allocation30_spill] sm:$0xff] %v6327_v21  ;;  %9206 = vst [vmem:[#allocation31_spill] sm:$0xff] %v6329_v48 }
  0xdf   : > { %5744 = vset.pattern.permute.xlu1 %v5824_v54 }
  0xe0   : > { %818 = vperm.xlu1 %5744, %v6020_v40  }
  0xe1   : > { %3152 = vperm.xlu0 %5757, %v6025_v41   ;;  %v6334_v25 = vpop.permute.xlu0 %1644 }
  0xe2   : > { %9207 = vst [vmem:[#allocation32_spill] sm:$0xff] %v6334_v25  ;;  %v6336_v31 = vpop.permute.xlu1 %1652 }
  0xe3   : > { %9208 = vst [vmem:[#allocation33_spill] sm:$0xff] %v6336_v31 }
  0xe4   : > { %5745 = vset.pattern.permute.xlu1 %v8912_v60 }
  0xe5   : > { %3160 = vperm.xlu0 %5757, %v6040_v45   ;;  %1736 = vperm.xlu1 %5745, %v6025_v41   ;;  %v6341_v34 = vpop.permute.xlu0 %1648  ;;  %v6359_v41 = vld [vmem:[%s8901_s2] ss:$0 sm:$0xff] }
  0xe6   : > { %9209 = vst [vmem:[#allocation34_spill] sm:$0xff] %v6341_v34 }
  0xe7   : > { %v6343_v35 = vpop.permute.xlu1 %718 }
  0xe8   : > { %9210 = vst [vmem:[#allocation35_spill] sm:$0xff] %v6343_v35 }
  0xe9   : > { %5746 = vset.pattern.permute.xlu1 %v5824_v54  ;;  %v6346_v18 = vpop.permute.xlu0 %1660  ;;  %v9216_v54 = vmov 3  }
  0xea   : > { %9211 = vst [vmem:[#allocation36_spill] sm:$0xff] %v6346_v18  ;;  %823 = vperm.xlu1 %5746, %v6040_v45  }
  0xec   : > { %v6349_v40 = vpop.permute.xlu1 %1656 }
  0xed   : > { %9212 = vst [vmem:[#allocation37_spill] sm:$0xff] %v6349_v40  ;;  %v6351_v2 = vpop.permute.xlu0 %1664 }
  0xee   : > { %9213 = vst [vmem:[#allocation38_spill] sm:$0xff] %v6351_v2  ;;  %828 = vperm.xlu1 %5746, %v6035_v44  }
  0xf1   : > { %v6354_v49 = vpop.permute.xlu0 %1676  ;;  %v6361_v60 = vpop.permute.xlu1 %723 }
  0xf2   : > { %9214 = vst [vmem:[#allocation39_spill] sm:$0xff] %v6354_v49  ;;  %9215 = vst [vmem:[#allocation40_spill] sm:$0xff] %v6361_v60  ;;  %5747 = vset.pattern.permute.xlu1 %v9216_v54  ;;  %v895_v49 = vlaneseq }
  0xf3   : > { %1748 = vperm.xlu1 %5747, %v6035_v44   ;;  %v5072_v45 = vpop.f32.mrb[0].mxu0 }
  0xf4   : > { %v489_v18 = vadd.f32 %v5072_v45, %v6359_v41  ;;  %v480_v40 = vpop.f32.mrb[1].mxu0 }
  0xf5   : > { %v6366_v2 = vpop.permute.xlu0 %1680  ;;  %v5073_v34 = vpop.f32.mrb[2].mxu0  ;;  %v481_v63 = vadd.f32 %v6359_v41, %v480_v40 }
  0xf6   : > { %9217 = vst [vmem:[#allocation41_spill] sm:$0xff] %v6366_v2  ;;  %v6368_v31 = vmax.f32 %v489_v18, 0.0  ;;  %v483_v30 = vpop.f32.mrb[3].mxu0  ;;  %v6370_v25 = vpop.permute.xlu1 %728  ;;  %v6383_v18 = vshrl.u32 %v895_v49, 7 }
  0xf7   : > { %9218 = vst [vmem:[#allocation42_spill] sm:$0xff] %v6370_v25  ;;  %v484_v16 = vadd.f32 %v6359_v41, %v483_v30  ;;  %5749 = vset.pattern.permute.xlu1 %v9219_v15 }
  0xf8   : > { %3044 = vperm.xlu1 %5749, %v6052_v50   ;;  %v6381_v45 = vmul.f32 %v6272_v20, %v6368_v31  ;;  %vm897_vm1 = vcmp.lt.s32.totalorder %v6383_v18, 1  ;;  %vm1590_vm2 = vcmp.lt.s32.totalorder %v6383_v18, 7  ;;  %v5771_v18 = vld [vmem:[%s8904_s5] sm:$0xff]  }
  0xf9   : > { %v6375_v54 = vmax.f32 %v484_v16, 0.0  ;;  %v6377_v21 = vpop.permute.xlu0 %1692 }
  0xfa   : > { %9221 = vst [vmem:[#allocation44_spill] sm:$0xff] %v6377_v21  ;;  %9222 = vst [vmem:[#allocation45_spill] sm:$0xff] %v6381_v45  ;;  %v6385_v28 = vpop.permute.xlu1 %1668  ;;  %v8931_v49 = vrot.slane %v6381_v45, 7 }
  0xfb   : > { %9220 = vst [vmem:[#allocation43_spill] sm:$0xff] %v6375_v54  ;;  %9223 = vst [vmem:[#allocation46_spill] sm:$0xff] %v6385_v28  ;;  %v5076_v22 = vpop.f32.mrb[4].mxu0  ;;  %v6389_v30 = vmul.f32 %v6292_v26, %v6375_v54 }
  0xfc   : > { %3164 = vperm.xlu1 %5749, %v6035_v44   ;;  %v6392_v60 = vpop.f32.mrb[5].mxu0 }
  0xfd   : > { %v6394_v16 = vpop.permute.xlu0 %1696  ;;  %v6396_v21 = vpop.f32.mrb[6].mxu0  ;;  %v8932_v20 = vrot.slane %v6389_v30, 7 }
  0xfe   : > { %9224 = vst [vmem:[#allocation47_spill] sm:$0xff] %v6394_v16  ;;  %v6400_v25 = vpop.f32.mrb[7].mxu0 }
  0xff   : > { %v6403_v28 = vpop.permute.xlu1 %738  ;;  %v6411_v44 = vsel %vm897_vm1, %v8932_v20, %v8931_v49  ;;  %v6434_v20 = vld [vmem:[%s8902_s3] sm:$0xff]  }
 0x100   : > { %9225 = vst [vmem:[#allocation48_spill] sm:$0xff] %v6403_v28  ;;  %9226 = vst [vmem:[#allocation49_spill] sm:$0xff] %v6411_v44  ;;  %3052 = vperm.xlu1 %5749, %v6097_v10   ;;  %5136 = vmatprep.subr.bf16.mxu0 %v6434_v20 }
 0x101   : > { %v6414_v26 = vpop.permute.xlu0 %1708  ;;  %9235 = vst [vmem:[#allocation57_spill] sm:$0xff] %v6434_v20 }
 0x102   : > { %9227 = vst [vmem:[#allocation50_spill] sm:$0xff] %v6414_v26  ;;  %v492_v26 = vadd.f32 %v5073_v34, %v6359_v41 }
 0x103   : > { %v6416_v35 = vpop.f32.mrb[8].mxu0 }
 0x104   : > { %9228 = vst [vmem:[#allocation51_spill] sm:$0xff] %v6416_v35  ;;  %5750 = vset.pattern.permute.xlu1 %v9229_v13  ;;  %v6419_v12 = vpop.f32.mrb[9].mxu0  ;;  %v6421_v11 = vpop.permute.xlu1 %1672  ;;  %v6466_v40 = vmax.f32 %v492_v26, 0.0 }
 0x105   : > { %9230 = vst [vmem:[#allocation52_spill] sm:$0xff] %v6419_v12  ;;  %9231 = vst [vmem:[#allocation53_spill] sm:$0xff] %v6421_v11  ;;  %935 = vperm.xlu1 %5750, %v6052_v50   ;;  %v6424_v28 = vpop.permute.xlu0 %1712  ;;  %v5081_v7 = vpop.f32.mrb[10].mxu0 }
 0x106   : > { %9232 = vst [vmem:[#allocation54_spill] sm:$0xff] %v6424_v28  ;;  %v6426_v5 = vpop.f32.mrb[11].mxu0  ;;  %v524_v51 = vadd.f32 %v5081_v7, %v6359_v41  ;;  %9243 = vst [vmem:[#allocation65_spill] sm:$0xff] %v6466_v40 }
 0x107   : > { %9233 = vst [vmem:[#allocation55_spill] sm:$0xff] %v6426_v5 }
 0x109   : > { %939 = vperm.xlu1 %5750, %v6085_v3   ;;  %v6429_v10 = vpop.permute.xlu0 %1724  ;;  %v744_v49 = vpop.permute.xlu1 %743 }
 0x10a   : > { %9234 = vst [vmem:[#allocation56_spill] sm:$0xff] %v6429_v10 }
 0x10c   : > { %v5084_v44 = vpop.f32.mrb[12].mxu0 }
 0x10d   : > { %v537_v50 = vadd.f32 %v5084_v44, %v6359_v41  ;;  %v528_v11 = vpop.f32.mrb[13].mxu0  ;;  %5751 = vset.pattern.permute.xlu1 %v9219_v15  ;;  %v6439_v28 = vpop.permute.xlu0 %1728 }
 0x10e   : > { %9236 = vst [vmem:[#allocation58_spill] sm:$0xff] %v6439_v28  ;;  %v529_v3 = vadd.f32 %v6359_v41, %v528_v11  ;;  %v5085_v12 = vpop.f32.mrb[14].mxu0  ;;  %3056 = vperm.xlu1 %5751, %v6067_v55   ;;  %v749_v10 = vpop.permute.xlu1 %748 }
 0x10f   : > { %v6445_v14 = vmax.f32 %v537_v50, 0.0  ;;  %v540_v20 = vadd.f32 %v5085_v12, %v6359_v41  ;;  %v531_v44 = vpop.f32.mrb[15].mxu0  ;;  %v6468_v50 = vmax.f32 %v524_v51, 0.0 }
 0x110   : > { %v6449_v6 = vmax.f32 %v529_v3, 0.0  ;;  %v532_v28 = vadd.f32 %v6359_v41, %v531_v44  ;;  %v6472_v44 = vmax.f32 %v481_v63, 0.0 }
 0x111   : > { %v6454_v11 = vmul.f32 %v6295_v27, %v6445_v14  ;;  %v6456_v55 = vpop.permute.xlu0 %1740  ;;  %v6470_v3 = vmax.f32 %v540_v20, 0.0  ;;  %v505_v27 = vadd.f32 %v5076_v22, %v6359_v41  ;;  %v6496_v20 = vmul.f32 %v6308_v29, %v6466_v40 }
 0x112   : > { %9237 = vst [vmem:[#allocation59_spill] sm:$0xff] %v6449_v6  ;;  %9239 = vst [vmem:[#allocation61_spill] sm:$0xff] %v6456_v55  ;;  %v6458_v34 = vmax.f32 %v532_v28, 0.0  ;;  %v6461_v7 = vmul.f32 %v744_v49, %v6449_v6  ;;  %3064 = vperm.xlu1 %5751, %v6131_v33   ;;  %v6464_v12 = vpop.permute.xlu1 %1684  ;;  %v2061_v51 = vrot.slane %v6449_v6, 7  ;;  %v497_v29 = vadd.f32 %v6359_v41, %v6392_v60 }
 0x113   : > { %9238 = vst [vmem:[#allocation60_spill] sm:$0xff] %v6454_v11  ;;  %9242 = vst [vmem:[#allocation64_spill] sm:$0xff] %v6464_v12  ;;  %v879_v55 = vrot.slane %v6454_v11, 7  ;;  %v1574_v62 = vrot.slane %v6454_v11, 1 }
 0x114   : > { %9240 = vst [vmem:[#allocation62_spill] sm:$0xff] %v6458_v34  ;;  %9241 = vst [vmem:[#allocation63_spill] sm:$0xff] %v6461_v7  ;;  %v6477_v28 = vmul.f32 %v749_v10, %v6458_v34  ;;  %v5088_v49 = vpop.f32.mrb[16].mxu0  ;;  %v2062_v63 = vrot.slane %v6458_v34, 7  ;;  %v9249_v5 = vrot.slane %v6461_v7, 7  ;;  %v9251_v35 = vrot.slane %v6461_v7, 1 }
 0x115   : > { %9244 = vst [vmem:[#allocation66_spill] sm:$0xff] %v6470_v3  ;;  %v544_v26 = vpop.f32.mrb[17].mxu0  ;;  %v6481_v59 = vpop.permute.xlu0 %1744  ;;  %9247 = vst [vmem:[#allocation69_spill] sm:$0xff] %v6496_v20  ;;  %v2063_v7 = vrot.slane %v6445_v14, 7 }
 0x116   : > { %9245 = vst [vmem:[#allocation67_spill] sm:$0xff] %v6477_v28  ;;  %9246 = vst [vmem:[#allocation68_spill] sm:$0xff] %v6481_v59  ;;  %v878_v22 = vrot.slane %v6477_v28, 7  ;;  %v1573_v10 = vrot.slane %v6477_v28, 1  ;;  %v5089_v54 = vpop.f32.mrb[18].mxu0  ;;  %3068 = vperm.xlu1 %5751, %v6141_v36   ;;  %v2099_v34 = vsel %vm897_vm1, %v2061_v51, %v2062_v63 }
 0x117   : > { %v547_v48 = vpop.f32.mrb[19].mxu0  ;;  %v759_v59 = vpop.permute.xlu1 %758 }
 0x118   : > { %v6500_v6 = vsel %vm897_vm1, %v878_v22, %v879_v55  ;;  %v6506_v36 = vsel %vm897_vm1, %v9249_v5, %v878_v22  ;;  %v1606_v11 = vsel %vm1590_vm2, %v1573_v10, %v1574_v62  ;;  %v1607_v28 = vsel %vm1590_vm2, %v9251_v35, %v1573_v10 }
 0x119   : > { %9248 = vst [vmem:[#allocation70_spill] sm:$0xff] %v6500_v6  ;;  %9250 = vst [vmem:[#allocation71_spill] sm:$0xff] %v6506_v36  ;;  %v6517_v40 = vmul.f32 %v6366_v2, %v1607_v28  ;;  %v6520_v6 = vmul.f32 %v6464_v12, %v1606_v11  ;;  %v9254_v5 = vrot.slane %v6468_v50, 7  ;;  %v6526_v36 = vmax.f32 %v505_v27, 0.0 }
 0x11a   : > { %v548_v35 = vadd.f32 %v6359_v41, %v547_v48  ;;  %v6531_v10 = vmul.f32 %v759_v59, %v6470_v3  ;;  %v3041_v60 = vpop.permute.xlu0 %3040  ;;  %5752 = vset.pattern.permute.xlu1 %v9229_v13  ;;  %v545_v28 = vadd.f32 %v6359_v41, %v544_v26  ;;  %v2126_v27 = vmul.f32 %v2099_v34, %v6198_v1 }
 0x11b   : > { %9252 = vst [vmem:[#allocation72_spill] sm:$0xff] %v6517_v40  ;;  %9253 = vst [vmem:[#allocation73_spill] sm:$0xff] %v6520_v6  ;;  %v2100_v22 = vsel %vm897_vm1, %v9254_v5, %v2061_v51  ;;  %v6538_v2 = vmul.f32 %v3041_v60, %v6368_v31  ;;  %951 = vperm.xlu1 %5752, %v6116_v23   ;;  %v9256_v5 = vrot.slane %v6470_v3, 7  ;;  %v6558_v40 = vmax.f32 %v497_v29, 0.0 }
 0x11c   : > { %v2125_v59 = vmul.f32 %v2100_v22, %v6192_v43  ;;  %v5092_v51 = vpop.f32.mrb[20].mxu0  ;;  %v2098_v26 = vsel %vm897_vm1, %v2062_v63, %v2063_v7  ;;  %v6550_v11 = vpop.permute.xlu1 %1688  ;;  %v508_v34 = vadd.f32 %v6396_v21, %v6359_v41  ;;  %v556_v23 = vadd.f32 %v5089_v54, %v6359_v41 }
 0x11d   : > { %9255 = vst [vmem:[#allocation74_spill] sm:$0xff] %v6538_v2  ;;  %v2097_v12 = vsel %vm897_vm1, %v2063_v7, %v9256_v5  ;;  %9257 = vst [vmem:[#allocation75_spill] sm:$0xff] %v6550_v11  ;;  %v6555_v60 = vmax.f32 %v548_v35, 0.0  ;;  %v1575_v22 = vrot.slane %v6531_v10, 1  ;;  %v560_v48 = vpop.f32.mrb[21].mxu0  ;;  %v553_v6 = vadd.f32 %v5088_v49, %v6359_v41 }
 0x11e   : > { %v9259_v5 = vrot.slane %v6531_v10, 7  ;;  %v2151_v63 = vpack.c.bf16 %v2126_v27, %v2125_v59  ;;  %v3049_v1 = vpop.permute.xlu0 %3048  ;;  %v5093_v21 = vpop.f32.mrb[22].mxu0  ;;  %v6567_v43 = vmax.f32 %v545_v28, 0.0  ;;  %v2127_v54 = vmul.f32 %v2098_v26, %v6189_v42 }
 0x11f   : > { %9258 = vst [vmem:[#allocation76_spill] sm:$0xff] %v6555_v60  ;;  %v2128_v35 = vmul.f32 %v2097_v12, %v6195_v46  ;;  %v6573_v29 = vsel %vm1590_vm2, %v1574_v62, %v1575_v22  ;;  %v563_v49 = vpop.f32.mrb[23].mxu0  ;;  %955 = vperm.xlu1 %5752, %v6131_v33   ;;  %v6581_v28 = vmul.f32 %v6284_v19, %v6472_v44  ;;  %v6583_v27 = vmax.f32 %v556_v23, 0.0  ;;  %v6592_v33 = vld [vmem:[%s8902_s3 + $0x28] sm:$0xff]  }
 0x120   : > { %v6565_v7 = vsel %vm897_vm1, %v879_v55, %v9259_v5  ;;  %9261 = vst [vmem:[#allocation78_spill] sm:$0xff] %v6567_v43  ;;  %9262 = vst [vmem:[#allocation79_spill] sm:$0xff] %v6573_v29  ;;  %v500_v55 = vadd.f32 %v6359_v41, %v6400_v25  ;;  %5218 = vmatprep.mubr.msk.bf16.mxu1 %vm1133_vm3, %v2151_v63  ;;  %v2066_v12 = vrot.slane %v6555_v60, 7  ;;  %v6594_v25 = vmax.f32 %v553_v6, 0.0 }
 0x121   : > { %9260 = vst [vmem:[#allocation77_spill] sm:$0xff] %v6565_v7  ;;  %9263 = vst [vmem:[#allocation80_spill] sm:$0xff] %v6581_v28  ;;  %v2152_v59 = vpack.c.bf16 %v2128_v35, %v2127_v54  ;;  %v6587_v62 = vmul.f32 %v3049_v1, %v6558_v40  ;;  %v764_v26 = vpop.permute.xlu1 %763  ;;  %v6598_v23 = vmax.f32 %v508_v34, 0.0  ;;  %v2065_v63 = vrot.slane %v6567_v43, 7 }
 0x122   : > { %9264 = vst [vmem:[#allocation81_spill] sm:$0xff] %v6583_v27  ;;  %9266 = vst [vmem:[#allocation83_spill] sm:$0xff] %v6594_v25  ;;  %v3061_v5 = vpop.permute.xlu0 %3060  ;;  %v6607_v54 = vmul.f32 %v6278_v17, %v6526_v36  ;;  %v6609_v6 = vmax.f32 %v500_v55, 0.0  ;;  %v561_v34 = vadd.f32 %v6359_v41, %v560_v48  ;;  %v564_v35 = vadd.f32 %v6359_v41, %v563_v49 }
 0x123   : > { %9265 = vst [vmem:[#allocation82_spill] sm:$0xff] %v6587_v62  ;;  %5219 = vmatmul.mubr.msk.bf16.vlgmr.msra.gmra.mrb[0].mxu1 %vm1133_vm3, %v2152_v59  ;;  %5753 = vset.pattern.permute.xlu1 %v9219_v15  ;;  %v6615_v19 = vmul.f32 %v764_v26, %v6567_v43  ;;  %v572_v11 = vadd.f32 %v5093_v21, %v6359_v41  ;;  %v9270_v7 = vrot.slane %v6470_v3, 7  ;;  %v9272_v2 = vrot.slane %v6531_v10, 7 }
 0x124   : > { %9267 = vst [vmem:[#allocation84_spill] sm:$0xff] %v6607_v54  ;;  %5239 = vmatpush3.bf16.msra.mxu1 %v6226_v56  ;;  %v5096_v59 = vpop.f32.mrb[24].mxu0  ;;  %3072 = vperm.xlu1 %5753, %v6080_v61   ;;  %v6621_v17 = vmul.f32 %v3061_v5, %v6598_v23  ;;  %v2095_v56 = vsel %vm897_vm1, %v2065_v63, %v2066_v12  ;;  %v2067_v61 = vrot.slane %v6594_v25, 7  ;;  %v6634_v29 = vmax.f32 %v564_v35, 0.0 }
 0x125   : > { %v576_v55 = vpop.f32.mrb[25].mxu0  ;;  %v769_v48 = vpop.permute.xlu1 %768  ;;  %5272 = vmatprep.subr.bf16.mxu1 %v6592_v33  ;;  %v6628_v49 = vmul.f32 %v6301_v24, %v6594_v25  ;;  %v881_v26 = vrot.slane %v6615_v19, 7  ;;  %v1576_v21 = vrot.slane %v6615_v19, 1  ;;  %v2096_v42 = vsel %vm897_vm1, %v9270_v7, %v2065_v63 }
 0x126   : > { %9268 = vst [vmem:[#allocation85_spill] sm:$0xff] %v6621_v17  ;;  %v3077_v1 = vpop.permute.xlu0 %3076  ;;  %v5097_v5 = vpop.f32.mrb[26].mxu0  ;;  %v569_v17 = vadd.f32 %v5092_v51, %v6359_v41  ;;  %9269 = vst [vmem:[#allocation86_spill] sm:$0xff] %v6634_v29  ;;  %v2130_v24 = vmul.f32 %v2095_v56, %v6202_v0  ;;  %v6641_v62 = vmax.f32 %v561_v34, 0.0  ;;  %v2129_v35 = vmul.f32 %v2096_v42, %v6204_v47 }
 0x127   : > { %v579_v46 = vpop.f32.mrb[27].mxu0  ;;  %v6647_v43 = vsel %vm897_vm1, %v9272_v2, %v881_v26  ;;  %v6651_v51 = vsel %vm1590_vm2, %v1575_v22, %v1576_v21  ;;  %v6655_v7 = vmax.f32 %v572_v11, 0.0  ;;  %v585_v63 = vadd.f32 %v5096_v59, %v6359_v41 }
 0x128   : > { %9271 = vst [vmem:[#allocation87_spill] sm:$0xff] %v6641_v62  ;;  %9273 = vst [vmem:[#allocation88_spill] sm:$0xff] %v6647_v43  ;;  %3080 = vperm.xlu1 %5753, %v6160_v38   ;;  %v9276_v34 = vrot.slane %v6583_v27, 7  ;;  %v2094_v2 = vsel %vm897_vm1, %v2066_v12, %v2067_v61  ;;  %v2153_v43 = vpack.c.bf16 %v2130_v24, %v2129_v35  ;;  %v2070_v59 = vrot.slane %v6634_v29, 7 }
 0x129   : > { %9274 = vst [vmem:[#allocation89_spill] sm:$0xff] %v6651_v51  ;;  %9275 = vst [vmem:[#allocation90_spill] sm:$0xff] %v6655_v7  ;;  %v2131_v22 = vmul.f32 %v2094_v2, %v6214_v4  ;;  %v6667_v42 = vmul.f32 %v769_v48, %v6555_v60  ;;  %v6672_v0 = vmax.f32 %v585_v63, 0.0  ;;  %v6675_v47 = vmul.f32 %v3077_v1, %v6468_v50 }
 0x12a   : > { %v2093_v56 = vsel %vm897_vm1, %v2067_v61, %v9276_v34  ;;  %v6669_v11 = vpop.permute.xlu1 %1700  ;;  %v6681_v12 = vmul.f32 %v6322_v32, %v6558_v40  ;;  %5222 = vmatprep.mubr.msk.bf16.mxu1 %vm1133_vm3, %v2153_v43  ;;  %v8983_v24 = vrot.slane %v6628_v49, 7  ;;  %v6688_v1 = vmax.f32 %v569_v17, 0.0 }
 0x12b   : > { %v2132_v51 = vmul.f32 %v2093_v56, %v6212_v52  ;;  %9277 = vst [vmem:[#allocation91_spill] sm:$0xff] %v6669_v11  ;;  %9278 = vst [vmem:[#allocation92_spill] sm:$0xff] %v6672_v0  ;;  %v6677_v34 = vpop.permute.xlu0 %931  ;;  %v882_v48 = vrot.slane %v6667_v42, 7  ;;  %v1577_v35 = vrot.slane %v6667_v42, 1  ;;  %v2069_v2 = vrot.slane %v6641_v62, 7 }
 0x12c   : > { %9279 = vst [vmem:[#allocation93_spill] sm:$0xff] %v6675_v47  ;;  %9280 = vst [vmem:[#allocation94_spill] sm:$0xff] %v6677_v34  ;;  %v5100_v63 = vpop.f32.mrb[28].mxu0  ;;  %3084 = vperm.xlu1 %5753, %v6171_v39   ;;  %v6694_v32 = vmul.f32 %v6313_v9, %v6672_v0  ;;  %v580_v9 = vadd.f32 %v6359_v41, %v579_v46  ;;  %v8989_v47 = vrot.slane %v6628_v49, 1 }
 0x12d   : > { %9281 = vst [vmem:[#allocation95_spill] sm:$0xff] %v6681_v12  ;;  %v2154_v61 = vpack.c.bf16 %v2132_v51, %v2131_v22  ;;  %9282 = vst [vmem:[#allocation96_spill] sm:$0xff] %v6688_v1  ;;  %v592_v43 = vpop.f32.mrb[29].mxu0  ;;  %v577_v22 = vadd.f32 %v6359_v41, %v576_v55  ;;  %v6703_v39 = vsel %vm897_vm1, %v882_v48, %v8983_v24  ;;  %v2696_v55 = vrot.slane %v6583_v27, 1 }
 0x12e   : > { %9283 = vst [vmem:[#allocation97_spill] sm:$0xff] %v6703_v39  ;;  %v6707_v17 = vsel %vm897_vm1, %v881_v26, %v882_v48  ;;  %v5101_v56 = vpop.f32.mrb[30].mxu0  ;;  %v588_v24 = vadd.f32 %v5097_v5, %v6359_v41  ;;  %v2091_v46 = vsel %vm897_vm1, %v2069_v2, %v2070_v59  ;;  %v1602_v52 = vsel %vm1590_vm2, %v1577_v35, %v8989_v47 }
 0x12f   : > { %5223 = vmatmul.mubr.msk.bf16.gmra.mrb[4].mxu1 %vm1133_vm3, %v2154_v61  ;;  %9284 = vst [vmem:[#allocation98_spill] sm:$0xff] %v6707_v17  ;;  %v1603_v61 = vsel %vm1590_vm2, %v1576_v21, %v1577_v35  ;;  %v6714_v51 = vpop.permute.xlu0 %943  ;;  %v595_v34 = vpop.f32.mrb[31].mxu0  ;;  %v2071_v21 = vrot.slane %v6688_v1, 7  ;;  %v9287_v5 = vrot.slane %v6594_v25, 1  ;;  %v9288_v26 = vrot.slane %v6583_v27, 7 }
 0x130   : > { %9285 = vst [vmem:[#allocation99_spill] sm:$0xff] %v6714_v51  ;;  %v6718_v39 = vmul.f32 %v6394_v16, %v1603_v61  ;;  %v779_v48 = vpop.permute.xlu1 %778  ;;  %5755 = vset.pattern.permute.xlu1 %v9229_v13  ;;  %v6738_v13 = vmax.f32 %v577_v22, 0.0  ;;  %v6740_v4 = vmax.f32 %v580_v9, 0.0  ;;  %v6743_v51 = vmul.f32 %v6669_v11, %v1602_v52 }
 0x131   : > { %v2721_v61 = vsel %vm1590_vm2, %v9287_v5, %v2696_v55  ;;  %v2092_v17 = vsel %vm897_vm1, %v9288_v26, %v2069_v2  ;;  %967 = vperm.xlu1 %5755, %v6151_v37   ;;  %v9292_v35 = vrot.slane %v6641_v62, 1  ;;  %v2134_v2 = vmul.f32 %v2091_v46, %v6219_v8 }
 0x132   : > { %9286 = vst [vmem:[#allocation100_spill] sm:$0xff] %v6718_v39  ;;  %9289 = vst [vmem:[#allocation101_spill] sm:$0xff] %v6738_v13  ;;  %v6750_v5 = vmul.f32 %v2721_v61, %v6394_v16  ;;  %v2133_v37 = vmul.f32 %v2092_v17, %v6221_v53  ;;  %v6759_v9 = vmax.f32 %v588_v24, 0.0  ;;  %v9297_v26 = vrot.slane %v6655_v7, 7  ;;  %v9322_v53 = vld [vmem:[#allocation23_spill] sm:$0xff] }
 0x133   : > { %9290 = vst [vmem:[#allocation102_spill] sm:$0xff] %v6740_v4  ;;  %9291 = vst [vmem:[#allocation103_spill] sm:$0xff] %v6743_v51  ;;  %v2720_v47 = vsel %vm1590_vm2, %v2696_v55, %v9292_v35  ;;  %v6757_v22 = vpop.permute.xlu0 %947  ;;  %v2073_v52 = vrot.slane %v6738_v13, 7 }
 0x134   : > { %9293 = vst [vmem:[#allocation104_spill] sm:$0xff] %v6750_v5  ;;  %v6753_v25 = vmul.f32 %v2720_v47, %v6669_v11  ;;  %9295 = vst [vmem:[#allocation106_spill] sm:$0xff] %v6757_v22  ;;  %v2089_v55 = vsel %vm897_vm1, %v2071_v21, %v9297_v26  ;;  %v2090_v47 = vsel %vm897_vm1, %v2070_v59, %v2071_v21  ;;  %v6769_v61 = vpop.permute.xlu1 %1704  ;;  %v2074_v11 = vrot.slane %v6740_v4, 7 }
 0x135   : > { %9296 = vst [vmem:[#allocation107_spill] sm:$0xff] %v6759_v9  ;;  %9298 = vst [vmem:[#allocation108_spill] sm:$0xff] %v6769_v61  ;;  %v2155_v46 = vpack.c.bf16 %v2134_v2, %v2133_v37  ;;  %v2135_v24 = vmul.f32 %v2090_v47, %v6234_v58  ;;  %v2136_v35 = vmul.f32 %v2089_v55, %v6231_v57  ;;  %971 = vperm.xlu1 %5755, %v6160_v38   ;;  %v9300_v38 = vld [vmem:[#allocation51_spill] sm:$0xff] }
 0x136   : > { %9294 = vst [vmem:[#allocation105_spill] sm:$0xff] %v6753_v25  ;;  %v593_v26 = vadd.f32 %v6359_v41, %v592_v43  ;;  %v604_v59 = vadd.f32 %v5101_v56, %v6359_v41  ;;  %v601_v21 = vadd.f32 %v5100_v63, %v6359_v41  ;;  %v596_v37 = vadd.f32 %v6359_v41, %v595_v34  ;;  %v9301_v56 = vld [vmem:[#allocation31_spill] sm:$0xff]  ;;  %v9312_v25 = vld [vmem:[#allocation14_spill] sm:$0xff] }
 0x137   : > { %5226 = vmatprep.mubr.msk.bf16.mxu1 %vm1133_vm3, %v2155_v46  ;;  %v2156_v17 = vpack.c.bf16 %v2136_v35, %v2135_v24  ;;  %v6784_v2 = vmul.f32 %v779_v48, %v6583_v27  ;;  %v6786_v55 = vpop.permute.xlu0 %959  ;;  %v6790_v47 = vadd.f32 %v9300_v38, %v6359_v41  ;;  %v2076_v43 = vrot.slane %v6759_v9, 7  ;;  %v9303_v63 = vld [vmem:[#allocation43_spill] sm:$0xff] }
 0x138   : > { %9299 = vst [vmem:[#allocation109_spill] sm:$0xff] %v6786_v55  ;;  %v6795_v16 = vmul.f32 %v9301_v56, %v6609_v6  ;;  %v9304_v24 = vld [vmem:[#allocation55_spill] sm:$0xff]  ;;  %v6804_v48 = vmax.f32 %v596_v37, 0.0  ;;  %v2075_v56 = vrot.slane %v6672_v0, 7  ;;  %v6810_v51 = vmax.f32 %v593_v26, 0.0 }
 0x139   : > { %v6801_v34 = vadd.f32 %v6359_v41, %v9304_v24  ;;  %5227 = vmatmul.mubr.msk.bf16.gmra.mrb[8].mxu1 %vm1133_vm3, %v2156_v17  ;;  %v884_v35 = vrot.slane %v6784_v2, 7  ;;  %v1579_v38 = vrot.slane %v6784_v2, 1  ;;  %5756 = vset.pattern.permute.xlu1 %v9219_v15  ;;  %v784_v39 = vpop.permute.xlu1 %783  ;;  %v6812_v46 = vmax.f32 %v604_v59, 0.0  ;;  %v5772_v17 = vld [vmem:[%s8906_s7 + $0x60] sm:$0xff]  ;;  %v9314_v57 = vld [vmem:[#allocation15_spill] sm:$0xff] }
 0x13a   : > { %9302 = vst [vmem:[#allocation51_spill] sm:$0xff] %v6795_v16  ;;  %9305 = vst [vmem:[#allocation31_spill] sm:$0xff] %v6804_v48  ;;  %v2087_v24 = vsel %vm897_vm1, %v2073_v52, %v2074_v11  ;;  %3088 = vperm.xlu1 %5756, %v5772_v17   ;;  %v6819_v37 = vmax.f32 %v601_v21, 0.0  ;;  %v9309_v5 = vrot.slane %v6628_v49, 7  ;;  %v9311_v26 = vrot.slane %v6655_v7, 7  ;;  %v9325_v27 = vld [vmem:[#allocation27_spill] sm:$0xff] }
 0x13b   : > { %9306 = vst [vmem:[#allocation43_spill] sm:$0xff] %v6810_v51  ;;  %9307 = vst [vmem:[#allocation55_spill] sm:$0xff] %v6812_v46  ;;  %v2138_v55 = vmul.f32 %v2087_v24, %v9312_v25  ;;  %v6832_v22 = vpop.permute.xlu0 %963  ;;  %v2085_v21 = vsel %vm897_vm1, %v2075_v56, %v2076_v43  ;;  %v2086_v17 = vsel %vm897_vm1, %v2074_v11, %v2075_v56  ;;  %v9318_v25 = vld [vmem:[#allocation16_spill] sm:$0xff]  ;;  %v2699_v56 = vrot.slane %v6688_v1, 1 }
 0x13c   : > { %9308 = vst [vmem:[#allocation110_spill] sm:$0xff] %v6819_v37  ;;  %v6825_v15 = vsel %vm897_vm1, %v9309_v5, %v884_v35  ;;  %v2088_v59 = vsel %vm897_vm1, %v9311_v26, %v2073_v52  ;;  %9313 = vst [vmem:[#allocation112_spill] sm:$0xff] %v6832_v22  ;;  %v9315_v5 = vrot.slane %v6628_v49, 1  ;;  %v2078_v52 = vrot.slane %v6804_v48, 7  ;;  %v9317_v26 = vld [vmem:[#allocation17_spill] sm:$0xff] }
 0x13d   : > { %9310 = vst [vmem:[#allocation111_spill] sm:$0xff] %v6825_v15  ;;  %v2137_v58 = vmul.f32 %v2088_v59, %v9314_v57  ;;  %v2139_v24 = vmul.f32 %v2086_v17, %v9317_v26  ;;  %v2140_v22 = vmul.f32 %v2085_v21, %v9318_v25  ;;  %v2698_v59 = vrot.slane %v6634_v29, 1  ;;  %v789_v57 = vpop.permute.xlu1 %788  ;;  %v9320_v25 = vld [vmem:[#allocation22_spill] sm:$0xff] }
 0x13e   : > { %v6843_v8 = vsel %vm1590_vm2, %v9315_v5, %v1579_v38  ;;  %v2077_v15 = vrot.slane %v6810_v51, 7  ;;  %v5773_v5 = vld [vmem:[%s8906_s7 + $0x70] sm:$0xff]  ;;  %v9319_v17 = vrot.slane %v6641_v62, 1  ;;  %v6861_v26 = vmul.f32 %v9320_v25, %v6819_v37 }
 0x13f   : > { %9316 = vst [vmem:[#allocation113_spill] sm:$0xff] %v6843_v8  ;;  %v2157_v11 = vpack.c.bf16 %v2138_v55, %v2137_v58  ;;  %3096 = vperm.xlu1 %5756, %v5773_v5   ;;  %v2158_v8 = vpack.c.bf16 %v2140_v22, %v2139_v24  ;;  %v6865_v58 = vmul.f32 %v9322_v53, %v6812_v46  ;;  %v6867_v55 = vpop.permute.xlu0 %975  ;;  %v2079_v53 = vrot.slane %v6819_v37, 7  ;;  %v9327_v5 = vld [vmem:[#allocation50_spill] sm:$0xff] }
 0x140   : > { %v2719_v21 = vsel %vm1590_vm2, %v9319_v17, %v2698_v59  ;;  %9321 = vst [vmem:[#allocation22_spill] sm:$0xff] %v6861_v26  ;;  %9324 = vst [vmem:[#allocation114_spill] sm:$0xff] %v6867_v55  ;;  %v6871_v60 = vmul.f32 %v9325_v27, %v6688_v1  ;;  %v2718_v22 = vsel %vm1590_vm2, %v2698_v59, %v2699_v56  ;;  %v9329_v55 = vld [vmem:[#allocation18_spill] sm:$0xff] }
 0x141   : > { %9323 = vst [vmem:[#allocation23_spill] sm:$0xff] %v6865_v58  ;;  %5230 = vmatprep.mubr.msk.bf16.mxu1 %vm1133_vm3, %v2157_v11  ;;  %v6877_v24 = vmul.f32 %v2719_v21, %v6769_v61  ;;  %v6880_v25 = vmul.f32 %v784_v39, %v6641_v62  ;;  %v6885_v17 = vmul.f32 %v2718_v22, %v9327_v5 }
 0x142   : > { %5231 = vmatmul.mubr.msk.bf16.gmra.mrb[12].mxu1 %vm1133_vm3, %v2158_v8  ;;  %v1108_v27 = vpack.c.bf16 %v6865_v58, %v6861_v26  ;;  %v2083_v11 = vsel %vm897_vm1, %v2077_v15, %v2078_v52  ;;  %v2084_v39 = vsel %vm897_vm1, %v2076_v43, %v2077_v15  ;;  %v5774_v8 = vld [vmem:[%s8906_s7 + $0x78] sm:$0xff]  ;;  %v6899_v22 = vpop.permute.xlu1 %1716  ;;  %v9331_v58 = vld [vmem:[#allocation19_spill] sm:$0xff]  ;;  %v9332_v26 = vrot.slane %v6812_v46, 7 }
 0x143   : > { %9326 = vst [vmem:[#allocation27_spill] sm:$0xff] %v6877_v24  ;;  %9328 = vst [vmem:[#allocation115_spill] sm:$0xff] %v6885_v17  ;;  %v885_v59 = vrot.slane %v6880_v25, 7  ;;  %v1580_v21 = vrot.slane %v6880_v25, 1  ;;  %v2142_v61 = vmul.f32 %v2083_v11, %v9329_v55  ;;  %3100 = vperm.xlu1 %5756, %v5774_v8   ;;  %v2141_v1 = vmul.f32 %v2084_v39, %v9331_v58  ;;  %v9335_v39 = vld [vmem:[#allocation20_spill] sm:$0xff]  ;;  %v9336_v24 = vld [vmem:[#allocation21_spill] sm:$0xff] }
 0x144   : > { %9330 = vst [vmem:[#allocation116_spill] sm:$0xff] %v6899_v22  ;;  %5104 = vmatprep.mubr.msk.bf16.mxu0 %vm1133_vm3, %v1108_v27  ;;  %v2081_v43 = vsel %vm897_vm1, %v2079_v53, %v9332_v26  ;;  %v2082_v15 = vsel %vm897_vm1, %v2078_v52, %v2079_v53  ;;  %v9333_v11 = vpack.c.bf16 %v6389_v30, %v6581_v28  ;;  %v9337_v17 = vld [vmem:[#allocation52_spill] sm:$0xff]  ;;  %v6934_v55 = vpop.permute.xlu0 %3092 }
 0x145   : > { %v6917_v8 = vsel %vm897_vm1, %v884_v35, %v885_v59  ;;  %v6921_v27 = vsel %vm1590_vm2, %v1579_v38, %v1580_v21  ;;  %v2143_v5 = vmul.f32 %v2082_v15, %v9335_v39  ;;  %v2144_v26 = vmul.f32 %v2081_v43, %v9336_v24  ;;  %9339 = vst [vmem:[#allocation52_spill] sm:$0xff] %v6934_v55  ;;  %v9340_v38 = vld [vmem:[#allocation57_spill] sm:$0xff]  ;;  %v9341_v43 = vld [vmem:[#allocation35_spill] sm:$0xff] }
 0x146   : > { %5105 = vmatmul.mubr.msk.bf16.vlgmr.msra.gmra.mrb[32].mxu0 %vm1133_vm3, %v9333_v11  ;;  %9334 = vst [vmem:[#allocation117_spill] sm:$0xff] %v6921_v27  ;;  %v513_v52 = vadd.f32 %v6359_v41, %v9337_v17  ;;  %v9338_v53 = vpack.c.bf16 %v6496_v20, %v6381_v45  ;;  %v2159_v11 = vpack.c.bf16 %v2142_v61, %v2141_v1  ;;  %v887_v15 = vrot.slane %v6871_v60, 7  ;;  %v5775_v1 = vld [vmem:[%s8906_s7 + $0x88] sm:$0xff] }
 0x147   : > { %v6932_v35 = vmul.f32 %v789_v57, %v6634_v29  ;;  %5137 = vmatpush3.bf16.msra.mxu0 %v9340_v38  ;;  %v2160_v27 = vpack.c.bf16 %v2144_v26, %v2143_v5  ;;  %v6940_v24 = vmul.f32 %v9341_v43, %v6598_v23  ;;  %v2700_v41 = vrot.slane %v6655_v7, 1  ;;  %3108 = vperm.xlu1 %5756, %v5775_v1   ;;  %v799_v26 = vpop.permute.xlu1 %798 }
 0x148   : > { %5108 = vmatprep.mubr.msk.bf16.mxu0 %vm1133_vm3, %v9338_v53  ;;  %5234 = vmatprep.mubr.msk.bf16.mxu1 %vm1133_vm3, %v2159_v11  ;;  %v1582_v5 = vrot.slane %v6871_v60, 1  ;;  %v2701_v17 = vrot.slane %v6738_v13, 1  ;;  %v6952_v53 = vmax.f32 %v6801_v34, 0.0  ;;  %v1111_v38 = vpack.c.bf16 %v6795_v16, %v6681_v12 }
 0x149   : > { %9342 = vst [vmem:[#allocation57_spill] sm:$0xff] %v6940_v24  ;;  %v886_v57 = vrot.slane %v6932_v35, 7  ;;  %v1581_v61 = vrot.slane %v6932_v35, 1  ;;  %v2717_v43 = vsel %vm1590_vm2, %v2699_v56, %v2700_v41  ;;  %v6959_v11 = vmul.f32 %v799_v26, %v6655_v7  ;;  %v9347_v26 = vld [vmem:[#allocation54_spill] sm:$0xff] }
 0x14a   : > { %9343 = vst [vmem:[#allocation35_spill] sm:$0xff] %v6952_v53  ;;  %5235 = vmatmul.mubr.msk.bf16.gmra.mrb[16].mxu1 %vm1133_vm3, %v2160_v27  ;;  %v9346_v56 = vpack.c.bf16 %v9303_v63, %v6472_v44  ;;  %v1112_v27 = vpack.c.bf16 %v6940_v24, %v6607_v54  ;;  %v7000_v24 = vpop.permute.xlu0 %3104  ;;  %v7006_v54 = vmax.f32 %v513_v52, 0.0 }
 0x14b   : > { %v6964_v1 = vsel %vm897_vm1, %v886_v57, %v887_v15  ;;  %v6968_v55 = vsel %vm897_vm1, %v885_v59, %v886_v57  ;;  %v1598_v34 = vsel %vm1590_vm2, %v1581_v61, %v1582_v5  ;;  %v1599_v20 = vsel %vm1590_vm2, %v1580_v21, %v1581_v61  ;;  %v6991_v21 = vld [vmem:[%s8902_s3 + $0x10] sm:$0xff]   ;;  %9353 = vst [vmem:[#allocation125_spill] sm:$0xff] %v7000_v24 }
 0x14c   : > { %9344 = vst [vmem:[#allocation118_spill] sm:$0xff] %v6964_v1  ;;  %9345 = vst [vmem:[#allocation119_spill] sm:$0xff] %v6968_v55  ;;  %5240 = vmatprep.mubr.msk.bf16.mxu1 %vm1133_vm3, %v9346_v56  ;;  %v6981_v12 = vmul.f32 %v9347_v26, %v1599_v20  ;;  %v6984_v59 = vmul.f32 %v6899_v22, %v1598_v34  ;;  %v2716_v57 = vsel %vm1590_vm2, %v2700_v41, %v2701_v17  ;;  %v5776_v34 = vld [vmem:[%s8906_s7 + $0x98] sm:$0xff]  ;;  %v9361_v24 = vld [vmem:[#allocation48_spill] sm:$0xff] }
 0x14d   : > { %9350 = vst [vmem:[#allocation122_spill] sm:$0xff] %v6991_v21  ;;  %v6994_v61 = vmul.f32 %v2717_v43, %v9347_v26  ;;  %v6997_v56 = vmul.f32 %v2716_v57, %v6899_v22  ;;  %v888_v20 = vrot.slane %v6959_v11, 7  ;;  %3116 = vperm.xlu1 %5756, %v5776_v34   ;;  %v2702_v41 = vrot.slane %v6740_v4, 1  ;;  %9354 = vst [vmem:[#allocation126_spill] sm:$0xff] %v7006_v54  ;;  %v7012_v22 = vpop.permute.xlu1 %1720  ;;  %v9357_v43 = vld [vmem:[#allocation42_spill] sm:$0xff] }
 0x14e   : > { %9348 = vst [vmem:[#allocation120_spill] sm:$0xff] %v6981_v12  ;;  %9349 = vst [vmem:[#allocation121_spill] sm:$0xff] %v6984_v59  ;;  %5109 = vmatmul.mubr.msk.bf16.gmra.mrb[36].mxu0 %vm1133_vm3, %v1111_v38  ;;  %v1583_v57 = vrot.slane %v6959_v11, 1  ;;  %5170 = vmatprep.subr.bf16.mxu0 %v6991_v21  ;;  %v7016_v26 = vmax.f32 %v6790_v47, 0.0  ;;  %v2703_v34 = vrot.slane %v6672_v0, 1  ;;  %v7028_v12 = vmul.f32 %v9357_v43, %v6952_v53  ;;  %v9360_v47 = vld [vmem:[#allocation65_spill] sm:$0xff]  ;;  %v7069_v39 = vpop.permute.xlu0 %3112 }
 0x14f   : > { %9351 = vst [vmem:[#allocation123_spill] sm:$0xff] %v6994_v61  ;;  %9352 = vst [vmem:[#allocation124_spill] sm:$0xff] %v6997_v56  ;;  %5112 = vmatprep.mubr.msk.bf16.mxu0 %vm1133_vm3, %v1112_v27  ;;  %v7023_v38 = vsel %vm897_vm1, %v887_v15, %v888_v20  ;;  %v2412_v27 = vpack.c.bf16 %v9360_v47, %v6368_v31  ;;  %v7038_v52 = vmul.f32 %v9361_v24, %v6468_v50  ;;  %v5777_v43 = vld [vmem:[%s8906_s7 + $0xa8] sm:$0xff]  ;;  %v9364_v56 = vld [vmem:[#allocation40_spill] sm:$0xff] }
 0x150   : > { %9355 = vst [vmem:[#allocation127_spill] sm:$0xff] %v7012_v22  ;;  %9356 = vst [vmem:[#allocation128_spill] sm:$0xff] %v7023_v38  ;;  %v7032_v59 = vsel %vm1590_vm2, %v1582_v5, %v1583_v57  ;;  %v2714_v15 = vsel %vm1590_vm2, %v2702_v41, %v2703_v34  ;;  %v2715_v61 = vsel %vm1590_vm2, %v2701_v17, %v2702_v41  ;;  %v7050_v5 = vld [vmem:[%s8902_s3 + $0x30] sm:$0xff]  }
 0x151   : > { %9358 = vst [vmem:[#allocation42_spill] sm:$0xff] %v7028_v12  ;;  %9359 = vst [vmem:[#allocation129_spill] sm:$0xff] %v7032_v59  ;;  %3124 = vperm.xlu1 %5756, %v5777_v43   ;;  %v7054_v24 = vmul.f32 %v9364_v56, %v7006_v54  ;;  %v2413_v59 = vpack.c.bf16 %v6609_v6, %v6558_v40  ;;  %v7059_v21 = vmul.f32 %v2715_v61, %v7012_v22  ;;  %v9367_v17 = vld [vmem:[#allocation56_spill] sm:$0xff]  ;;  %v9369_v43 = vld [vmem:[#allocation25_spill] sm:$0xff]  ;;  %v804_v58 = vpop.permute.xlu1 %803 }
 0x152   : > { %9362 = vst [vmem:[#allocation65_spill] sm:$0xff] %v7038_v52  ;;  %9363 = vst [vmem:[#allocation48_spill] sm:$0xff] %v7050_v5  ;;  %v7062_v41 = vmul.f32 %v2714_v15, %v9367_v17  ;;  %v7066_v16 = vmul.f32 %v9369_v43, %v7016_v26  ;;  %5241 = vmatmul.mubr.msk.bf16.vlgmr.msra.gmra.mrb[20].mxu1 %vm1133_vm3, %v2412_v27  ;;  %v7079_v43 = vmul.f32 %v804_v58, %v6738_v13  ;;  %v5778_v56 = vld [vmem:[%s8906_s7 + $0xb8] sm:$0xff]  ;;  %v9377_v22 = vld [vmem:[#allocation26_spill] sm:$0xff] }
 0x153   : > { %9365 = vst [vmem:[#allocation40_spill] sm:$0xff] %v7054_v24  ;;  %9366 = vst [vmem:[#allocation130_spill] sm:$0xff] %v7059_v21  ;;  %5273 = vmatpush3.bf16.msra.mxu1 %v6592_v33  ;;  %5244 = vmatprep.mubr.msk.bf16.mxu1 %vm1133_vm3, %v2413_v59  ;;  %v1113_v61 = vpack.c.bf16 %v7028_v12, %v7054_v24  ;;  %v2680_v33 = vrot.slane %v9360_v47, 1  ;;  %v9372_v21 = vrot.slane %v6558_v40, 1  ;;  %v891_v17 = vrot.slane %v6694_v32, 7 }
 0x154   : > { %9368 = vst [vmem:[#allocation131_spill] sm:$0xff] %v7062_v41  ;;  %9370 = vst [vmem:[#allocation25_spill] sm:$0xff] %v7066_v16  ;;  %v1114_v27 = vpack.c.bf16 %v7038_v52, %v7066_v16  ;;  %5306 = vmatprep.subr.bf16.mxu1 %v7050_v5  ;;  %v889_v59 = vrot.slane %v7079_v43, 7  ;;  %v1584_v15 = vrot.slane %v7079_v43, 1  ;;  %v2414_v24 = vpack.c.bf16 %v6598_v23, %v6526_v36 }
 0x155   : > { %9371 = vst [vmem:[#allocation132_spill] sm:$0xff] %v7069_v39  ;;  %3132 = vperm.xlu1 %5756, %v5778_v56   ;;  %v809_v58 = vpop.permute.xlu1 %808  ;;  %v2704_v39 = vrot.slane %v6759_v9, 1  ;;  %v2736_v56 = vsel %vm1590_vm2, %v2680_v33, %v9372_v21  ;;  %v2415_v12 = vpack.c.bf16 %v6952_v53, %v7006_v54  ;;  %v7113_v21 = vpop.permute.xlu0 %3120  ;;  %v9376_v5 = vrot.slane %v6368_v31, 1  ;;  %v9378_v54 = vld [vmem:[#allocation63_spill] sm:$0xff] }
 0x156   : > { %5113 = vmatmul.mubr.msk.bf16.gmra.mrb[40].mxu0 %vm1133_vm3, %v1113_v61  ;;  %v7099_v41 = vsel %vm897_vm1, %v888_v20, %v889_v59  ;;  %v7103_v61 = vsel %vm1590_vm2, %v1583_v57, %v1584_v15  ;;  %v7106_v16 = vmul.f32 %v809_v58, %v6740_v4  ;;  %9375 = vst [vmem:[#allocation135_spill] sm:$0xff] %v7113_v21  ;;  %v5779_v20 = vld [vmem:[%s8906_s7 + $0xc8] sm:$0xff]  ;;  %v2705_v57 = vrot.slane %v6810_v51, 1 }
 0x157   : > { %5116 = vmatprep.mubr.msk.bf16.mxu0 %vm1133_vm3, %v1114_v27  ;;  %9373 = vst [vmem:[#allocation133_spill] sm:$0xff] %v7099_v41  ;;  %9374 = vst [vmem:[#allocation134_spill] sm:$0xff] %v7103_v61  ;;  %v1586_v61 = vrot.slane %v6694_v32, 1  ;;  %v2737_v21 = vsel %vm1590_vm2, %v9376_v5, %v2680_v33  ;;  %v7128_v53 = vmul.f32 %v2736_v56, %v9377_v22  ;;  %v9384_v22 = vld [vmem:[#allocation58_spill] sm:$0xff] }
 0x158   : > { %v890_v58 = vrot.slane %v7106_v16, 7  ;;  %v1585_v27 = vrot.slane %v7106_v16, 1  ;;  %v2713_v38 = vsel %vm1590_vm2, %v2703_v34, %v2704_v39 }
 0x159   : > { %3140 = vperm.xlu1 %5756, %v5779_v20   ;;  %v9379_v20 = vld [vmem:[#allocation67_spill] sm:$0xff] }
 0x15a   : > { %v1115_v41 = vpack.c.bf16 %v9379_v20, %v9378_v54  ;;  %5245 = vmatmul.mubr.msk.bf16.gmra.mrb[24].mxu1 %vm1133_vm3, %v2414_v24  ;;  %v7138_v1 = vsel %vm897_vm1, %v890_v58, %v891_v17  ;;  %v7142_v5 = vsel %vm897_vm1, %v889_v59, %v890_v58  ;;  %v7144_v33 = vpop.permute.xlu1 %1732  ;;  %v1594_v56 = vsel %vm1590_vm2, %v1585_v27, %v1586_v61  ;;  %v9383_v20 = vld [vmem:[#allocation60_spill] sm:$0xff] }
 0x15b   : > { %5248 = vmatprep.mubr.msk.bf16.mxu1 %vm1133_vm3, %v2415_v12  ;;  %9380 = vst [vmem:[#allocation67_spill] sm:$0xff] %v7138_v1  ;;  %9381 = vst [vmem:[#allocation136_spill] sm:$0xff] %v7142_v5  ;;  %v1595_v24 = vsel %vm1590_vm2, %v1584_v15, %v1585_v27  ;;  %v1116_v34 = vpack.c.bf16 %v6531_v10, %v9383_v20  ;;  %v5780_v12 = vld [vmem:[%s8906_s7 + $0xd8] sm:$0xff]  ;;  %v7159_v59 = vmul.f32 %v7144_v33, %v1594_v56  ;;  %v9387_v5 = vld [vmem:[#allocation30_spill] sm:$0xff]  ;;  %v7174_v27 = vpop.permute.xlu0 %3128 }
 0x15c   : > { %9382 = vst [vmem:[#allocation137_spill] sm:$0xff] %v7144_v33  ;;  %v7156_v1 = vmul.f32 %v9384_v22, %v1595_v24  ;;  %v2712_v58 = vsel %vm1590_vm2, %v2704_v39, %v2705_v57  ;;  %v7164_v55 = vmul.f32 %v2737_v21, %v9387_v5  ;;  %v7168_v10 = vmul.f32 %v2713_v38, %v9384_v22  ;;  %v5781_v24 = vld [vmem:[%s8906_s7 + $0xe8] sm:$0xff] }
 0x15d   : > { %3148 = vperm.xlu1 %5756, %v5780_v12   ;;  %9386 = vst [vmem:[#allocation138_spill] sm:$0xff] %v7159_v59  ;;  %v7171_v15 = vmul.f32 %v2712_v58, %v7144_v33  ;;  %9390 = vst [vmem:[#allocation140_spill] sm:$0xff] %v7174_v27  ;;  %v2706_v21 = vrot.slane %v6804_v48, 1  ;;  %v2416_v38 = vpack.c.bf16 %v6468_v50, %v7016_v26  ;;  %v9392_v12 = vld [vmem:[#allocation62_spill] sm:$0xff]  ;;  %v2707_v39 = vrot.slane %v6819_v37, 1 }
 0x15e   : > { %9385 = vst [vmem:[#allocation60_spill] sm:$0xff] %v7156_v1  ;;  %5117 = vmatmul.mubr.msk.bf16.gmra.mrb[44].mxu0 %vm1133_vm3, %v1115_v41  ;;  %9388 = vst [vmem:[#allocation30_spill] sm:$0xff] %v7168_v10  ;;  %v1117_v41 = vpack.c.bf16 %v6667_v42, %v6615_v19  ;;  %v2418_v59 = vpack.c.bf16 %v6470_v3, %v6445_v14  ;;  %v9412_v3 = vld [vmem:[#allocation74_spill] sm:$0xff] }
 0x15f   : > { %9389 = vst [vmem:[#allocation139_spill] sm:$0xff] %v7171_v15  ;;  %5120 = vmatprep.mubr.msk.bf16.mxu0 %vm1133_vm3, %v1116_v34  ;;  %v819_v20 = vpop.permute.xlu1 %818  ;;  %v9391_v34 = vld [vmem:[#allocation59_spill] sm:$0xff]  ;;  %v2710_v22 = vsel %vm1590_vm2, %v2706_v21, %v2707_v39  ;;  %v7204_v1 = vpop.permute.xlu0 %3136  ;;  %v9403_v15 = vrot.slane %v6389_v30, 7 }
 0x160   : > { %v2417_v58 = vpack.c.bf16 %v9392_v12, %v9391_v34  ;;  %v7191_v56 = vmul.f32 %v819_v20, %v6759_v9  ;;  %v1118_v20 = vpack.c.bf16 %v6784_v2, %v6628_v49  ;;  %9393 = vst [vmem:[#allocation59_spill] sm:$0xff] %v7204_v1  ;;  %v9397_v2 = vld [vmem:[#allocation61_spill] sm:$0xff]  ;;  %v2678_v1 = vrot.slane %v9303_v63, 1 }
 0x161   : > { %3156 = vperm.xlu1 %5756, %v5781_v24  }
 0x162   : > { %5249 = vmatmul.mubr.msk.bf16.gmra.mrb[28].mxu1 %vm1133_vm3, %v2416_v38  ;;  %v892_v33 = vrot.slane %v7191_v56, 7  ;;  %v1587_v24 = vrot.slane %v7191_v56, 1 }
 0x163   : > { %5252 = vmatprep.mubr.msk.bf16.mxu1 %vm1133_vm3, %v2417_v58  ;;  %v2711_v58 = vsel %vm1590_vm2, %v2705_v57, %v2706_v21  ;;  %v9064_v57 = vrot.slane %v6368_v31, 7  ;;  %v9399_v21 = vld [vmem:[#allocation78_spill] sm:$0xff]  ;;  %v7236_v10 = vpop.permute.xlu0 %3144 }
 0x164   : > { %v7209_v38 = vsel %vm897_vm1, %v891_v17, %v892_v33  ;;  %v7211_v19 = vpop.permute.xlu1 %1736  ;;  %v7215_v42 = vsel %vm1590_vm2, %v1586_v61, %v1587_v24  ;;  %9401 = vst [vmem:[#allocation144_spill] sm:$0xff] %v7236_v10  ;;  %v2677_v17 = vrot.slane %v6472_v44, 1  ;;  %v9402_v61 = vrot.slane %v9360_v47, 7 }
 0x165   : > { %9394 = vst [vmem:[#allocation62_spill] sm:$0xff] %v7211_v19  ;;  %9395 = vst [vmem:[#allocation141_spill] sm:$0xff] %v7215_v42  ;;  %v7221_v49 = vmul.f32 %v2711_v58, %v7211_v19  ;;  %v1119_v58 = vpack.c.bf16 %v6932_v35, %v6880_v25  ;;  %v9404_v10 = vrot.slane %v6581_v28, 7 }
 0x166   : > { %5121 = vmatmul.mubr.msk.bf16.gmra.mrb[48].mxu0 %vm1133_vm3, %v1117_v41  ;;  %v7224_v41 = vmul.f32 %v2710_v22, %v9397_v2  ;;  %v2739_v25 = vsel %vm1590_vm2, %v2677_v17, %v2678_v1 }
 0x167   : > { %5124 = vmatprep.mubr.msk.bf16.mxu0 %vm1133_vm3, %v1118_v20  ;;  %9396 = vst [vmem:[#allocation142_spill] sm:$0xff] %v7221_v49  ;;  %v9400_v20 = vld [vmem:[#allocation76_spill] sm:$0xff]  ;;  %v7247_v49 = vsel %vm897_vm1, %v9064_v57, %v9402_v61  ;;  %v1120_v57 = vpack.c.bf16 %v6959_v11, %v6871_v60  ;;  %v7291_v61 = vpop.permute.xlu0 %3152  ;;  %v9408_v60 = vld [vmem:[#allocation83_spill] sm:$0xff]  ;;  %v9409_v11 = vld [vmem:[#allocation81_spill] sm:$0xff] }
 0x168   : > { %9398 = vst [vmem:[#allocation143_spill] sm:$0xff] %v7224_v41  ;;  %v2419_v27 = vpack.c.bf16 %v9400_v20, %v9399_v21  ;;  %v926_v20 = vsel %vm897_vm1, %v9404_v10, %v9403_v15  ;;  %v2708_v41 = vrot.slane %v6812_v46, 1  ;;  %9407 = vst [vmem:[#allocation146_spill] sm:$0xff] %v7291_v61  ;;  %v2420_v2 = vpack.c.bf16 %v9409_v11, %v9408_v60  ;;  %v9411_v61 = vld [vmem:[#allocation22_spill] sm:$0xff] }
 0x169   : > { %v824_v22 = vpop.permute.xlu1 %823 }
 0x16a   : > { %5253 = vmatmul.mubr.msk.bf16.gmra.mrb[0].mxu1 %vm1133_vm3, %v2418_v59  ;;  %v7254_v59 = vmul.f32 %v824_v22, %v6810_v51  ;;  %v9405_v22 = vrot.slane %v6368_v31, 1 }
 0x16b   : > { %5256 = vmatprep.mubr.msk.bf16.mxu1 %vm1133_vm3, %v2419_v27 }
 0x16c   : > { %v893_v35 = vrot.slane %v7254_v59, 7  ;;  %v1588_v27 = vrot.slane %v7254_v59, 1  ;;  %v2738_v10 = vsel %vm1590_vm2, %v2678_v1, %v9405_v22  ;;  %v2740_v1 = vsel %vm1590_vm2, %v2708_v41, %v2677_v17 }
 0x16d   : > { %v1122_v17 = vpack.c.bf16 %v7191_v56, %v6694_v32  ;;  %v9082_v32 = vrot.slane %v7038_v52, 7  ;;  %v3161_v56 = vpop.permute.xlu0 %3160 }
 0x16e   : > { %5125 = vmatmul.mubr.msk.bf16.gmra.mrb[52].mxu0 %vm1133_vm3, %v1119_v58  ;;  %v829_v58 = vpop.permute.xlu1 %828  ;;  %v7282_v21 = vsel %vm897_vm1, %v892_v33, %v893_v35  ;;  %v7286_v22 = vsel %vm1590_vm2, %v1587_v24, %v1588_v27  ;;  %v9410_v33 = vld [vmem:[#allocation29_spill] sm:$0xff]  ;;  %v2421_v24 = vpack.c.bf16 %v6634_v29, %v6641_v62  ;;  %v9420_v29 = vld [vmem:[#allocation99_spill] sm:$0xff] }
 0x16f   : > { %5128 = vmatprep.mubr.msk.bf16.mxu0 %vm1133_vm3, %v1120_v57  ;;  %9406 = vst [vmem:[#allocation145_spill] sm:$0xff] %v7286_v22  ;;  %v7289_v15 = vmul.f32 %v829_v58, %v6804_v48  ;;  %v2709_v57 = vsel %vm1590_vm2, %v2707_v39, %v2708_v41  ;;  %v7300_v19 = vmul.f32 %v2738_v10, %v9410_v33 }
 0x170   : > { %v1121_v39 = vpack.c.bf16 %v7106_v16, %v7079_v43  ;;  %v9413_v16 = vrot.slane %v9411_v61, 1  ;;  %v7345_v62 = vmul.f32 %v9420_v29, %v926_v20 }
 0x171   : > { %v9069_v58 = vrot.slane %v7289_v15, 7  ;;  %v1589_v22 = vrot.slane %v7289_v15, 1 }
 0x172   : > { %5257 = vmatmul.mubr.msk.bf16.gmra.mrb[4].mxu1 %vm1133_vm3, %v2420_v2  ;;  %v7321_v42 = vpop.permute.xlu1 %1748  ;;  %v9414_v2 = vld [vmem:[#allocation68_spill] sm:$0xff] }
 0x173   : > { %5260 = vmatprep.mubr.msk.bf16.mxu1 %vm1133_vm3, %v2421_v24  ;;  %v7319_v10 = vsel %vm897_vm1, %v893_v35, %v9069_v58  ;;  %v1591_v11 = vsel %vm1590_vm2, %v1588_v27, %v1589_v22  ;;  %v1622_v43 = vsel %vm1590_vm2, %v1589_v22, %v9413_v16  ;;  %v7330_v41 = vmul.f32 %v2709_v57, %v9414_v2  ;;  %v9419_v27 = vld [vmem:[#allocation82_spill] sm:$0xff]  ;;  %v9421_v22 = vld [vmem:[#allocation96_spill] sm:$0xff] }
 0x174   : > { %v7335_v24 = vmul.f32 %v9414_v2, %v1591_v11  ;;  %v7338_v35 = vmul.f32 %v7321_v42, %v1622_v43  ;;  %v7341_v60 = vmul.f32 %v2740_v1, %v7321_v42  ;;  %v2422_v57 = vpack.c.bf16 %v6655_v7, %v9421_v22  ;;  %v9422_v43 = vld [vmem:[#allocation24_spill] sm:$0xff]  ;;  %v9424_v1 = vld [vmem:[#allocation71_spill] sm:$0xff]  ;;  %v9432_v7 = vld [vmem:[#allocation6_spill] sm:$0xff] }
 0x175   : > { %9415 = vst [vmem:[#allocation68_spill] sm:$0xff] %v7330_v41  ;;  %v2423_v11 = vpack.c.bf16 %v6740_v4, %v6738_v13  ;;  %v2425_v16 = vpack.c.bf16 %v6804_v48, %v6810_v51  ;;  %v7363_v58 = vmul.f32 %v2739_v25, %v9422_v43  ;;  %v9428_v51 = vld [vmem:[#allocation70_spill] sm:$0xff]  ;;  %v9429_v25 = vld [vmem:[#allocation7_spill] sm:$0xff] }
 0x176   : > { %9416 = vst [vmem:[#allocation147_spill] sm:$0xff] %v7335_v24  ;;  %9417 = vst [vmem:[#allocation148_spill] sm:$0xff] %v7338_v35  ;;  %5129 = vmatmul.mubr.msk.bf16.gmra.mrb[56].mxu0 %vm1133_vm3, %v1121_v39  ;;  %v2424_v39 = vpack.c.bf16 %v6759_v9, %v6672_v0  ;;  %v9425_v24 = vld [vmem:[#allocation4_spill] sm:$0xff]  ;;  %v863_v9 = vrot.slane %v9411_v61, 7  ;;  %v9426_v0 = vld [vmem:[#allocation2_spill] sm:$0xff]  ;;  %v7381_v48 = vmul.f32 %v9429_v25, %v9428_v51 }
 0x177   : > { %9418 = vst [vmem:[#allocation149_spill] sm:$0xff] %v7341_v60  ;;  %5132 = vmatprep.mubr.msk.bf16.mxu0 %vm1133_vm3, %v1122_v17  ;;  %v9423_v17 = vrot.slane %v9378_v54, 7  ;;  %v7373_v35 = vmul.f32 %v9425_v24, %v9424_v1  ;;  %v3045_v20 = vpop.permute.xlu1 %3044  ;;  %v9431_v54 = vld [vmem:[#allocation77_spill] sm:$0xff]  ;;  %v1123_v1 = vpack.c.bf16 %v7289_v15, %v7254_v59  ;;  %v9442_v25 = vld [vmem:[#allocation11_spill] sm:$0xff]  ;;  %v9445_v61 = vld [vmem:[#allocation10_spill] sm:$0xff] }
 0x178   : > { %9430 = vst [vmem:[#allocation71_spill] sm:$0xff] %v7381_v48  ;;  %v7385_v22 = vmul.f32 %v9432_v7, %v9431_v54  ;;  %v9436_v24 = vld [vmem:[#allocation9_spill] sm:$0xff]  ;;  %v9444_v59 = vld [vmem:[#allocation111_spill] sm:$0xff]  ;;  %v9457_v48 = vld [vmem:[#allocation14_spill] sm:$0xff] }
 0x179   : > { %v915_v4 = vsel %vm897_vm1, %v9082_v32, %v9423_v17  ;;  %v7388_v17 = vmul.f32 %v3161_v56, %v6472_v44  ;;  %v9435_v32 = vld [vmem:[#allocation88_spill] sm:$0xff]  ;;  %v9441_v56 = vld [vmem:[#allocation97_spill] sm:$0xff]  ;;  %v9454_v60 = vld [vmem:[#allocation15_spill] sm:$0xff] }
 0x17a   : > { %v7377_v13 = vmul.f32 %v9426_v0, %v915_v4  ;;  %9433 = vst [vmem:[#allocation70_spill] sm:$0xff] %v7385_v22  ;;  %v7394_v33 = vmul.f32 %v9436_v24, %v9435_v32  ;;  %v9438_v4 = vld [vmem:[#allocation98_spill] sm:$0xff]  ;;  %v9439_v0 = vld [vmem:[#allocation8_spill] sm:$0xff]  ;;  %5261 = vmatmul.mubr.msk.bf16.gmra.mrb[8].mxu1 %vm1133_vm3, %v2422_v57  ;;  %v7407_v7 = vmul.f32 %v9442_v25, %v9441_v56  ;;  %v9450_v25 = vld [vmem:[#allocation119_spill] sm:$0xff] }
 0x17b   : > { %9434 = vst [vmem:[#allocation77_spill] sm:$0xff] %v7388_v17  ;;  %v7398_v43 = vmul.f32 %v9439_v0, %v9438_v4  ;;  %v7411_v32 = vmul.f32 %v9445_v61, %v9444_v59  ;;  %5264 = vmatprep.mubr.msk.bf16.mxu1 %vm1133_vm3, %v2423_v11  ;;  %v9447_v4 = vld [vmem:[#allocation23_spill] sm:$0xff]  ;;  %v9448_v0 = vld [vmem:[#allocation13_spill] sm:$0xff]  ;;  %v3165_v41 = vpop.permute.xlu1 %3164  ;;  %v9451_v59 = vld [vmem:[#allocation12_spill] sm:$0xff] }
 0x17c   : > { %9427 = vst [vmem:[#allocation99_spill] sm:$0xff] %v7377_v13  ;;  %9437 = vst [vmem:[#allocation88_spill] sm:$0xff] %v7394_v33  ;;  %v864_v24 = vrot.slane %v9447_v4, 7  ;;  %v7420_v51 = vmul.f32 %v9448_v0, %v6917_v8  ;;  %v7426_v61 = vmul.f32 %v9451_v59, %v9450_v25  ;;  %v9453_v11 = vld [vmem:[#allocation118_spill] sm:$0xff]  ;;  %v9456_v57 = vld [vmem:[#allocation128_spill] sm:$0xff]  ;;  %v7439_v8 = vmul.f32 %v3045_v20, %v9360_v47 }
 0x17d   : > { %9440 = vst [vmem:[#allocation98_spill] sm:$0xff] %v7398_v43  ;;  %9443 = vst [vmem:[#allocation97_spill] sm:$0xff] %v7407_v7  ;;  %v7430_v4 = vmul.f32 %v9454_v60, %v9453_v11  ;;  %v7434_v22 = vmul.f32 %v9457_v48, %v9456_v57  ;;  %v7442_v56 = vmul.f32 %v3165_v41, %v9303_v63  ;;  %v9461_v25 = vrot.slane %v6472_v44, 7  ;;  %v9464_v41 = vld [vmem:[#allocation133_spill] sm:$0xff]  ;;  %v9468_v7 = vld [vmem:[#allocation16_spill] sm:$0xff] }
 0x17e   : > { %9446 = vst [vmem:[#allocation111_spill] sm:$0xff] %v7411_v32  ;;  %9449 = vst [vmem:[#allocation150_spill] sm:$0xff] %v7420_v51  ;;  %5133 = vmatmul.mubr.msk.bf16.gmra.mrb[60].mxu0 %vm1133_vm3, %v1123_v1  ;;  %v9462_v0 = vrot.slane %v6812_v46, 7  ;;  %v9463_v57 = vrot.slane %v7289_v15, 7  ;;  %v9465_v60 = vld [vmem:[#allocation17_spill] sm:$0xff]  ;;  %v9470_v1 = vld [vmem:[#allocation67_spill] sm:$0xff] }
 0x17f   : > { %9452 = vst [vmem:[#allocation119_spill] sm:$0xff] %v7426_v61  ;;  %9455 = vst [vmem:[#allocation118_spill] sm:$0xff] %v7430_v4  ;;  %v7460_v48 = vmul.f32 %v9465_v60, %v9464_v41  ;;  %v3858_v15 = vrot.slane %v7442_v56, 1  ;;  %v3053_v32 = vpop.permute.xlu1 %3052  ;;  %v9471_v51 = vld [vmem:[#allocation19_spill] sm:$0xff]  ;;  %v9473_v20 = vld [vmem:[#allocation18_spill] sm:$0xff] }
 0x180   : > { %9458 = vst [vmem:[#allocation128_spill] sm:$0xff] %v7434_v22  ;;  %9459 = vst [vmem:[#allocation151_spill] sm:$0xff] %v7439_v8  ;;  %v2112_v11 = vsel %vm897_vm1, %v9462_v0, %v9461_v25  ;;  %v929_v54 = vsel %vm897_vm1, %v9463_v57, %v863_v9  ;;  %v9467_v25 = vld [vmem:[#allocation136_spill] sm:$0xff]  ;;  %v7472_v61 = vmul.f32 %v9471_v51, %v9470_v1  ;;  %v9477_v0 = vld [vmem:[#allocation21_spill] sm:$0xff]  ;;  %v9480_v51 = vrot.slane %v9412_v3, 1 }
 0x181   : > { %9460 = vst [vmem:[#allocation152_spill] sm:$0xff] %v7442_v56  ;;  %9466 = vst [vmem:[#allocation133_spill] sm:$0xff] %v7460_v48  ;;  %v7468_v57 = vmul.f32 %v9468_v7, %v9467_v25  ;;  %v7476_v41 = vmul.f32 %v9473_v20, %v7209_v38  ;;  %v9475_v59 = vld [vmem:[#allocation20_spill] sm:$0xff]  ;;  %v7484_v4 = vmul.f32 %v9477_v0, %v7319_v10  ;;  %v3200_v25 = vrot.slane %v7439_v8, 7  ;;  %v9537_v48 = vld [vmem:[#allocation113_spill] sm:$0xff] }
 0x182   : > { %9472 = vst [vmem:[#allocation67_spill] sm:$0xff] %v7472_v61  ;;  %v7480_v60 = vmul.f32 %v9475_v59, %v7282_v21  ;;  %v9479_v7 = vrot.slane %v7388_v17, 1  ;;  %v7497_v38 = vsel %vm1590_vm2, %v3858_v15, %v9480_v51  ;;  %v7500_v21 = vmul.f32 %v3053_v32, %v6609_v6  ;;  %5265 = vmatmul.mubr.msk.bf16.gmra.mrb[12].mxu1 %vm1133_vm3, %v2424_v39  ;;  %v9551_v22 = vld [vmem:[#allocation36_spill] sm:$0xff]  ;;  %v9564_v33 = vld [vmem:[#allocation69_spill] sm:$0xff] }
 0x183   : > { %9469 = vst [vmem:[#allocation136_spill] sm:$0xff] %v7468_v57  ;;  %9474 = vst [vmem:[#allocation153_spill] sm:$0xff] %v7476_v41  ;;  %v9482_v10 = vrot.slane %v9412_v3, 7  ;;  %v9483_v8 = vrot.slane %v7442_v56, 7  ;;  %v7517_v32 = vmul.f32 %v7247_v49, %v9420_v29  ;;  %5268 = vmatprep.mubr.msk.bf16.mxu1 %vm1133_vm3, %v2425_v16  ;;  %v2426_v39 = vpack.c.bf16 %v6812_v46, %v6819_v37  ;;  %v9533_v46 = vld [vmem:[#allocation75_spill] sm:$0xff]  ;;  %v9536_v41 = vld [vmem:[#allocation106_spill] sm:$0xff] }
 0x184   : > { %9476 = vst [vmem:[#allocation154_spill] sm:$0xff] %v7480_v60  ;;  %9478 = vst [vmem:[#allocation155_spill] sm:$0xff] %v7484_v4  ;;  %v7491_v1 = vsel %vm1590_vm2, %v9479_v7, %v3858_v15  ;;  %v9485_v59 = vrot.slane %v9303_v63, 7  ;;  %v9486_v51 = vrot.slane %v6472_v44, 7  ;;  %v9487_v7 = vld [vmem:[#allocation94_spill] sm:$0xff]  ;;  %v9489_v56 = vrot.slane %v6381_v45, 1 }
 0x185   : > { %9481 = vst [vmem:[#allocation156_spill] sm:$0xff] %v7500_v21  ;;  %v3262_v0 = vsel %vm897_vm1, %v9483_v8, %v9482_v10  ;;  %9484 = vst [vmem:[#allocation157_spill] sm:$0xff] %v7517_v32  ;;  %v2773_v8 = vpack.c.bf16 %v7300_v19, %v7363_v58  ;;  %v928_v10 = vsel %vm897_vm1, %v863_v9, %v864_v24  ;;  %v9490_v20 = vrot.slane %v6389_v30, 1  ;;  %v936_v58 = vpop.permute.xlu1 %935 }
 0x186   : > { %v2111_v49 = vsel %vm897_vm1, %v9486_v51, %v9485_v59  ;;  %v7534_v16 = vmul.f32 %v2112_v11, %v9487_v7  ;;  %v1058_v9 = vmul.f32 %v9487_v7, %v929_v54  ;;  %v9491_v15 = vrot.slane %v9412_v3, 7 }
 0x187   : > { %v1618_v19 = vsel %vm1590_vm2, %v9490_v20, %v9489_v56  ;;  %v7548_v59 = vmul.f32 %v3262_v0, %v9487_v7  ;;  %v9103_v11 = vrot.slane %v6581_v28, 1  ;;  %v1059_v51 = vmul.f32 %v936_v58, %v928_v10 }
 0x188   : > { %9488 = vst [vmem:[#allocation94_spill] sm:$0xff] %v7534_v16  ;;  %v3261_v44 = vsel %vm897_vm1, %v9491_v15, %v3200_v25  ;;  %v7551_v37 = vmul.f32 %v2111_v49, %v936_v58  ;;  %v9495_v56 = vrot.slane %v7500_v21, 7  ;;  %v9496_v20 = vrot.slane %v9419_v27, 7  ;;  %v9525_v16 = vld [vmem:[#allocation122_spill] sm:$0xff] }
 0x189   : > { %9492 = vst [vmem:[#allocation158_spill] sm:$0xff] %v7548_v59  ;;  %v7553_v17 = vmul.f32 %v3261_v44, %v936_v58  ;;  %v9497_v3 = vrot.slane %v6526_v36, 1  ;;  %v9498_v15 = vrot.slane %v6609_v6, 1  ;;  %v9500_v10 = vrot.slane %v6558_v40, 1 }
 0x18a   : > { %9493 = vst [vmem:[#allocation159_spill] sm:$0xff] %v7551_v37  ;;  %v3259_v54 = vsel %vm897_vm1, %v9496_v20, %v9495_v56  ;;  %v9501_v58 = vrot.slane %v6389_v30, 1  ;;  %v9502_v56 = vld [vmem:[#allocation26_spill] sm:$0xff]  ;;  %v1090_v60 = vpack.c.bf16 %v1059_v51, %v1058_v9  ;;  %v9504_v4 = vrot.slane %v6581_v28, 7  ;;  %5269 = vmatmul.mubr.msk.bf16.gmra.mrb[16].mxu1 %vm1133_vm3, %v2426_v39 }
 0x18b   : > { %9494 = vst [vmem:[#allocation160_spill] sm:$0xff] %v7553_v17  ;;  %v2734_v0 = vsel %vm1590_vm2, %v9498_v15, %v9497_v3  ;;  %v9499_v7 = vmov %v9498_v15  ;;  %v7580_v20 = vmul.f32 %v9502_v56, %v1618_v19  ;;  %v9507_v9 = vrot.slane %v9419_v27, 7  ;;  %5274 = vmatprep.mubr.msk.bf16.mxu1 %vm1133_vm3, %v2773_v8  ;;  %v9542_v28 = vld [vmem:[#allocation66_spill] sm:$0xff] }
 0x18c   : > { %v2735_v49 = vsel %vm1590_vm2, %v9500_v10, %v9499_v7  ;;  %v1619_v44 = vsel %vm1590_vm2, %v9103_v11, %v9501_v58  ;;  %v927_v30 = vsel %vm897_vm1, %v864_v24, %v9504_v4  ;;  %v940_v7 = vpop.permute.xlu1 %939  ;;  %v9505_v10 = vrot.slane %v6368_v31, 7  ;;  %v9510_v24 = vld [vmem:[#allocation51_spill] sm:$0xff]  ;;  %5138 = vmatprep.mubr.msk.bf16.mxu0 %vm1133_vm3, %v1090_v60  ;;  %v9516_v4 = vld [vmem:[#allocation28_spill] sm:$0xff] }
 0x18d   : > { %9503 = vst [vmem:[#allocation26_spill] sm:$0xff] %v7580_v20  ;;  %v9506_v58 = vrot.slane %v9303_v63, 7  ;;  %v3260_v51 = vsel %vm897_vm1, %v3200_v25, %v9507_v9  ;;  %v7601_v3 = vmul.f32 %v3259_v54, %v9420_v29  ;;  %v7604_v11 = vmul.f32 %v9387_v5, %v1619_v44  ;;  %v9514_v25 = vld [vmem:[#allocation95_spill] sm:$0xff]  ;;  %v9515_v29 = vld [vmem:[#allocation32_spill] sm:$0xff] }
 0x18e   : > { %v1060_v31 = vmul.f32 %v940_v7, %v927_v30  ;;  %v7610_v15 = vmul.f32 %v3260_v51, %v940_v7  ;;  %v2746_v54 = vmul.f32 %v2734_v0, %v9515_v29  ;;  %v2745_v39 = vmul.f32 %v2735_v49, %v9516_v4  ;;  %v9532_v20 = vld [vmem:[#allocation79_spill] sm:$0xff] }
 0x18f   : > { %v2110_v19 = vsel %vm897_vm1, %v9506_v58, %v9505_v10  ;;  %9508 = vst [vmem:[#allocation161_spill] sm:$0xff] %v7601_v3  ;;  %9509 = vst [vmem:[#allocation162_spill] sm:$0xff] %v7604_v11  ;;  %v9513_v10 = vld [vmem:[#allocation126_spill] sm:$0xff]  ;;  %v9518_v9 = vrot.slane %v6558_v40, 7  ;;  %v9519_v8 = vrot.slane %v9360_v47, 7  ;;  %v3830_v49 = vrot.slane %v7500_v21, 1 }
 0x190   : > { %v7608_v63 = vmul.f32 %v2110_v19, %v940_v7  ;;  %9512 = vst [vmem:[#allocation164_spill] sm:$0xff] %v7610_v15  ;;  %v2685_v58 = vrot.slane %v9513_v10, 1  ;;  %v1091_v30 = vpack.c.bf16 %v7345_v62, %v1060_v31  ;;  %v9517_v19 = vld [vmem:[#allocation35_spill] sm:$0xff]  ;;  %v9520_v7 = vrot.slane %v9510_v24, 7 }
 0x191   : > { %v2686_v51 = vrot.slane %v9517_v19, 1  ;;  %v7632_v0 = vsel %vm897_vm1, %v9519_v8, %v9518_v9  ;;  %v9521_v44 = vrot.slane %v9514_v25, 7  ;;  %v9522_v47 = vrot.slane %v6598_v23, 7  ;;  %v3057_v8 = vpop.permute.xlu1 %3056  ;;  %v9544_v15 = vld [vmem:[#allocation127_spill] sm:$0xff] }
 0x192   : > { %9511 = vst [vmem:[#allocation163_spill] sm:$0xff] %v7608_v63  ;;  %v9523_v63 = vrot.slane %v6526_v36, 7  ;;  %5139 = vmatmul.mubr.msk.bf16.vlgmr.msra.gmra.mrb[32].mxu0 %vm1133_vm3, %v1091_v30  ;;  %v9524_v32 = vrot.slane %v6598_v23, 1  ;;  %v2775_v37 = vpack.c.bf16 %v2746_v54, %v2745_v39  ;;  %v9527_v31 = vrot.slane %v6526_v36, 1 }
 0x193   : > { %v7643_v60 = vsel %vm897_vm1, %v9521_v44, %v9520_v7  ;;  %v7661_v7 = vmul.f32 %v3057_v8, %v6526_v36  ;;  %5171 = vmatpush3.bf16.msra.mxu0 %v9525_v16  ;;  %v7680_v16 = vld [vmem:[%s8902_s3 + $0x18] sm:$0xff]   ;;  %v9530_v54 = vrot.slane %v9419_v27, 1  ;;  %v9531_v8 = vrot.slane %v7016_v26, 1 }
 0x194   : > { %v7651_v9 = vsel %vm897_vm1, %v9523_v63, %v9522_v47  ;;  %v2732_v44 = vsel %vm1590_vm2, %v9524_v32, %v2685_v58  ;;  %v2689_v63 = vrot.slane %v9391_v34, 1  ;;  %v2690_v47 = vrot.slane %v9392_v12, 1  ;;  %9529 = vst [vmem:[#allocation95_spill] sm:$0xff] %v7680_v16  ;;  %5204 = vmatprep.subr.bf16.mxu0 %v7680_v16  ;;  %v9535_v16 = vld [vmem:[#allocation49_spill] sm:$0xff] }
 0x195   : > { %v9526_v30 = vmov %v9524_v32  ;;  %v7675_v32 = vld [vmem:[%s8902_s3 + $0x38] sm:$0xff]   ;;  %v3887_v39 = vsel %vm1590_vm2, %v9530_v54, %v3830_v49  ;;  %v7696_v61 = vmul.f32 %v9533_v46, %v9532_v20  ;;  %v7700_v27 = vmul.f32 %v9536_v41, %v9535_v16  ;;  %v9538_v54 = vld [vmem:[#allocation108_spill] sm:$0xff]  ;;  %v3065_v11 = vpop.permute.xlu1 %3064 }
 0x196   : > { %v2733_v62 = vsel %vm1590_vm2, %v9527_v31, %v9526_v30  ;;  %9528 = vst [vmem:[#allocation126_spill] sm:$0xff] %v7675_v32  ;;  %v2730_v31 = vsel %vm1590_vm2, %v2686_v51, %v9531_v8  ;;  %v2731_v30 = vsel %vm1590_vm2, %v2685_v58, %v2686_v51  ;;  %v7704_v57 = vmul.f32 %v9538_v54, %v9537_v48  ;;  %v9541_v58 = vld [vmem:[#allocation33_spill] sm:$0xff]  ;;  %v9546_v16 = vld [vmem:[#allocation48_spill] sm:$0xff]  ;;  %v9547_v48 = vld [vmem:[#allocation34_spill] sm:$0xff] }
 0x197   : > { %9534 = vst [vmem:[#allocation35_spill] sm:$0xff] %v7696_v61  ;;  %v9540_v8 = vpack.c.bf16 %v7128_v53, %v7164_v55  ;;  %v2748_v51 = vmul.f32 %v2732_v44, %v9541_v58  ;;  %v9543_v20 = vld [vmem:[#allocation129_spill] sm:$0xff]  ;;  %v2747_v54 = vmul.f32 %v2733_v62, %v9547_v48  ;;  %v9548_v21 = vrot.slane %v7661_v7, 1 }
 0x198   : > { %9539 = vst [vmem:[#allocation122_spill] sm:$0xff] %v7704_v57  ;;  %v7714_v3 = vmul.f32 %v9544_v15, %v9543_v20  ;;  %v7724_v53 = vmul.f32 %v3887_v39, %v9387_v5  ;;  %v9550_v44 = vld [vmem:[#allocation37_spill] sm:$0xff]  ;;  %v2750_v59 = vmul.f32 %v2730_v31, %v9551_v22  ;;  %v7737_v15 = vmul.f32 %v3065_v11, %v9513_v10 }
 0x199   : > { %5275 = vmatmul.mubr.msk.bf16.vlgmr.msra.gmra.mrb[20].mxu1 %vm1133_vm3, %v9540_v8  ;;  %v3886_v55 = vsel %vm1590_vm2, %v3830_v49, %v9548_v21  ;;  %v2749_v8 = vmul.f32 %v2731_v30, %v9550_v44  ;;  %v9556_v21 = vrot.slane %v6468_v50, 1  ;;  %v9557_v49 = vrot.slane %v6445_v14, 1  ;;  %v3069_v30 = vpop.permute.xlu1 %3068  ;;  %v9561_v11 = vld [vmem:[#allocation117_spill] sm:$0xff] }
 0x19a   : > { %9545 = vst [vmem:[#allocation79_spill] sm:$0xff] %v7714_v3  ;;  %5307 = vmatpush3.bf16.msra.mxu1 %v9546_v16  ;;  %5278 = vmatprep.mubr.msk.bf16.mxu1 %vm1133_vm3, %v2775_v37  ;;  %9549 = vst [vmem:[#allocation49_spill] sm:$0xff] %v7724_v53  ;;  %v7729_v20 = vmul.f32 %v3886_v55, %v9502_v56  ;;  %v9553_v37 = vld [vmem:[#allocation141_spill] sm:$0xff]  ;;  %v9554_v16 = vld [vmem:[#allocation62_spill] sm:$0xff]  ;;  %v2776_v39 = vpack.c.bf16 %v2748_v51, %v2747_v54  ;;  %v868_v43 = vrot.slane %v9564_v33, 7 }
 0x19b   : > { %5340 = vmatprep.subr.bf16.mxu1 %v7675_v32  ;;  %v7734_v62 = vmul.f32 %v9554_v16, %v9553_v37  ;;  %v2728_v5 = vsel %vm1590_vm2, %v9556_v21, %v2689_v63  ;;  %v2726_v56 = vsel %vm1590_vm2, %v2690_v47, %v9557_v49  ;;  %v9558_v55 = vld [vmem:[#allocation89_spill] sm:$0xff]  ;;  %v9559_v37 = vld [vmem:[#allocation44_spill] sm:$0xff]  ;;  %v9562_v32 = vld [vmem:[#allocation50_spill] sm:$0xff]  ;;  %v7758_v21 = vmul.f32 %v3069_v30, %v9517_v19 }
 0x19c   : > { %9552 = vst [vmem:[#allocation106_spill] sm:$0xff] %v7729_v20  ;;  %v7751_v16 = vmul.f32 %v9559_v37, %v9558_v55  ;;  %v7755_v17 = vmul.f32 %v9562_v32, %v9561_v11  ;;  %v2054_v49 = vrot.slane %v6609_v6, 7  ;;  %v9565_v54 = vld [vmem:[#allocation134_spill] sm:$0xff]  ;;  %v9566_v51 = vld [vmem:[#allocation56_spill] sm:$0xff]  ;;  %v2777_v31 = vpack.c.bf16 %v2750_v59, %v2749_v8  ;;  %v9568_v11 = vld [vmem:[#allocation145_spill] sm:$0xff] }
 0x19d   : > { %9555 = vst [vmem:[#allocation113_spill] sm:$0xff] %v7734_v62  ;;  %v7764_v13 = vmul.f32 %v9566_v51, %v9565_v54  ;;  %v9569_v32 = vld [vmem:[#allocation61_spill] sm:$0xff]  ;;  %v3833_v30 = vrot.slane %v7737_v15, 1  ;;  %v3834_v33 = vrot.slane %v7758_v21, 1  ;;  %v2727_v8 = vsel %vm1590_vm2, %v2689_v63, %v2690_v47  ;;  %v7804_v54 = vpop.permute.xlu1 %951  ;;  %v9580_v51 = vld [vmem:[#allocation78_spill] sm:$0xff]  ;;  %v9582_v3 = vld [vmem:[#allocation39_spill] sm:$0xff] }
 0x19e   : > { %9560 = vst [vmem:[#allocation33_spill] sm:$0xff] %v7751_v16  ;;  %9563 = vst [vmem:[#allocation66_spill] sm:$0xff] %v7755_v17  ;;  %v7772_v20 = vmul.f32 %v9569_v32, %v9568_v11  ;;  %v7787_v11 = vmul.f32 %v7491_v1, %v9414_v2  ;;  %v7791_v6 = vmul.f32 %v7497_v38, %v7321_v42  ;;  %v9573_v59 = vrot.slane %v6468_v50, 1  ;;  %v9586_v16 = vld [vmem:[#allocation109_spill] sm:$0xff] }
 0x19f   : > { %9567 = vst [vmem:[#allocation129_spill] sm:$0xff] %v7764_v13  ;;  %v7802_v47 = vsel %vm1590_vm2, %v3833_v30, %v3834_v33  ;;  %v9575_v2 = vrot.slane %v6381_v45, 7  ;;  %v9576_v1 = vrot.slane %v6558_v40, 7  ;;  %v2693_v62 = vrot.slane %v9580_v51, 1  ;;  %v9583_v13 = vld [vmem:[#allocation76_spill] sm:$0xff] }
 0x1a0   : > { %9570 = vst [vmem:[#allocation48_spill] sm:$0xff] %v7772_v20  ;;  %9571 = vst [vmem:[#allocation34_spill] sm:$0xff] %v7787_v11  ;;  %v9581_v20 = vld [vmem:[#allocation53_spill] sm:$0xff]  ;;  %v2754_v40 = vmul.f32 %v2726_v56, %v9582_v3  ;;  %v2694_v57 = vrot.slane %v9583_v13, 1  ;;  %v1065_v32 = vmul.f32 %v9586_v16, %v7643_v60  ;;  %v9587_v56 = vrot.slane %v9514_v25, 7 }
 0x1a1   : > { %5279 = vmatmul.mubr.msk.bf16.gmra.mrb[24].mxu1 %vm1133_vm3, %v2776_v39  ;;  %9572 = vst [vmem:[#allocation37_spill] sm:$0xff] %v7791_v6  ;;  %v9574_v39 = vrot.slane %v7016_v26, 1  ;;  %v924_v42 = vsel %vm897_vm1, %v9575_v2, %v868_v43  ;;  %v2107_v38 = vsel %vm897_vm1, %v9576_v1, %v2054_v49  ;;  %v2753_v2 = vmul.f32 %v2727_v8, %v9581_v20  ;;  %v7836_v8 = vpop.permute.xlu1 %955 }
 0x1a2   : > { %5282 = vmatprep.mubr.msk.bf16.mxu1 %vm1133_vm3, %v2777_v31  ;;  %v7816_v31 = vmul.f32 %v7632_v0, %v9536_v41  ;;  %v1063_v53 = vmul.f32 %v7804_v54, %v924_v42  ;;  %v7821_v55 = vmul.f32 %v2107_v38, %v7804_v54  ;;  %v9584_v0 = vld [vmem:[#allocation38_spill] sm:$0xff]  ;;  %v9585_v38 = vld [vmem:[#allocation85_spill] sm:$0xff]  ;;  %v923_v1 = vsel %vm897_vm1, %v868_v43, %v9587_v56  ;;  %v9597_v56 = vld [vmem:[#allocation64_spill] sm:$0xff] }
 0x1a3   : > { %v2729_v63 = vsel %vm1590_vm2, %v9574_v39, %v9573_v59  ;;  %v9578_v59 = vld [vmem:[#allocation46_spill] sm:$0xff]  ;;  %v3832_v61 = vrot.slane %v9585_v38, 1  ;;  %v9588_v11 = vrot.slane %v6526_v36, 7  ;;  %v1064_v42 = vmul.f32 %v7836_v8, %v923_v1 }
 0x1a4   : > { %9577 = vst [vmem:[#allocation36_spill] sm:$0xff] %v7816_v31  ;;  %v2752_v39 = vmul.f32 %v2728_v5, %v9578_v59  ;;  %9579 = vst [vmem:[#allocation141_spill] sm:$0xff] %v7821_v55  ;;  %v2751_v17 = vmul.f32 %v2729_v63, %v9584_v0  ;;  %v1092_v5 = vpack.c.bf16 %v1063_v53, %v7700_v27  ;;  %v9591_v6 = vrot.slane %v7661_v7, 1  ;;  %v9611_v31 = vld [vmem:[#allocation104_spill] sm:$0xff] }
 0x1a5   : > { %v2106_v27 = vsel %vm897_vm1, %v2054_v49, %v9588_v11  ;;  %v7848_v53 = vmul.f32 %v7651_v9, %v9586_v16  ;;  %v3884_v43 = vsel %vm1590_vm2, %v3832_v61, %v3833_v30  ;;  %v2779_v49 = vpack.c.bf16 %v2754_v40, %v2753_v2  ;;  %v9593_v11 = vld [vmem:[#allocation83_spill] sm:$0xff] }
 0x1a6   : > { %v2778_v63 = vpack.c.bf16 %v2752_v39, %v2751_v17  ;;  %v7852_v60 = vmul.f32 %v2106_v27, %v7836_v8  ;;  %5142 = vmatprep.mubr.msk.bf16.mxu0 %vm1133_vm3, %v1092_v5  ;;  %v3885_v36 = vsel %vm1590_vm2, %v9591_v6, %v3832_v61  ;;  %v9592_v9 = vrot.slane %v9542_v28, 1 }
 0x1a7   : > { %9589 = vst [vmem:[#allocation89_spill] sm:$0xff] %v7848_v53  ;;  %v9594_v39 = vrot.slane %v9593_v11, 1  ;;  %v2723_v5 = vsel %vm1590_vm2, %v2693_v62, %v2694_v57  ;;  %v1093_v6 = vpack.c.bf16 %v1065_v32, %v1064_v42  ;;  %v9596_v2 = vrot.slane %v6445_v14, 1 }
 0x1a8   : > { %9590 = vst [vmem:[#allocation117_spill] sm:$0xff] %v7852_v60  ;;  %v2724_v17 = vsel %vm1590_vm2, %v9592_v9, %v2693_v62  ;;  %v9595_v30 = vmov %v9592_v9  ;;  %v3073_v9 = vpop.permute.xlu1 %3072  ;;  %v7887_v32 = vmul.f32 %v3884_v43, %v9515_v29  ;;  %v2757_v62 = vmul.f32 %v2723_v5, %v9533_v46  ;;  %v9601_v5 = vld [vmem:[#allocation84_spill] sm:$0xff] }
 0x1a9   : > { %v2722_v1 = vsel %vm1590_vm2, %v2694_v57, %v9594_v39  ;;  %5283 = vmatmul.mubr.msk.bf16.gmra.mrb[28].mxu1 %vm1133_vm3, %v2778_v63  ;;  %v2725_v40 = vsel %vm1590_vm2, %v9596_v2, %v9595_v30  ;;  %v2756_v27 = vmul.f32 %v2724_v17, %v9597_v56  ;;  %5143 = vmatmul.mubr.msk.bf16.gmra.mrb[36].mxu0 %vm1133_vm3, %v1093_v6 }
 0x1aa   : > { %5286 = vmatprep.mubr.msk.bf16.mxu1 %vm1133_vm3, %v2779_v49  ;;  %v7884_v57 = vmul.f32 %v3885_v36, %v9516_v4  ;;  %9599 = vst [vmem:[#allocation145_spill] sm:$0xff] %v7887_v32  ;;  %v2758_v42 = vmul.f32 %v2722_v1, %v9559_v37  ;;  %v7892_v63 = vmul.f32 %v3073_v9, %v7016_v26  ;;  %v9600_v49 = vld [vmem:[#allocation41_spill] sm:$0xff]  ;;  %v2057_v9 = vrot.slane %v9513_v10, 7 }
 0x1ab   : > { %v2755_v39 = vmul.f32 %v2725_v40, %v9600_v49  ;;  %v871_v40 = vrot.slane %v9601_v5, 7  ;;  %v9608_v32 = vld [vmem:[#allocation25_spill] sm:$0xff] }
 0x1ac   : > { %9598 = vst [vmem:[#allocation134_spill] sm:$0xff] %v7884_v57  ;;  %v3835_v6 = vrot.slane %v7892_v63, 1  ;;  %v3081_v36 = vpop.permute.xlu1 %3080  ;;  %v2781_v2 = vpack.c.bf16 %v2758_v42, %v2757_v62  ;;  %v2058_v42 = vrot.slane %v9517_v19, 7  ;;  %v9606_v19 = vrot.slane %v6598_v23, 7  ;;  %v9607_v57 = vld [vmem:[#allocation40_spill] sm:$0xff] }
 0x1ad   : > { %v2780_v30 = vpack.c.bf16 %v2756_v27, %v2755_v39  ;;  %v7903_v1 = vmul.f32 %v3081_v36, %v9391_v34  ;;  %v9602_v27 = vld [vmem:[#allocation57_spill] sm:$0xff]  ;;  %v2059_v36 = vrot.slane %v7016_v26, 7  ;;  %v875_v60 = vrot.slane %v9608_v32, 7 }
 0x1ae   : > { %v3882_v43 = vsel %vm1590_vm2, %v3834_v33, %v3835_v6  ;;  %v872_v62 = vrot.slane %v9602_v27, 7  ;;  %v9603_v33 = vrot.slane %v9510_v24, 7  ;;  %v2104_v46 = vsel %vm897_vm1, %v9606_v19, %v2057_v9  ;;  %v9610_v19 = vld [vmem:[#allocation105_spill] sm:$0xff] }
 0x1af   : > { %v2103_v23 = vsel %vm897_vm1, %v2057_v9, %v2058_v42  ;;  %v9612_v55 = vpack.c.bf16 %v9610_v19, %v9611_v31  ;;  %v9614_v27 = vrot.slane %v7038_v52, 7  ;;  %v9618_v19 = vld [vmem:[#allocation27_spill] sm:$0xff]  ;;  %v9620_v52 = vld [vmem:[#allocation114_spill] sm:$0xff] }
 0x1b0   : > { %v3085_v17 = vpop.permute.xlu1 %3084  ;;  %v921_v39 = vsel %vm897_vm1, %v9603_v33, %v871_v40  ;;  %v873_v33 = vrot.slane %v9607_v57, 7  ;;  %v9615_v57 = vld [vmem:[#allocation93_spill] sm:$0xff] }
 0x1b1   : > { %5287 = vmatmul.mubr.msk.bf16.gmra.mrb[0].mxu1 %vm1133_vm3, %v2780_v30  ;;  %v7908_v61 = vmul.f32 %v3085_v17, %v9392_v12  ;;  %v9604_v30 = vld [vmem:[#allocation42_spill] sm:$0xff]  ;;  %v9605_v17 = vld [vmem:[#allocation112_spill] sm:$0xff]  ;;  %v916_v5 = vsel %vm897_vm1, %v875_v60, %v9614_v27  ;;  %v3836_v9 = vrot.slane %v9615_v57, 1 }
 0x1b2   : > { %5290 = vmatprep.mubr.msk.bf16.mxu1 %vm1133_vm3, %v2781_v2  ;;  %v874_v34 = vrot.slane %v9604_v30, 7  ;;  %v3837_v2 = vrot.slane %v7903_v1, 1  ;;  %v1066_v37 = vmul.f32 %v9605_v17, %v921_v39  ;;  %v7930_v26 = vmul.f32 %v2104_v46, %v9605_v17 }
 0x1b3   : > { %v3838_v12 = vrot.slane %v7908_v61, 1  ;;  %v920_v39 = vsel %vm897_vm1, %v871_v40, %v872_v62 }
 0x1b4   : > { %9609 = vst [vmem:[#allocation46_spill] sm:$0xff] %v7930_v26  ;;  %v7936_v10 = vpop.permute.xlu1 %967  ;;  %v917_v40 = vsel %vm897_vm1, %v874_v34, %v875_v60  ;;  %v918_v31 = vsel %vm897_vm1, %v873_v33, %v874_v34  ;;  %v9721_v26 = vld [vmem:[#allocation40_spill] sm:$0xff] }
 0x1b5   : > { %v7934_v53 = vsel %vm1590_vm2, %v3837_v2, %v3838_v12  ;;  %v1067_v46 = vmul.f32 %v7936_v10, %v920_v39  ;;  %v7948_v30 = vmul.f32 %v2103_v23, %v7936_v10  ;;  %v9617_v23 = vld [vmem:[#allocation115_spill] sm:$0xff]  ;;  %v1069_v27 = vmul.f32 %v9620_v52, %v918_v31 }
 0x1b6   : > { %v9619_v4 = vpack.c.bf16 %v9617_v23, %v9618_v19  ;;  %v9622_v23 = vld [vmem:[#allocation3_spill] sm:$0xff] }
 0x1b7   : > { %9613 = vst [vmem:[#allocation78_spill] sm:$0xff] %v7948_v30  ;;  %v1094_v60 = vpack.c.bf16 %v1067_v46, %v1066_v37  ;;  %v1070_v19 = vmul.f32 %v9622_v23, %v917_v40  ;;  %v7988_v37 = vmul.f32 %v7802_v47, %v9547_v48  ;;  %v9628_v47 = vld [vmem:[#allocation123_spill] sm:$0xff]  ;;  %v9722_v30 = vld [vmem:[#allocation92_spill] sm:$0xff] }
 0x1b8   : > { %v7973_v34 = vpop.permute.xlu1 %971 }
 0x1b9   : > { %5291 = vmatmul.mubr.msk.bf16.gmra.mrb[4].mxu1 %vm1133_vm3, %v9612_v55  ;;  %v9616_v55 = vrot.slane %v6468_v50, 7  ;;  %v919_v50 = vsel %vm897_vm1, %v872_v62, %v873_v33  ;;  %5146 = vmatprep.mubr.msk.bf16.mxu0 %vm1133_vm3, %v1094_v60  ;;  %9625 = vst [vmem:[#allocation76_spill] sm:$0xff] %v7988_v37  ;;  %v7991_v62 = vmul.f32 %v3882_v43, %v9541_v58  ;;  %v9627_v60 = vld [vmem:[#allocation124_spill] sm:$0xff]  ;;  %v9655_v33 = vld [vmem:[#allocation158_spill] sm:$0xff] }
 0x1ba   : > { %5294 = vmatprep.mubr.msk.bf16.mxu1 %vm1133_vm3, %v9619_v4  ;;  %v9623_v4 = vld [vmem:[#allocation5_spill] sm:$0xff]  ;;  %v1068_v31 = vmul.f32 %v7973_v34, %v919_v50  ;;  %v9629_v50 = vpack.c.bf16 %v9627_v60, %v9628_v47  ;;  %v9636_v60 = vld [vmem:[#allocation139_spill] sm:$0xff]  ;;  %v9637_v47 = vld [vmem:[#allocation30_spill] sm:$0xff] }
 0x1bb   : > { %v2101_v39 = vsel %vm897_vm1, %v2059_v36, %v9616_v55  ;;  %v2102_v55 = vsel %vm897_vm1, %v2058_v42, %v2059_v36  ;;  %v1071_v45 = vmul.f32 %v9623_v4, %v916_v5  ;;  %9626 = vst [vmem:[#allocation38_spill] sm:$0xff] %v7991_v62  ;;  %v3881_v42 = vsel %vm1590_vm2, %v3835_v6, %v3836_v9  ;;  %v9674_v62 = vld [vmem:[#allocation126_spill] sm:$0xff] }
 0x1bc   : > { %v7969_v29 = vmul.f32 %v2101_v39, %v9620_v52  ;;  %v7983_v39 = vmul.f32 %v2102_v55, %v7973_v34  ;;  %v3880_v5 = vsel %vm1590_vm2, %v3836_v9, %v3837_v2  ;;  %v1095_v36 = vpack.c.bf16 %v1069_v27, %v1068_v31  ;;  %v3089_v43 = vpop.permute.xlu1 %3088  ;;  %v9632_v9 = vld [vmem:[#allocation131_spill] sm:$0xff]  ;;  %v9633_v27 = vld [vmem:[#allocation130_spill] sm:$0xff] }
 0x1bd   : > { %v1096_v40 = vpack.c.bf16 %v1071_v45, %v1070_v19  ;;  %v8007_v6 = vmul.f32 %v3881_v42, %v9550_v44  ;;  %v8010_v2 = vmul.f32 %v3880_v5, %v9551_v22  ;;  %v9634_v55 = vpack.c.bf16 %v9632_v9, %v9633_v27  ;;  %v9641_v9 = vld [vmem:[#allocation143_spill] sm:$0xff]  ;;  %v9642_v27 = vld [vmem:[#allocation142_spill] sm:$0xff] }
 0x1be   : > { %9621 = vst [vmem:[#allocation53_spill] sm:$0xff] %v7969_v29  ;;  %9624 = vst [vmem:[#allocation39_spill] sm:$0xff] %v7983_v39  ;;  %5147 = vmatmul.mubr.msk.bf16.gmra.mrb[40].mxu0 %vm1133_vm3, %v1095_v36  ;;  %v8017_v45 = vmul.f32 %v3089_v43, %v6445_v14 }
 0x1bf   : > { %9630 = vst [vmem:[#allocation85_spill] sm:$0xff] %v8007_v6  ;;  %9631 = vst [vmem:[#allocation109_spill] sm:$0xff] %v8010_v2  ;;  %5150 = vmatprep.mubr.msk.bf16.mxu0 %vm1133_vm3, %v1096_v40  ;;  %v9639_v40 = vld [vmem:[#allocation99_spill] sm:$0xff]  ;;  %v9658_v2 = vld [vmem:[#allocation97_spill] sm:$0xff] }
 0x1c0   : > { %v3839_v31 = vrot.slane %v8017_v45, 1  ;;  %v3097_v42 = vpop.permute.xlu1 %3096  ;;  %v9640_v43 = vpack.c.bf16 %v7373_v35, %v9639_v40  ;;  %v9647_v40 = vld [vmem:[#allocation52_spill] sm:$0xff]  ;;  %v9657_v6 = vld [vmem:[#allocation111_spill] sm:$0xff] }
 0x1c1   : > { %5295 = vmatmul.mubr.msk.bf16.gmra.mrb[8].mxu1 %vm1133_vm3, %v9629_v50  ;;  %v8026_v36 = vmul.f32 %v3097_v42, %v9580_v51  ;;  %v9638_v50 = vpack.c.bf16 %v9636_v60, %v9637_v47  ;;  %v9644_v51 = vld [vmem:[#allocation70_spill] sm:$0xff]  ;;  %v9645_v42 = vld [vmem:[#allocation71_spill] sm:$0xff]  ;;  %v9659_v37 = vpack.c.bf16 %v9657_v6, %v9658_v2 }
 0x1c2   : > { %5298 = vmatprep.mubr.msk.bf16.mxu1 %vm1133_vm3, %v9634_v55  ;;  %v3878_v5 = vsel %vm1590_vm2, %v3838_v12, %v3839_v31  ;;  %v9643_v55 = vpack.c.bf16 %v9641_v9, %v9642_v27  ;;  %v9646_v19 = vpack.c.bf16 %v9644_v51, %v9645_v42  ;;  %v9648_v9 = vld [vmem:[#allocation149_spill] sm:$0xff]  ;;  %v9649_v27 = vld [vmem:[#allocation68_spill] sm:$0xff]  ;;  %v9651_v51 = vld [vmem:[#allocation98_spill] sm:$0xff] }
 0x1c3   : > { %9635 = vst [vmem:[#allocation83_spill] sm:$0xff] %v8026_v36  ;;  %v3841_v60 = vrot.slane %v8026_v36, 1  ;;  %v9652_v42 = vld [vmem:[#allocation88_spill] sm:$0xff]  ;;  %v8094_v6 = vmul.f32 %v3878_v5, %v9578_v59 }
 0x1c4   : > { %v3101_v14 = vpop.permute.xlu1 %3100  ;;  %v9653_v46 = vpack.c.bf16 %v9651_v51, %v9652_v42  ;;  %v9662_v51 = vld [vmem:[#allocation125_spill] sm:$0xff]  ;;  %v9668_v5 = vld [vmem:[#allocation164_spill] sm:$0xff] }
 0x1c5   : > { %v8041_v12 = vmul.f32 %v3101_v14, %v9583_v13  ;;  %v3203_v14 = vrot.slane %v7661_v7, 7  ;;  %9663 = vst [vmem:[#allocation64_spill] sm:$0xff] %v8094_v6 }
 0x1c6   : > { %5151 = vmatmul.mubr.msk.bf16.gmra.mrb[44].mxu0 %vm1133_vm3, %v9640_v43  ;;  %v8055_v43 = vmul.f32 %v9647_v40, %v9542_v28  ;;  %v9654_v40 = vld [vmem:[#allocation160_spill] sm:$0xff] }
 0x1c7   : > { %5154 = vmatprep.mubr.msk.bf16.mxu0 %vm1133_vm3, %v9646_v19  ;;  %v3842_v47 = vrot.slane %v8041_v12, 1  ;;  %v3204_v19 = vrot.slane %v9585_v38, 7  ;;  %v9656_v24 = vpack.c.bf16 %v9654_v40, %v9655_v33  ;;  %v8088_v33 = vmul.f32 %v9662_v51, %v9593_v11  ;;  %v9667_v51 = vld [vmem:[#allocation161_spill] sm:$0xff] }
 0x1c8   : > { %v3840_v28 = vrot.slane %v8055_v43, 1  ;;  %v3206_v11 = vrot.slane %v7758_v21, 7 }
 0x1c9   : > { %5299 = vmatmul.mubr.msk.bf16.gmra.mrb[12].mxu1 %vm1133_vm3, %v9638_v50  ;;  %v8051_v50 = vpop.permute.xlu1 %3108  ;;  %v3875_v13 = vsel %vm1590_vm2, %v3841_v60, %v3842_v47 }
 0x1ca   : > { %5302 = vmatprep.mubr.msk.bf16.mxu1 %vm1133_vm3, %v9643_v55  ;;  %v9650_v55 = vpack.c.bf16 %v9648_v9, %v9649_v27  ;;  %v3257_v9 = vsel %vm897_vm1, %v3203_v14, %v3204_v19  ;;  %v9660_v27 = vld [vmem:[#allocation156_spill] sm:$0xff]  ;;  %v3876_v42 = vsel %vm1590_vm2, %v3840_v28, %v3841_v60  ;;  %v3877_v2 = vsel %vm1590_vm2, %v3839_v31, %v3840_v28  ;;  %v9670_v31 = vld [vmem:[#allocation119_spill] sm:$0xff] }
 0x1cb   : > { %v3207_v60 = vrot.slane %v7892_v63, 7 }
 0x1cd   : > { %v8074_v35 = vpop.permute.xlu1 %3116 }
 0x1ce   : > { %5155 = vmatmul.mubr.msk.bf16.gmra.mrb[48].mxu0 %vm1133_vm3, %v9653_v46 }
 0x1cf   : > { %5158 = vmatprep.mubr.msk.bf16.mxu0 %vm1133_vm3, %v9659_v37  ;;  %v3205_v37 = vrot.slane %v7737_v15, 7 }
 0x1d1   : > { %5303 = vmatmul.mubr.msk.bf16.gmra.mrb[16].mxu1 %vm1133_vm3, %v9650_v55  ;;  %v9661_v55 = vrot.slane %v9660_v27, 7 }
 0x1d2   : > { %5308 = vmatprep.mubr.msk.bf16.mxu1 %vm1133_vm3, %v9656_v24  ;;  %v3268_v24 = vmul.f32 %v3257_v9, %v7804_v54  ;;  %v8105_v54 = vpop.permute.xlu1 %3124  ;;  %v8111_v9 = vmul.f32 %v3876_v42, %v9582_v3  ;;  %v9669_v42 = vpack.c.bf16 %v9667_v51, %v9668_v5 }
 0x1d3   : > { %v3258_v46 = vsel %vm897_vm1, %v9661_v55, %v3203_v14  ;;  %v8101_v14 = vmul.f32 %v7934_v53, %v9584_v0  ;;  %v8117_v53 = vld [vmem:[%s8902_s3 + $0x40] sm:$0xff]   ;;  %v3208_v55 = vrot.slane %v9615_v57, 7 }
 0x1d4   : > { %v3267_v40 = vmul.f32 %v3258_v46, %v9536_v41  ;;  %9665 = vst [vmem:[#allocation112_spill] sm:$0xff] %v8111_v9  ;;  %v8120_v41 = vmul.f32 %v3877_v2, %v9581_v20  ;;  %v3256_v46 = vsel %vm897_vm1, %v3204_v19, %v3205_v37  ;;  %v9673_v2 = vrot.slane %v8088_v33, 1 }
 0x1d5   : > { %9664 = vst [vmem:[#allocation41_spill] sm:$0xff] %v8101_v14  ;;  %v3255_v14 = vsel %vm897_vm1, %v3205_v37, %v3206_v11  ;;  %v3253_v51 = vsel %vm897_vm1, %v3207_v60, %v3208_v55  ;;  %v3254_v37 = vsel %vm897_vm1, %v3206_v11, %v3207_v60  ;;  %v3209_v60 = vrot.slane %v7903_v1, 7 }
 0x1d6   : > { %v3297_v28 = vpack.c.bf16 %v3268_v24, %v3267_v40  ;;  %9666 = vst [vmem:[#allocation25_spill] sm:$0xff] %v8120_v41  ;;  %v9671_v24 = vld [vmem:[#allocation150_spill] sm:$0xff]  ;;  %v3874_v6 = vsel %vm1590_vm2, %v3842_v47, %v9673_v2  ;;  %v8141_v19 = vpop.permute.xlu1 %3132  ;;  %v3270_v2 = vmul.f32 %v3255_v14, %v9586_v16 }
 0x1d7   : > { %v9672_v40 = vpack.c.bf16 %v9670_v31, %v9671_v24  ;;  %v3269_v31 = vmul.f32 %v3256_v46, %v7836_v8  ;;  %v9676_v24 = vld [vmem:[#allocation118_spill] sm:$0xff]  ;;  %v3211_v8 = vrot.slane %v8017_v45, 7  ;;  %v8160_v46 = vmul.f32 %v3875_v13, %v9600_v49  ;;  %v9681_v49 = vld [vmem:[#allocation80_spill] sm:$0xff] }
 0x1d8   : > { %v8163_v11 = vmul.f32 %v3874_v6, %v9597_v56  ;;  %v9682_v13 = vrot.slane %v9681_v49, 1  ;;  %v9683_v6 = vld [vmem:[#allocation22_spill] sm:$0xff] }
 0x1d9   : > { %5309 = vmatmul.mubr.msk.bf16.vlgmr.msra.gmra.mrb[20].mxu1 %vm1133_vm3, %v9669_v42  ;;  %5159 = vmatmul.mubr.msk.bf16.gmra.mrb[52].mxu0 %vm1133_vm3, %v9672_v40  ;;  %v9675_v42 = vld [vmem:[#allocation128_spill] sm:$0xff]  ;;  %9679 = vst [vmem:[#allocation105_spill] sm:$0xff] %v8160_v46  ;;  %v9702_v41 = vld [vmem:[#allocation86_spill] sm:$0xff] }
 0x1da   : > { %5341 = vmatpush3.bf16.msra.mxu1 %v9674_v62  ;;  %5312 = vmatprep.mubr.msk.bf16.mxu1 %vm1133_vm3, %v3297_v28  ;;  %v9677_v47 = vpack.c.bf16 %v9675_v42, %v9676_v24  ;;  %v3272_v62 = vmul.f32 %v3253_v51, %v7936_v10  ;;  %v9678_v28 = vld [vmem:[#allocation23_spill] sm:$0xff]  ;;  %9680 = vst [vmem:[#allocation104_spill] sm:$0xff] %v8163_v11  ;;  %v3210_v42 = vrot.slane %v7908_v61, 7  ;;  %v8168_v51 = vpop.permute.xlu1 %3140  ;;  %v3212_v24 = vrot.slane %v8055_v43, 7 }
 0x1db   : > { %v1559_v40 = vrot.slane %v9678_v28, 1  ;;  %5374 = vmatprep.subr.bf16.mxu1 %v8117_v53  ;;  %v3271_v10 = vmul.f32 %v3254_v37, %v9605_v17  ;;  %v9684_v28 = vrot.slane %v9683_v6, 1  ;;  %v9685_v37 = vld [vmem:[#allocation81_spill] sm:$0xff] }
 0x1dc   : > { %5162 = vmatprep.mubr.msk.bf16.mxu0 %vm1133_vm3, %v9677_v47  ;;  %v3298_v47 = vpack.c.bf16 %v3270_v2, %v3269_v31  ;;  %v3249_v17 = vsel %vm897_vm1, %v3211_v8, %v3212_v24  ;;  %v3250_v31 = vsel %vm897_vm1, %v3210_v42, %v3211_v8  ;;  %v8187_v2 = vmul.f32 %v8051_v50, %v9685_v37  ;;  %v9689_v6 = vld [vmem:[#allocation153_spill] sm:$0xff]  ;;  %v9690_v50 = vld [vmem:[#allocation67_spill] sm:$0xff]  ;;  %v9692_v37 = vld [vmem:[#allocation24_spill] sm:$0xff] }
 0x1dd   : > { %v3299_v14 = vpack.c.bf16 %v3272_v62, %v3271_v10  ;;  %v1620_v56 = vsel %vm1590_vm2, %v1559_v40, %v9682_v13  ;;  %v1621_v5 = vsel %vm1590_vm2, %v9684_v28, %v1559_v40  ;;  %v9686_v62 = vld [vmem:[#allocation136_spill] sm:$0xff]  ;;  %v9687_v10 = vld [vmem:[#allocation133_spill] sm:$0xff]  ;;  %v3251_v40 = vsel %vm897_vm1, %v3209_v60, %v3210_v42 }
 0x1de   : > { %v9688_v49 = vpack.c.bf16 %v9686_v62, %v9687_v10  ;;  %v3252_v13 = vsel %vm897_vm1, %v3208_v55, %v3209_v60  ;;  %v8199_v8 = vpop.permute.xlu1 %3148  ;;  %v9691_v28 = vpack.c.bf16 %v9689_v6, %v9690_v50  ;;  %v1751_v62 = vmul.f32 %v9692_v37, %v1621_v5  ;;  %v9693_v60 = vld [vmem:[#allocation29_spill] sm:$0xff]  ;;  %v9696_v5 = vld [vmem:[#allocation132_spill] sm:$0xff] }
 0x1df   : > { %v1564_v10 = vrot.slane %v9514_v25, 1  ;;  %v3214_v42 = vrot.slane %v8041_v12, 7  ;;  %v3276_v55 = vmul.f32 %v3249_v17, %v9623_v4  ;;  %v3274_v16 = vmul.f32 %v3251_v40, %v9620_v52  ;;  %v9694_v50 = vld [vmem:[#allocation69_spill] sm:$0xff]  ;;  %v9701_v17 = vld [vmem:[#allocation55_spill] sm:$0xff] }
 0x1e0   : > { %v3216_v6 = vrot.slane %v8187_v2, 7  ;;  %v3213_v25 = vrot.slane %v8026_v36, 7  ;;  %v9727_v36 = vld [vmem:[#allocation84_spill] sm:$0xff] }
 0x1e1   : > { %5313 = vmatmul.mubr.msk.bf16.gmra.mrb[24].mxu1 %vm1133_vm3, %v3298_v47  ;;  %5163 = vmatmul.mubr.msk.bf16.gmra.mrb[56].mxu0 %vm1133_vm3, %v9688_v49  ;;  %v3273_v47 = vmul.f32 %v3252_v13, %v7973_v34  ;;  %v3275_v49 = vmul.f32 %v3250_v31, %v9622_v23  ;;  %v3215_v34 = vrot.slane %v8088_v33, 7  ;;  %v9695_v13 = vld [vmem:[#allocation87_spill] sm:$0xff]  ;;  %v9698_v23 = vld [vmem:[#allocation96_spill] sm:$0xff] }
 0x1e2   : > { %5316 = vmatprep.mubr.msk.bf16.mxu1 %vm1133_vm3, %v3299_v14  ;;  %5166 = vmatprep.mubr.msk.bf16.mxu0 %vm1133_vm3, %v9691_v28  ;;  %v1752_v14 = vmul.f32 %v9693_v60, %v1620_v56  ;;  %v1563_v28 = vrot.slane %v9694_v50, 1  ;;  %v8218_v46 = vmul.f32 %v9696_v5, %v9695_v13  ;;  %v3157_v11 = vpop.permute.xlu1 %3156  ;;  %v9699_v31 = vld [vmem:[#allocation135_spill] sm:$0xff]  ;;  %v3247_v50 = vsel %vm897_vm1, %v3213_v25, %v3214_v42  ;;  %v9717_v60 = vld [vmem:[#allocation140_spill] sm:$0xff] }
 0x1e3   : > { %v8223_v4 = vmul.f32 %v9699_v31, %v9698_v23  ;;  %v3300_v56 = vpack.c.bf16 %v3274_v16, %v3273_v47  ;;  %v8226_v52 = vmul.f32 %v3157_v11, %v9701_v17  ;;  %v8234_v13 = vmul.f32 %v8074_v35, %v9702_v41  ;;  %v9704_v47 = vld [vmem:[#allocation90_spill] sm:$0xff]  ;;  %v9706_v31 = vld [vmem:[#allocation155_spill] sm:$0xff] }
 0x1e4   : > { %9697 = vst [vmem:[#allocation93_spill] sm:$0xff] %v8218_v46  ;;  %v1616_v40 = vsel %vm1590_vm2, %v1563_v28, %v1564_v10  ;;  %v3301_v5 = vpack.c.bf16 %v3276_v55, %v3275_v49  ;;  %v1783_v9 = vpack.c.bf16 %v1752_v14, %v1751_v62  ;;  %v3245_v16 = vsel %vm897_vm1, %v3215_v34, %v3216_v6  ;;  %v9707_v17 = vld [vmem:[#allocation154_spill] sm:$0xff]  ;;  %v9711_v55 = vld [vmem:[#allocation51_spill] sm:$0xff] }
 0x1e5   : > { %9700 = vst [vmem:[#allocation115_spill] sm:$0xff] %v8223_v4  ;;  %9703 = vst [vmem:[#allocation27_spill] sm:$0xff] %v8234_v13  ;;  %v8241_v11 = vmul.f32 %v8105_v54, %v9704_v47  ;;  %v3856_v23 = vrot.slane %v8226_v52, 1  ;;  %v9708_v37 = vpack.c.bf16 %v9706_v31, %v9707_v17  ;;  %v3217_v35 = vrot.slane %v8218_v46, 7  ;;  %v9709_v54 = vld [vmem:[#allocation45_spill] sm:$0xff]  ;;  %v9725_v46 = vld [vmem:[#allocation146_spill] sm:$0xff] }
 0x1e6   : > { %v3248_v41 = vsel %vm897_vm1, %v3212_v24, %v3213_v25  ;;  %v9710_v62 = vrot.slane %v9709_v54, 1  ;;  %v1565_v14 = vrot.slane %v9711_v55, 1  ;;  %v9713_v31 = vld [vmem:[#allocation77_spill] sm:$0xff]  ;;  %v9715_v25 = vld [vmem:[#allocation32_spill] sm:$0xff] }
 0x1e7   : > { %9705 = vst [vmem:[#allocation114_spill] sm:$0xff] %v8241_v11  ;;  %v9714_v17 = vrot.slane %v9713_v31, 1  ;;  %v9716_v54 = vld [vmem:[#allocation101_spill] sm:$0xff] }
 0x1e8   : > { %v1617_v49 = vsel %vm1590_vm2, %v9710_v62, %v1563_v28  ;;  %v8270_v39 = vmul.f32 %v9717_v60, %v9716_v54  ;;  %v3218_v28 = vrot.slane %v8234_v13, 7  ;;  %v9718_v62 = vld [vmem:[#allocation6_spill] sm:$0xff]  ;;  %v9726_v54 = vld [vmem:[#allocation7_spill] sm:$0xff] }
 0x1e9   : > { %5317 = vmatmul.mubr.msk.bf16.gmra.mrb[28].mxu1 %vm1133_vm3, %v3300_v56  ;;  %5167 = vmatmul.mubr.msk.bf16.gmra.mrb[60].mxu0 %vm1133_vm3, %v9708_v37  ;;  %v3246_v56 = vsel %vm897_vm1, %v3214_v42, %v3215_v34  ;;  %v9712_v37 = vld [vmem:[#allocation4_spill] sm:$0xff]  ;;  %v3860_v24 = vsel %vm1590_vm2, %v3856_v23, %v9714_v17  ;;  %v3280_v55 = vmul.f32 %v3245_v16, %v9718_v62  ;;  %v3220_v42 = vrot.slane %v8241_v11, 7  ;;  %v9719_v34 = vld [vmem:[#allocation2_spill] sm:$0xff] }
 0x1ea   : > { %5320 = vmatprep.mubr.msk.bf16.mxu1 %vm1133_vm3, %v3301_v5  ;;  %5172 = vmatprep.mubr.msk.bf16.mxu0 %vm1133_vm3, %v1783_v9  ;;  %v3278_v47 = vmul.f32 %v3247_v50, %v9712_v37  ;;  %v1756_v5 = vmul.f32 %v9715_v25, %v1616_v40  ;;  %v3219_v9 = vrot.slane %v8223_v4, 7  ;;  %v3277_v50 = vmul.f32 %v3248_v41, %v9719_v34  ;;  %v9720_v37 = vld [vmem:[#allocation28_spill] sm:$0xff]  ;;  %v9723_v40 = vld [vmem:[#allocation59_spill] sm:$0xff]  ;;  %v9724_v4 = vld [vmem:[#allocation110_spill] sm:$0xff] }
 0x1eb   : > { %v1755_v29 = vmul.f32 %v9720_v37, %v1617_v49  ;;  %v1568_v17 = vrot.slane %v9721_v26, 1  ;;  %v8280_v25 = vmul.f32 %v9723_v40, %v9722_v30  ;;  %v8284_v60 = vmul.f32 %v9725_v46, %v9724_v4  ;;  %v9728_v49 = vld [vmem:[#allocation57_spill] sm:$0xff]  ;;  %v9729_v30 = vld [vmem:[#allocation102_spill] sm:$0xff] }
 0x1ec   : > { %v3279_v13 = vmul.f32 %v3246_v56, %v9726_v54  ;;  %v1566_v16 = vrot.slane %v9727_v36, 1  ;;  %v3302_v62 = vpack.c.bf16 %v3278_v47, %v3277_v50  ;;  %v1615_v41 = vsel %vm1590_vm2, %v1564_v10, %v1565_v14  ;;  %v9730_v56 = vld [vmem:[#allocation65_spill] sm:$0xff]  ;;  %v9731_v47 = vld [vmem:[#allocation107_spill] sm:$0xff]  ;;  %v9733_v50 = vld [vmem:[#allocation162_spill] sm:$0xff] }
 0x1ed   : > { %v1785_v11 = vpack.c.bf16 %v1756_v5, %v1755_v29  ;;  %v1567_v34 = vrot.slane %v9728_v49, 1  ;;  %v3243_v26 = vsel %vm897_vm1, %v3217_v35, %v3218_v28  ;;  %v8295_v37 = vmul.f32 %v8141_v19, %v9729_v30  ;;  %v9732_v5 = vld [vmem:[#allocation26_spill] sm:$0xff]  ;;  %v9736_v49 = vld [vmem:[#allocation8_spill] sm:$0xff] }
 0x1ee   : > { %v3303_v46 = vpack.c.bf16 %v3280_v55, %v3279_v13  ;;  %v1614_v4 = vsel %vm1590_vm2, %v1565_v14, %v1566_v16  ;;  %v1571_v36 = vrot.slane %v9730_v56, 1  ;;  %v3241_v29 = vsel %vm897_vm1, %v3219_v9, %v3220_v42  ;;  %v9735_v55 = vld [vmem:[#allocation42_spill] sm:$0xff] }
 0x1ef   : > { %v8304_v10 = vmul.f32 %v8168_v51, %v9731_v47  ;;  %v9734_v40 = vpack.c.bf16 %v9732_v5, %v9733_v50  ;;  %v1612_v19 = vsel %vm1590_vm2, %v1567_v34, %v1568_v17  ;;  %v3855_v13 = vrot.slane %v8284_v60, 1  ;;  %v9737_v5 = vld [vmem:[#allocation95_spill] sm:$0xff] }
 0x1f0   : > { %v3244_v14 = vsel %vm897_vm1, %v3216_v6, %v3217_v35  ;;  %v1757_v51 = vmul.f32 %v9547_v48, %v1615_v41  ;;  %v1569_v54 = vrot.slane %v9735_v55, 1  ;;  %v3282_v30 = vmul.f32 %v3243_v26, %v9736_v49  ;;  %v9740_v26 = vld [vmem:[#allocation11_spill] sm:$0xff]  ;;  %v9743_v49 = vld [vmem:[#allocation61_spill] sm:$0xff] }
 0x1f1   : > { %5321 = vmatmul.mubr.msk.bf16.gmra.mrb[0].mxu1 %vm1133_vm3, %v3302_v62  ;;  %5173 = vmatmul.mubr.msk.bf16.vlgmr.msra.gmra.mrb[32].mxu0 %vm1133_vm3, %v9734_v40  ;;  %v3242_v62 = vsel %vm897_vm1, %v3218_v28, %v3219_v9  ;;  %v1758_v56 = vmul.f32 %v9541_v58, %v1614_v4  ;;  %v1613_v47 = vsel %vm1590_vm2, %v1566_v16, %v1567_v34  ;;  %v3222_v6 = vrot.slane %v8295_v37, 7  ;;  %v9739_v16 = vld [vmem:[#allocation9_spill] sm:$0xff] }
 0x1f2   : > { %5324 = vmatprep.mubr.msk.bf16.mxu1 %vm1133_vm3, %v3303_v46  ;;  %5176 = vmatprep.mubr.msk.bf16.mxu0 %vm1133_vm3, %v1785_v11  ;;  %v3861_v48 = vsel %vm1590_vm2, %v3855_v13, %v3856_v23  ;;  %v9738_v11 = vld [vmem:[#allocation10_spill] sm:$0xff]  ;;  %v1760_v9 = vmul.f32 %v9551_v22, %v1612_v19  ;;  %v3221_v28 = vrot.slane %v8270_v39, 7  ;;  %v3223_v58 = vrot.slane %v8280_v25, 7 }
 0x1f3   : > { %5205 = vmatpush3.bf16.msra.mxu0 %v9737_v5  ;;  %v3284_v35 = vmul.f32 %v3241_v29, %v9738_v11  ;;  %v3224_v41 = vrot.slane %v8304_v10, 7  ;;  %v3281_v34 = vmul.f32 %v3244_v14, %v9739_v16  ;;  %v3283_v46 = vmul.f32 %v3242_v62, %v9740_v26  ;;  %v9742_v19 = vld [vmem:[#allocation62_spill] sm:$0xff]  ;;  %v9750_v26 = vld [vmem:[#allocation12_spill] sm:$0xff] }
 0x1f4   : > { %v1759_v4 = vmul.f32 %v9550_v44, %v1613_v47  ;;  %v9741_v50 = vrot.slane %v9608_v32, 1  ;;  %v1611_v22 = vsel %vm1590_vm2, %v1568_v17, %v1569_v54  ;;  %v1786_v40 = vpack.c.bf16 %v1758_v56, %v1757_v51  ;;  %v9744_v44 = vld [vmem:[#allocation31_spill] sm:$0xff]  ;;  %5408 = vmatprep.subr.bf16.mxu0 %v5771_v18 }
 0x1f5   : > { %v3304_v29 = vpack.c.bf16 %v3282_v30, %v3281_v34  ;;  %v8347_v55 = vmul.f32 %v3861_v48, %v9742_v19  ;;  %v8350_v5 = vmul.f32 %v3860_v24, %v9743_v49  ;;  %v3239_v14 = vsel %vm897_vm1, %v3221_v28, %v3222_v6  ;;  %v9745_v51 = vld [vmem:[#allocation63_spill] sm:$0xff] }
 0x1f6   : > { %v1610_v23 = vsel %vm1590_vm2, %v1569_v54, %v9741_v50  ;;  %v8356_v62 = vmul.f32 %v8199_v8, %v9744_v44  ;;  %v3305_v47 = vpack.c.bf16 %v3284_v35, %v3283_v46  ;;  %v1787_v11 = vpack.c.bf16 %v1760_v9, %v1759_v4  ;;  %v9748_v48 = vld [vmem:[#allocation43_spill] sm:$0xff]  ;;  %v9749_v35 = vld [vmem:[#allocation144_spill] sm:$0xff] }
 0x1f7   : > { %v3237_v17 = vsel %vm897_vm1, %v3223_v58, %v3224_v41  ;;  %v9746_v54 = vrot.slane %v9745_v51, 1  ;;  %v3937_v30 = vpack.c.bf16 %v8350_v5, %v8347_v55  ;;  %v9747_v8 = vmov %v9741_v50  ;;  %v9751_v50 = vld [vmem:[#allocation14_spill] sm:$0xff] }
 0x1f8   : > { %v1609_v56 = vsel %vm1590_vm2, %v9747_v8, %v1571_v36  ;;  %v8374_v9 = vmul.f32 %v9749_v35, %v9748_v48  ;;  %v3240_v16 = vsel %vm897_vm1, %v3220_v42, %v3221_v28  ;;  %v3238_v34 = vsel %vm897_vm1, %v3222_v6, %v3223_v58  ;;  %v9752_v28 = vld [vmem:[#allocation13_spill] sm:$0xff]  ;;  %v9753_v58 = vld [vmem:[#allocation15_spill] sm:$0xff] }
 0x1f9   : > { %5325 = vmatmul.mubr.msk.bf16.gmra.mrb[4].mxu1 %vm1133_vm3, %v3304_v29  ;;  %5177 = vmatmul.mubr.msk.bf16.gmra.mrb[36].mxu0 %vm1133_vm3, %v1786_v40  ;;  %v1608_v24 = vsel %vm1590_vm2, %v1571_v36, %v9746_v54  ;;  %v3286_v46 = vmul.f32 %v3239_v14, %v9750_v26  ;;  %v1761_v32 = vmul.f32 %v9584_v0, %v1611_v22  ;;  %v3226_v4 = vrot.slane %v8356_v62, 7  ;;  %v9755_v54 = vld [vmem:[#allocation18_spill] sm:$0xff]  ;;  %v9756_v8 = vld [vmem:[#allocation17_spill] sm:$0xff]  ;;  %v9757_v35 = vld [vmem:[#allocation19_spill] sm:$0xff] }
 0x1fa   : > { %5328 = vmatprep.mubr.msk.bf16.mxu1 %vm1133_vm3, %v3305_v47  ;;  %5180 = vmatprep.mubr.msk.bf16.mxu0 %vm1133_vm3, %v1787_v11  ;;  %v1762_v36 = vmul.f32 %v9578_v59, %v1610_v23  ;;  %v3288_v29 = vmul.f32 %v3237_v17, %v9751_v50  ;;  %v1764_v40 = vmul.f32 %v9582_v3, %v1608_v24  ;;  %v3228_v42 = vrot.slane %v8226_v52, 7  ;;  %v9754_v17 = vld [vmem:[#allocation16_spill] sm:$0xff] }
 0x1fb   : > { %v3285_v19 = vmul.f32 %v3240_v16, %v9752_v28  ;;  %v1763_v49 = vmul.f32 %v9581_v20, %v1609_v56  ;;  %v3225_v6 = vrot.slane %v8374_v9, 7  ;;  %v3287_v14 = vmul.f32 %v3238_v34, %v9753_v58  ;;  %v9764_v28 = vld [vmem:[#allocation35_spill] sm:$0xff] }
 0x1fc   : > { %v3227_v0 = vrot.slane %v8284_v60, 7  ;;  %v1788_v59 = vpack.c.bf16 %v1762_v36, %v1761_v32  ;;  %v3229_v48 = vrot.slane %v9713_v31, 7  ;;  %v9759_v32 = vld [vmem:[#allocation72_spill] sm:$0xff] }
 0x1fd   : > { %v3306_v22 = vpack.c.bf16 %v3286_v46, %v3285_v19  ;;  %v3235_v23 = vsel %vm897_vm1, %v3225_v6, %v3226_v4  ;;  %v3307_v44 = vpack.c.bf16 %v3288_v29, %v3287_v14  ;;  %v1789_v47 = vpack.c.bf16 %v1764_v40, %v1763_v49  ;;  %v9758_v46 = vld [vmem:[#allocation73_spill] sm:$0xff] }
 0x1fe   : > { %v3233_v3 = vsel %vm897_vm1, %v3227_v0, %v3228_v42  ;;  %v3236_v20 = vsel %vm897_vm1, %v3224_v41, %v3225_v6  ;;  %v3234_v11 = vsel %vm897_vm1, %v3226_v4, %v3227_v0  ;;  %v3290_v51 = vmul.f32 %v3235_v23, %v9754_v17  ;;  %v9761_v4 = vld [vmem:[#allocation152_spill] sm:$0xff]  ;;  %v9763_v40 = vld [vmem:[#allocation33_spill] sm:$0xff]  ;;  %v9768_v0 = vld [vmem:[#allocation74_spill] sm:$0xff] }
 0x1ff   : > { %v3292_v24 = vmul.f32 %v3233_v3, %v9755_v54  ;;  %v3289_v56 = vmul.f32 %v3236_v20, %v9756_v8  ;;  %v3291_v16 = vmul.f32 %v3234_v11, %v9757_v35  ;;  %v3232_v41 = vsel %vm897_vm1, %v3228_v42, %v3229_v48  ;;  %v9766_v42 = vld [vmem:[#allocation20_spill] sm:$0xff]  ;;  %v9767_v6 = vld [vmem:[#allocation21_spill] sm:$0xff]  ;;  %v9770_v23 = vld [vmem:[#allocation103_spill] sm:$0xff] }
 0x200   : > { %v9760_v36 = vpack.c.bf16 %v9758_v46, %v9759_v32  ;;  %v9762_v50 = vrot.slane %v9761_v4, 7  ;;  %v9765_v19 = vpack.c.bf16 %v9763_v40, %v9764_v28  ;;  %v3293_v49 = vmul.f32 %v3232_v41, %v9766_v42  ;;  %v9773_v3 = vld [vmem:[#allocation66_spill] sm:$0xff]  ;;  %v9778_v8 = vld [vmem:[#allocation120_spill] sm:$0xff]  ;;  %v9781_v35 = vld [vmem:[#allocation79_spill] sm:$0xff] }
 0x201   : > { %5329 = vmatmul.mubr.msk.bf16.gmra.mrb[8].mxu1 %vm1133_vm3, %v3306_v22  ;;  %5181 = vmatmul.mubr.msk.bf16.gmra.mrb[40].mxu0 %vm1133_vm3, %v1788_v59  ;;  %v3308_v34 = vpack.c.bf16 %v3290_v51, %v3289_v56  ;;  %v3309_v26 = vpack.c.bf16 %v3292_v24, %v3291_v16  ;;  %v9769_v22 = vld [vmem:[#allocation151_spill] sm:$0xff]  ;;  %v9774_v20 = vld [vmem:[#allocation122_spill] sm:$0xff]  ;;  %v3563_v54 = vpack.c.bf16 %v9585_v38, %v7661_v7  ;;  %v9777_v24 = vld [vmem:[#allocation121_spill] sm:$0xff] }
 0x202   : > { %5332 = vmatprep.mubr.msk.bf16.mxu1 %vm1133_vm3, %v3307_v44  ;;  %5184 = vmatprep.mubr.msk.bf16.mxu0 %vm1133_vm3, %v1789_v47  ;;  %v3231_v29 = vsel %vm897_vm1, %v3229_v48, %v9762_v50  ;;  %v3561_v59 = vpack.c.bf16 %v9769_v22, %v9768_v0  ;;  %v9771_v44 = vld [vmem:[#allocation100_spill] sm:$0xff]  ;;  %v9775_v11 = vpack.c.bf16 %v9773_v3, %v9774_v20  ;;  %v9776_v17 = vld [vmem:[#allocation82_spill] sm:$0xff]  ;;  %v9780_v48 = vld [vmem:[#allocation129_spill] sm:$0xff] }
 0x203   : > { %v3294_v58 = vmul.f32 %v3231_v29, %v9767_v6  ;;  %v9772_v47 = vpack.c.bf16 %v9770_v23, %v9771_v44  ;;  %v3562_v51 = vpack.c.bf16 %v9660_v27, %v9776_v17  ;;  %v9779_v56 = vpack.c.bf16 %v9777_v24, %v9778_v8  ;;  %v9784_v38 = vld [vmem:[#allocation138_spill] sm:$0xff]  ;;  %v9800_v40 = vld [vmem:[#allocation163_spill] sm:$0xff]  ;;  %v9803_v42 = vld [vmem:[#allocation36_spill] sm:$0xff] }
 0x204   : > { %v9782_v16 = vpack.c.bf16 %v9780_v48, %v9781_v35  ;;  %v3565_v27 = vpack.c.bf16 %v9615_v57, %v7892_v63  ;;  %v9783_v7 = vpack.c.bf16 %v7758_v21, %v7737_v15  ;;  %v3567_v57 = vpack.c.bf16 %v8055_v43, %v8017_v45  ;;  %v9791_v21 = vld [vmem:[#allocation148_spill] sm:$0xff]  ;;  %v9792_v63 = vld [vmem:[#allocation147_spill] sm:$0xff]  ;;  %v9795_v50 = vld [vmem:[#allocation94_spill] sm:$0xff] }
 0x205   : > { %v3310_v14 = vpack.c.bf16 %v3294_v58, %v3293_v49  ;;  %v9790_v15 = vpack.c.bf16 %v7908_v61, %v7903_v1  ;;  %v9793_v32 = vpack.c.bf16 %v9791_v21, %v9792_v63  ;;  %v3569_v45 = vpack.c.bf16 %v8187_v2, %v8088_v33  ;;  %v9797_v43 = vld [vmem:[#allocation83_spill] sm:$0xff]  ;;  %v9799_v1 = vld [vmem:[#allocation157_spill] sm:$0xff]  ;;  %v9808_v23 = vld [vmem:[#allocation114_spill] sm:$0xff] }
 0x206   : > { %v9798_v61 = vpack.c.bf16 %v8041_v12, %v9797_v43  ;;  %v9801_v28 = vpack.c.bf16 %v9799_v1, %v9800_v40  ;;  %v9805_v6 = vld [vmem:[#allocation93_spill] sm:$0xff]  ;;  %v9806_v58 = vld [vmem:[#allocation27_spill] sm:$0xff]  ;;  %v9812_v20 = vld [vmem:[#allocation78_spill] sm:$0xff]  ;;  %v3573_v24 = vpack.c.bf16 %v8304_v10, %v8280_v25  ;;  %v3828_v35 = vrot.slane %v9769_v22, 1 }
 0x207   : > { %v9809_v44 = vld [vmem:[#allocation89_spill] sm:$0xff]  ;;  %v9820_v22 = vld [vmem:[#allocation24_spill] sm:$0xff]  ;;  %v9827_v63 = vld [vmem:[#allocation134_spill] sm:$0xff]  ;;  %v3844_v43 = vrot.slane %v8187_v2, 1  ;;  %v9835_v40 = vrot.slane %v8088_v33, 1  ;;  %v3846_v2 = vrot.slane %v9806_v58, 1 }
 0x208   : > { %v9815_v8 = vld [vmem:[#allocation53_spill] sm:$0xff]  ;;  %v3848_v33 = vrot.slane %v9808_v23, 1 }
 0x209   : > { %5333 = vmatmul.mubr.msk.bf16.gmra.mrb[12].mxu1 %vm1133_vm3, %v3308_v34  ;;  %5185 = vmatmul.mubr.msk.bf16.gmra.mrb[44].mxu0 %vm1133_vm3, %v9760_v36  ;;  %v9785_v34 = vld [vmem:[#allocation60_spill] sm:$0xff]  ;;  %v9794_v36 = vld [vmem:[#allocation159_spill] sm:$0xff]  ;;  %v9826_v21 = vld [vmem:[#allocation145_spill] sm:$0xff] }
 0x20a   : > { %5336 = vmatprep.mubr.msk.bf16.mxu1 %vm1133_vm3, %v3309_v26  ;;  %5188 = vmatprep.mubr.msk.bf16.mxu0 %vm1133_vm3, %v9765_v19  ;;  %v9786_v41 = vpack.c.bf16 %v9784_v38, %v9785_v34  ;;  %v9788_v26 = vld [vmem:[#allocation113_spill] sm:$0xff]  ;;  %v9796_v29 = vpack.c.bf16 %v9794_v36, %v9795_v50  ;;  %v9819_v34 = vrot.slane %v9768_v0, 1  ;;  %v9823_v0 = vld [vmem:[#allocation106_spill] sm:$0xff]  ;;  %v9830_v50 = vld [vmem:[#allocation76_spill] sm:$0xff] }
 0x20b   : > { %v9802_v19 = vld [vmem:[#allocation141_spill] sm:$0xff]  ;;  %v9829_v36 = vld [vmem:[#allocation38_spill] sm:$0xff] }
 0x20c   : > { %v9804_v49 = vpack.c.bf16 %v9802_v19, %v9803_v42  ;;  %v9836_v19 = vld [vmem:[#allocation64_spill] sm:$0xff]  ;;  %v9837_v42 = vld [vmem:[#allocation41_spill] sm:$0xff] }
 0x211   : > { %5337 = vmatmul.mubr.msk.bf16.gmra.mrb[16].mxu1 %vm1133_vm3, %v3310_v14  ;;  %5189 = vmatmul.mubr.msk.bf16.gmra.mrb[48].mxu0 %vm1133_vm3, %v9772_v47  ;;  %v3570_v14 = vpack.c.bf16 %v9806_v58, %v9805_v6  ;;  %v9810_v47 = vld [vmem:[#allocation117_spill] sm:$0xff] }
 0x212   : > { %5342 = vmatprep.mubr.msk.bf16.mxu1 %vm1133_vm3, %v3561_v59  ;;  %5192 = vmatprep.mubr.msk.bf16.mxu0 %vm1133_vm3, %v9775_v11  ;;  %v9807_v59 = vld [vmem:[#allocation115_spill] sm:$0xff]  ;;  %v9811_v3 = vpack.c.bf16 %v9809_v44, %v9810_v47  ;;  %v9813_v11 = vld [vmem:[#allocation46_spill] sm:$0xff] }
 0x213   : > { %v3571_v12 = vpack.c.bf16 %v9808_v23, %v9807_v59 }
 0x219   : > { %5343 = vmatmul.mubr.msk.bf16.vlgmr.msra.gmra.mrb[20].mxu1 %vm1133_vm3, %v3562_v51  ;;  %5193 = vmatmul.mubr.msk.bf16.gmra.mrb[52].mxu0 %vm1133_vm3, %v9779_v56  ;;  %v9814_v51 = vpack.c.bf16 %v9812_v20, %v9813_v11  ;;  %v9816_v56 = vld [vmem:[#allocation39_spill] sm:$0xff]  ;;  %v3847_v11 = vrot.slane %v9807_v59, 1 }
 0x21a   : > { %5375 = vmatpush3.bf16.msra.mxu1 %v8117_v53  ;;  %5346 = vmatprep.mubr.msk.bf16.mxu1 %vm1133_vm3, %v3563_v54  ;;  %v9787_v53 = vld [vmem:[#allocation48_spill] sm:$0xff]  ;;  %v3572_v54 = vpack.c.bf16 %v8295_v37, %v8270_v39  ;;  %v9817_v48 = vpack.c.bf16 %v9815_v8, %v9816_v56 }
 0x21b   : > { %5196 = vmatprep.mubr.msk.bf16.mxu0 %vm1133_vm3, %v9782_v16  ;;  %v9789_v46 = vpack.c.bf16 %v9787_v53, %v9788_v26  ;;  %v3574_v16 = vpack.c.bf16 %v8356_v62, %v8374_v9  ;;  %v9821_v26 = vld [vmem:[#allocation29_spill] sm:$0xff]  ;;  %v3869_v56 = vsel %vm1590_vm2, %v3847_v11, %v3848_v33 }
 0x221   : > { %5347 = vmatmul.mubr.msk.bf16.gmra.mrb[24].mxu1 %vm1133_vm3, %v9783_v7  ;;  %5197 = vmatmul.mubr.msk.bf16.gmra.mrb[56].mxu0 %vm1133_vm3, %v9786_v41  ;;  %v9818_v7 = vrot.slane %v9776_v17, 1  ;;  %v3889_v41 = vsel %vm1590_vm2, %v9819_v34, %v3828_v35  ;;  %v9824_v17 = vld [vmem:[#allocation49_spill] sm:$0xff] }
 0x222   : > { %5350 = vmatprep.mubr.msk.bf16.mxu1 %vm1133_vm3, %v3565_v27  ;;  %5200 = vmatprep.mubr.msk.bf16.mxu0 %vm1133_vm3, %v9789_v46  ;;  %v3575_v27 = vpack.c.bf16 %v8226_v52, %v8284_v60  ;;  %v3891_v53 = vmul.f32 %v3889_v41, %v9820_v22  ;;  %v9822_v52 = vpack.c.bf16 %v9761_v4, %v9713_v31  ;;  %v9832_v31 = vld [vmem:[#allocation109_spill] sm:$0xff]  ;;  %v9850_v41 = vld [vmem:[#allocation50_spill] sm:$0xff] }
 0x223   : > { %v3888_v38 = vsel %vm1590_vm2, %v3828_v35, %v9818_v7  ;;  %v9833_v4 = vld [vmem:[#allocation85_spill] sm:$0xff]  ;;  %v3850_v7 = vrot.slane %v8295_v37, 1 }
 0x224   : > { %v3892_v46 = vmul.f32 %v3888_v38, %v9821_v26  ;;  %v9845_v35 = vld [vmem:[#allocation105_spill] sm:$0xff]  ;;  %v9849_v38 = vld [vmem:[#allocation108_spill] sm:$0xff]  ;;  %v3851_v26 = vrot.slane %v8280_v25, 1  ;;  %v9851_v25 = vld [vmem:[#allocation54_spill] sm:$0xff] }
 0x225   : > { %v3911_v34 = vmul.f32 %v3869_v56, %v9849_v38  ;;  %v9857_v60 = vld [vmem:[#allocation37_spill] sm:$0xff] }
 0x229   : > { %5351 = vmatmul.mubr.msk.bf16.gmra.mrb[28].mxu1 %vm1133_vm3, %v9790_v15  ;;  %5201 = vmatmul.mubr.msk.bf16.gmra.mrb[60].mxu0 %vm1133_vm3, %v9793_v32  ;;  %v9825_v15 = vpack.c.bf16 %v9823_v0, %v9824_v17  ;;  %v9828_v32 = vpack.c.bf16 %v9826_v21, %v9827_v63  ;;  %v3854_v63 = vrot.slane %v8356_v62, 1 }
 0x22a   : > { %5354 = vmatprep.mubr.msk.bf16.mxu1 %vm1133_vm3, %v3567_v57  ;;  %5206 = vmatprep.mubr.msk.bf16.mxu0 %vm1133_vm3, %v9796_v29  ;;  %v3923_v57 = vpack.c.bf16 %v3892_v46, %v3891_v53  ;;  %v9831_v29 = vpack.c.bf16 %v9829_v36, %v9830_v50  ;;  %v3852_v53 = vrot.slane %v8304_v10, 1  ;;  %v3853_v46 = vrot.slane %v8374_v9, 1  ;;  %v9852_v9 = vld [vmem:[#allocation116_spill] sm:$0xff] }
 0x22b   : > { %v9854_v50 = vld [vmem:[#allocation56_spill] sm:$0xff] }
 0x22c   : > { %v3864_v37 = vsel %vm1590_vm2, %v3852_v53, %v3853_v46 }
 0x231   : > { %5355 = vmatmul.mubr.msk.bf16.gmra.mrb[0].mxu1 %vm1133_vm3, %v9798_v61  ;;  %5207 = vmatmul.mubr.msk.bf16.vlgmr.msra.gmra.mrb[32].mxu0 %vm1133_vm3, %v9801_v28  ;;  %v3845_v61 = vrot.slane %v9805_v6, 1  ;;  %v3873_v28 = vsel %vm1590_vm2, %v9835_v40, %v3844_v43  ;;  %v9842_v6 = vld [vmem:[#allocation75_spill] sm:$0xff] }
 0x232   : > { %5358 = vmatprep.mubr.msk.bf16.mxu1 %vm1133_vm3, %v3569_v45  ;;  %5210 = vmatprep.mubr.msk.bf16.mxu0 %vm1133_vm3, %v9804_v49  ;;  %v9834_v45 = vpack.c.bf16 %v9832_v31, %v9833_v4  ;;  %v9838_v49 = vpack.c.bf16 %v9836_v19, %v9837_v42  ;;  %v3907_v47 = vmul.f32 %v3873_v28, %v9842_v6 }
 0x233   : > { %v3872_v1 = vsel %vm1590_vm2, %v3844_v43, %v3845_v61  ;;  %v3862_v4 = vsel %vm1590_vm2, %v3854_v63, %v3855_v13  ;;  %v9858_v13 = vld [vmem:[#allocation34_spill] sm:$0xff]  ;;  %5409 = vmatpush3.bf16.msra.mxu0 %v5771_v18 }
 0x234   : > { %v9859_v19 = vpack.c.bf16 %v9857_v60, %v9858_v13 }
 0x239   : > { %5359 = vmatmul.mubr.msk.bf16.gmra.mrb[4].mxu1 %vm1133_vm3, %v3570_v14  ;;  %5211 = vmatmul.mubr.msk.bf16.gmra.mrb[36].mxu0 %vm1133_vm3, %v9811_v3  ;;  %v9839_v14 = vld [vmem:[#allocation112_spill] sm:$0xff] }
 0x23a   : > { %5362 = vmatprep.mubr.msk.bf16.mxu1 %vm1133_vm3, %v3571_v12  ;;  %5214 = vmatprep.mubr.msk.bf16.mxu0 %vm1133_vm3, %v9814_v51  ;;  %v9840_v12 = vld [vmem:[#allocation25_spill] sm:$0xff]  ;;  %v9843_v3 = vld [vmem:[#allocation44_spill] sm:$0xff]  ;;  %v3849_v51 = vrot.slane %v8270_v39, 1  ;;  %v9847_v39 = vld [vmem:[#allocation47_spill] sm:$0xff] }
 0x23b   : > { %v9841_v44 = vpack.c.bf16 %v9839_v14, %v9840_v12  ;;  %v3908_v20 = vmul.f32 %v3872_v1, %v9843_v3  ;;  %v9856_v1 = vld [vmem:[#allocation137_spill] sm:$0xff] }
 0x23c   : > { %v3868_v58 = vsel %vm1590_vm2, %v3848_v33, %v3849_v51  ;;  %v3867_v0 = vsel %vm1590_vm2, %v3849_v51, %v3850_v7  ;;  %v3918_v40 = vmul.f32 %v3862_v4, %v9856_v1 }
 0x23d   : > { %v3931_v8 = vpack.c.bf16 %v3908_v20, %v3907_v47  ;;  %v3912_v22 = vmul.f32 %v3868_v58, %v9850_v41  ;;  %v3913_v10 = vmul.f32 %v3867_v0, %v9851_v25 }
 0x23f   : > { %v3933_v17 = vpack.c.bf16 %v3912_v22, %v3911_v34 }
 0x241   : > { %5363 = vmatmul.mubr.msk.bf16.gmra.mrb[8].mxu1 %vm1133_vm3, %v3572_v54  ;;  %5215 = vmatmul.mubr.msk.bf16.gmra.mrb[40].mxu0 %vm1133_vm3, %v9817_v48  ;;  %v3870_v54 = vsel %vm1590_vm2, %v3846_v2, %v3847_v11  ;;  %v9844_v48 = vld [vmem:[#allocation104_spill] sm:$0xff] }
 0x242   : > { %5366 = vmatprep.mubr.msk.bf16.mxu1 %vm1133_vm3, %v3573_v24  ;;  %v3871_v24 = vsel %vm1590_vm2, %v3845_v61, %v3846_v2  ;;  %v9846_v23 = vpack.c.bf16 %v9844_v48, %v9845_v35  ;;  %v9855_v61 = vld [vmem:[#allocation58_spill] sm:$0xff] }
 0x243   : > { %v3909_v59 = vmul.f32 %v3871_v24, %v9847_v39 }
 0x249   : > { %5367 = vmatmul.mubr.msk.bf16.gmra.mrb[12].mxu1 %vm1133_vm3, %v3574_v16  ;;  %v9848_v16 = vld [vmem:[#allocation91_spill] sm:$0xff] }
 0x24a   : > { %5370 = vmatprep.mubr.msk.bf16.mxu1 %vm1133_vm3, %v3575_v27  ;;  %v3910_v27 = vmul.f32 %v3870_v54, %v9848_v16 }
 0x251   : > { %5371 = vmatmul.mubr.msk.bf16.gmra.mrb[16].mxu1 %vm1133_vm3, %v9822_v52  ;;  %v3866_v52 = vsel %vm1590_vm2, %v3850_v7, %v3851_v26 }
 0x252   : > { %5376 = vmatprep.mubr.msk.bf16.mxu1 %vm1133_vm3, %v3923_v57  ;;  %v3932_v57 = vpack.c.bf16 %v3910_v27, %v3909_v59  ;;  %v3914_v21 = vmul.f32 %v3866_v52, %v9852_v9 }
 0x254   : > { %v3934_v31 = vpack.c.bf16 %v3914_v21, %v3913_v10 }
 0x259   : > { %5377 = vmatmul.mubr.msk.bf16.vlgmr.msra.gmra.mrb[20].mxu1 %vm1133_vm3, %v9825_v15  ;;  %v3865_v15 = vsel %vm1590_vm2, %v3851_v26, %v3852_v53  ;;  %v8686_v53 = vld [vmem:[%s8903_s4] ss:$0 sm:$0xff] }
 0x25a   : > { %5380 = vmatprep.mubr.msk.bf16.mxu1 %vm1133_vm3, %v9828_v32  ;;  %v9853_v32 = vld [vmem:[#allocation127_spill] sm:$0xff] }
 0x25b   : > { %v3915_v36 = vmul.f32 %v3865_v15, %v9853_v32 }
 0x261   : > { %5381 = vmatmul.mubr.msk.bf16.gmra.mrb[24].mxu1 %vm1133_vm3, %v9831_v29  ;;  %v3916_v29 = vmul.f32 %v3864_v37, %v9854_v50 }
 0x262   : > { %5384 = vmatprep.mubr.msk.bf16.mxu1 %vm1133_vm3, %v9834_v45  ;;  %v3863_v45 = vsel %vm1590_vm2, %v3853_v46, %v3854_v63 }
 0x263   : > { %v3935_v43 = vpack.c.bf16 %v3916_v29, %v3915_v36  ;;  %v3917_v62 = vmul.f32 %v3863_v45, %v9855_v61 }
 0x265   : > { %v3936_v28 = vpack.c.bf16 %v3918_v40, %v3917_v62 }
 0x269   : > { %5385 = vmatmul.mubr.msk.bf16.gmra.mrb[28].mxu1 %vm1133_vm3, %v9838_v49 }
 0x26a   : > { %5388 = vmatprep.mubr.msk.bf16.mxu1 %vm1133_vm3, %v9841_v44 }
 0x271   : > { %5389 = vmatmul.mubr.msk.bf16.gmra.mrb[0].mxu1 %vm1133_vm3, %v9846_v23 }
 0x272   : > { %5392 = vmatprep.mubr.msk.bf16.mxu1 %vm1133_vm3, %v3931_v8 }
 0x279   : > { %5393 = vmatmul.mubr.msk.bf16.gmra.mrb[4].mxu1 %vm1133_vm3, %v3932_v57 }
 0x27a   : > { %5396 = vmatprep.mubr.msk.bf16.mxu1 %vm1133_vm3, %v3933_v17 }
 0x281   : > { %5397 = vmatmul.mubr.msk.bf16.gmra.mrb[8].mxu1 %vm1133_vm3, %v3934_v31 }
 0x282   : > { %5400 = vmatprep.mubr.msk.bf16.mxu1 %vm1133_vm3, %v3935_v43 }
 0x289   : > { %5401 = vmatmul.mubr.msk.bf16.gmra.mrb[12].mxu1 %vm1133_vm3, %v3936_v28 }
 0x28a   : > { %5404 = vmatprep.mubr.msk.bf16.mxu1 %vm1133_vm3, %v3937_v30 }
 0x291   : > { %5405 = vmatmul.mubr.msk.bf16.gmra.mrb[16].mxu1 %vm1133_vm3, %v9859_v19 }
 0x2dc   : > { %v8643_v42 = vpop.f32.mrb[44].mxu0 }
 0x2dd   : > { %v8645_v49 = vpop.f32.mrb[45].mxu0 }
 0x2de   : > { %v8647_v14 = vpop.f32.mrb[46].mxu0 }
 0x2df   : > { %v8649_v55 = vpop.f32.mrb[47].mxu0 }
 0x2e4   : > { %v8651_v5 = vpop.f32.mrb[48].mxu0 }
 0x2e5   : > { %v8653_v30 = vpop.f32.mrb[49].mxu0 }
 0x2e6   : > { %v8655_v12 = vpop.f32.mrb[50].mxu0 }
 0x2e7   : > { %v8657_v44 = vpop.f32.mrb[51].mxu0 }
 0x2ec   : > { %v8659_v2 = vpop.f32.mrb[52].mxu0 }
 0x2ed   : > { %v8661_v6 = vpop.f32.mrb[53].mxu0 }
 0x2ee   : > { %v8663_v47 = vpop.f32.mrb[54].mxu0 }
 0x2ef   : > { %v8665_v3 = vpop.f32.mrb[55].mxu0 }
 0x2f4   : > { %v8667_v20 = vpop.f32.mrb[56].mxu0 }
 0x2f5   : > { %v8669_v33 = vpop.f32.mrb[57].mxu0 }
 0x2f6   : > { %v8671_v11 = vpop.f32.mrb[58].mxu0 }
 0x2f7   : > { %v8673_v51 = vpop.f32.mrb[59].mxu0 }
 0x2fc   : > { %v8675_v54 = vpop.f32.mrb[60].mxu0 }
 0x2fd   : > { %v8677_v24 = vpop.f32.mrb[61].mxu0 }
 0x2fe   : > { %v8679_v8 = vpop.f32.mrb[62].mxu0 }
 0x2ff   : > { %v8681_v58 = vpop.f32.mrb[63].mxu0 }
 0x304   : > { %v5208_v56 = vpop.f32.mrb[32].mxu0 }
 0x305   : > { %v2252_v48 = vpop.f32.mrb[33].mxu0 }
 0x306   : > { %v5209_v35 = vpop.f32.mrb[34].mxu0 }
 0x307   : > { %v2255_v23 = vpop.f32.mrb[35].mxu0 }
 0x30c   : > { %v5212_v39 = vpop.f32.mrb[36].mxu0 }
 0x30d   : > { %v2268_v59 = vpop.f32.mrb[37].mxu0 }
 0x30e   : > { %v5213_v16 = vpop.f32.mrb[38].mxu0 }
 0x30f   : > { %v2271_v27 = vpop.f32.mrb[39].mxu0 }
 0x314   : > { %v5216_v7 = vpop.f32.mrb[40].mxu0 }
 0x315   : > { %v2284_v38 = vpop.f32.mrb[41].mxu0 }
 0x316   : > { %v5217_v34 = vpop.f32.mrb[42].mxu0 }
 0x317   : > { %v2287_v41 = vpop.f32.mrb[43].mxu0 }
 0x32c   : > { %v5378_v22 = vpop.f32.mrb[20].mxu1 }
 0x32d   : > { %v5444_v26 = vadd.f32 %v5378_v22, %v5208_v56  ;;  %v4030_v46 = vpop.f32.mrb[21].mxu1 }
 0x32e   : > { %v5445_v57 = vadd.f32 %v4030_v46, %v2252_v48  ;;  %v5379_v52 = vpop.f32.mrb[22].mxu1 }
 0x32f   : > { %v4198_v0 = vadd.f32 %v5444_v26, %v8686_v53  ;;  %v5446_v17 = vadd.f32 %v5379_v52, %v5209_v35  ;;  %v4033_v37 = vpop.f32.mrb[23].mxu1 }
 0x330   : > { %v4196_v15 = vadd.f32 %v5445_v57, %v8686_v53  ;;  %v5447_v25 = vadd.f32 %v4033_v37, %v2255_v23 }
 0x331   : > { %v4199_v10 = vadd.f32 %v5446_v17, %v8686_v53  ;;  %v4230_v21 = vmax.f32 %v4198_v0, 0.0 }
 0x332   : > { %v4197_v9 = vadd.f32 %v5447_v25, %v8686_v53  ;;  %v4228_v32 = vmax.f32 %v4196_v15, 0.0 }
 0x333   : > { %v4231_v63 = vmax.f32 %v4199_v10, 0.0 }
 0x334   : > { %v4229_v36 = vmax.f32 %v4197_v9, 0.0  ;;  %v5382_v50 = vpop.f32.mrb[24].mxu1 }
 0x335   : > { %v4261_v29 = vpack.c.bf16 %v4231_v63, %v4230_v21  ;;  %v5448_v31 = vadd.f32 %v5382_v50, %v5212_v39  ;;  %v4046_v4 = vpop.f32.mrb[25].mxu1 }
 0x336   : > { %v4260_v45 = vpack.c.bf16 %v4229_v36, %v4228_v32  ;;  %v5449_v43 = vadd.f32 %v4046_v4, %v2268_v59  ;;  %v5383_v61 = vpop.f32.mrb[26].mxu1 }
 0x337   : > { %v4202_v62 = vadd.f32 %v5448_v31, %v8686_v53  ;;  %v5450_v1 = vadd.f32 %v5383_v61, %v5213_v16  ;;  %v4049_v40 = vpop.f32.mrb[27].mxu1 }
 0x338   : > { %v4200_v28 = vadd.f32 %v5449_v43, %v8686_v53  ;;  %v5451_v18 = vadd.f32 %v4049_v40, %v2271_v27  ;;  %5410 = vmatprep.mubr.msk.bf16.mxu0 %vm1133_vm3, %v4260_v45 }
 0x339   : > { %v4203_v60 = vadd.f32 %v5450_v1, %v8686_v53  ;;  %5411 = vmatmul.mubr.msk.bf16.vlgmr.msra.gmra.mrb[64].mxu0 %vm1133_vm3, %v4261_v29  ;;  %v4234_v19 = vmax.f32 %v4202_v62, 0.0 }
 0x33a   : > { %v4201_v13 = vadd.f32 %v5451_v18, %v8686_v53  ;;  %v4232_v48 = vmax.f32 %v4200_v28, 0.0 }
 0x33b   : > { %v4235_v56 = vmax.f32 %v4203_v60, 0.0 }
 0x33c   : > { %v4233_v35 = vmax.f32 %v4201_v13, 0.0  ;;  %v5386_v23 = vpop.f32.mrb[28].mxu1 }
 0x33d   : > { %v4263_v39 = vpack.c.bf16 %v4235_v56, %v4234_v19  ;;  %v5452_v59 = vadd.f32 %v5386_v23, %v5216_v7  ;;  %v4062_v16 = vpop.f32.mrb[29].mxu1 }
 0x33e   : > { %v4262_v22 = vpack.c.bf16 %v4233_v35, %v4232_v48  ;;  %v5453_v26 = vadd.f32 %v4062_v16, %v2284_v38  ;;  %v5387_v46 = vpop.f32.mrb[30].mxu1 }
 0x33f   : > { %v4206_v27 = vadd.f32 %v5452_v59, %v8686_v53  ;;  %v5454_v57 = vadd.f32 %v5387_v46, %v5217_v34  ;;  %v4065_v52 = vpop.f32.mrb[31].mxu1 }
 0x340   : > { %v4204_v0 = vadd.f32 %v5453_v26, %v8686_v53  ;;  %v5455_v17 = vadd.f32 %v4065_v52, %v2287_v41  ;;  %5414 = vmatprep.mubr.msk.bf16.mxu0 %vm1133_vm3, %v4262_v22 }
 0x341   : > { %v4207_v37 = vadd.f32 %v5454_v57, %v8686_v53  ;;  %5415 = vmatmul.mubr.msk.bf16.gmra.mrb[68].mxu0 %vm1133_vm3, %v4263_v39  ;;  %v4238_v7 = vmax.f32 %v4206_v27, 0.0 }
 0x342   : > { %v4205_v15 = vadd.f32 %v5455_v17, %v8686_v53  ;;  %v4236_v10 = vmax.f32 %v4204_v0, 0.0 }
 0x343   : > { %v4239_v25 = vmax.f32 %v4207_v37, 0.0 }
 0x344   : > { %v4237_v38 = vmax.f32 %v4205_v15, 0.0  ;;  %v5390_v9 = vpop.f32.mrb[0].mxu1 }
 0x345   : > { %v4265_v21 = vpack.c.bf16 %v4239_v25, %v4238_v7  ;;  %v5456_v34 = vadd.f32 %v5390_v9, %v8643_v42  ;;  %v4078_v63 = vpop.f32.mrb[1].mxu1 }
 0x346   : > { %v4264_v32 = vpack.c.bf16 %v4237_v38, %v4236_v10  ;;  %v5457_v41 = vadd.f32 %v4078_v63, %v8645_v49  ;;  %v5391_v36 = vpop.f32.mrb[2].mxu1 }
 0x347   : > { %v4210_v50 = vadd.f32 %v5456_v34, %v8686_v53  ;;  %v5458_v29 = vadd.f32 %v5391_v36, %v8647_v14  ;;  %v4081_v31 = vpop.f32.mrb[3].mxu1 }
 0x348   : > { %v4208_v4 = vadd.f32 %v5457_v41, %v8686_v53  ;;  %v5459_v45 = vadd.f32 %v4081_v31, %v8649_v55  ;;  %5418 = vmatprep.mubr.msk.bf16.mxu0 %vm1133_vm3, %v4264_v32 }
 0x349   : > { %v4211_v43 = vadd.f32 %v5458_v29, %v8686_v53  ;;  %5419 = vmatmul.mubr.msk.bf16.gmra.mrb[72].mxu0 %vm1133_vm3, %v4265_v21  ;;  %v4242_v61 = vmax.f32 %v4210_v50, 0.0 }
 0x34a   : > { %v4209_v42 = vadd.f32 %v5459_v45, %v8686_v53  ;;  %v4240_v62 = vmax.f32 %v4208_v4, 0.0 }
 0x34b   : > { %v4243_v49 = vmax.f32 %v4211_v43, 0.0 }
 0x34c   : > { %v4241_v1 = vmax.f32 %v4209_v42, 0.0  ;;  %v5394_v40 = vpop.f32.mrb[4].mxu1 }
 0x34d   : > { %v4267_v28 = vpack.c.bf16 %v4243_v49, %v4242_v61  ;;  %v5460_v14 = vadd.f32 %v5394_v40, %v8651_v5  ;;  %v4094_v18 = vpop.f32.mrb[5].mxu1 }
 0x34e   : > { %v4266_v60 = vpack.c.bf16 %v4241_v1, %v4240_v62  ;;  %v5461_v55 = vadd.f32 %v4094_v18, %v8653_v30  ;;  %v5395_v13 = vpop.f32.mrb[6].mxu1 }
 0x34f   : > { %v4214_v19 = vadd.f32 %v5460_v14, %v8686_v53  ;;  %v5462_v56 = vadd.f32 %v5395_v13, %v8655_v12  ;;  %v4097_v48 = vpop.f32.mrb[7].mxu1 }
 0x350   : > { %v4212_v35 = vadd.f32 %v5461_v55, %v8686_v53  ;;  %v5463_v23 = vadd.f32 %v4097_v48, %v8657_v44  ;;  %5422 = vmatprep.mubr.msk.bf16.mxu0 %vm1133_vm3, %v4266_v60 }
 0x351   : > { %v4215_v39 = vadd.f32 %v5462_v56, %v8686_v53  ;;  %5423 = vmatmul.mubr.msk.bf16.gmra.mrb[76].mxu0 %vm1133_vm3, %v4267_v28  ;;  %v4246_v59 = vmax.f32 %v4214_v19, 0.0 }
 0x352   : > { %v4213_v5 = vadd.f32 %v5463_v23, %v8686_v53  ;;  %v4244_v16 = vmax.f32 %v4212_v35, 0.0 }
 0x353   : > { %v4247_v30 = vmax.f32 %v4215_v39, 0.0 }
 0x354   : > { %v4245_v22 = vmax.f32 %v4213_v5, 0.0  ;;  %v5398_v26 = vpop.f32.mrb[8].mxu1 }
 0x355   : > { %v4269_v46 = vpack.c.bf16 %v4247_v30, %v4246_v59  ;;  %v5464_v12 = vadd.f32 %v5398_v26, %v8659_v2  ;;  %v4110_v27 = vpop.f32.mrb[9].mxu1 }
 0x356   : > { %v4268_v57 = vpack.c.bf16 %v4245_v22, %v4244_v16  ;;  %v5465_v44 = vadd.f32 %v4110_v27, %v8661_v6  ;;  %v5399_v52 = vpop.f32.mrb[10].mxu1  ;;  %v5783_v16 = vld [vmem:[%s5928_s28 + $0x10] sm:$0xff] }
 0x357   : > { %v4218_v0 = vadd.f32 %v5464_v12, %v8686_v53  ;;  %v5466_v17 = vadd.f32 %v5399_v52, %v8663_v47  ;;  %v4113_v37 = vpop.f32.mrb[11].mxu1  ;;  %v5784_v12 = vld [vmem:[%s5928_s28] sm:$0xff]  ;;  %v5785_v52 = vld [vmem:[%s5928_s28 + $0x18] sm:$0xff] }
 0x358   : > { %v4216_v15 = vadd.f32 %v5465_v44, %v8686_v53  ;;  %v5467_v7 = vadd.f32 %v4113_v37, %v8665_v3  ;;  %5426 = vmatprep.mubr.msk.bf16.mxu0 %vm1133_vm3, %v4268_v57  ;;  %v5786_v37 = vld [vmem:[%s5928_s28 + $0x8] sm:$0xff] }
 0x359   : > { %v4219_v25 = vadd.f32 %v5466_v17, %v8686_v53  ;;  %5427 = vmatmul.mubr.msk.bf16.gmra.mrb[80].mxu0 %vm1133_vm3, %v4269_v46  ;;  %v4250_v10 = vmax.f32 %v4218_v0, 0.0 }
 0x35a   : > { %v4217_v2 = vadd.f32 %v5467_v7, %v8686_v53  ;;  %v4248_v38 = vmax.f32 %v4216_v15, 0.0 }
 0x35b   : > { %v4251_v6 = vmax.f32 %v4219_v25, 0.0 }
 0x35c   : > { %v4249_v9 = vmax.f32 %v4217_v2, 0.0  ;;  %v5402_v21 = vpop.f32.mrb[12].mxu1 }
 0x35d   : > { %v4271_v34 = vpack.c.bf16 %v4251_v6, %v4250_v10  ;;  %v5468_v47 = vadd.f32 %v5402_v21, %v8667_v20  ;;  %v4126_v63 = vpop.f32.mrb[13].mxu1  ;;  %v5787_v21 = vld [vmem:[%s5928_s28 + $0x30] sm:$0xff] }
 0x35e   : > { %v4270_v32 = vpack.c.bf16 %v4249_v9, %v4248_v38  ;;  %v5469_v3 = vadd.f32 %v4126_v63, %v8669_v33  ;;  %v5403_v41 = vpop.f32.mrb[14].mxu1 }
 0x35f   : > { %v4222_v36 = vadd.f32 %v5468_v47, %v8686_v53  ;;  %v5470_v50 = vadd.f32 %v5403_v41, %v8671_v11  ;;  %v4129_v29 = vpop.f32.mrb[15].mxu1 }
 0x360   : > { %v4220_v31 = vadd.f32 %v5469_v3, %v8686_v53  ;;  %v5471_v4 = vadd.f32 %v4129_v29, %v8673_v51  ;;  %5430 = vmatprep.mubr.msk.bf16.mxu0 %vm1133_vm3, %v4270_v32  ;;  %v5788_v32 = vld [vmem:[%s5928_s28 + $0x20] sm:$0xff] }
 0x361   : > { %v4223_v45 = vadd.f32 %v5470_v50, %v8686_v53  ;;  %5431 = vmatmul.mubr.msk.bf16.gmra.mrb[84].mxu0 %vm1133_vm3, %v4271_v34  ;;  %v4254_v43 = vmax.f32 %v4222_v36, 0.0  ;;  %v5789_v50 = vld [vmem:[%s5928_s28 + $0x38] sm:$0xff] }
 0x362   : > { %v4221_v20 = vadd.f32 %v5471_v4, %v8686_v53  ;;  %v4252_v42 = vmax.f32 %v4220_v31, 0.0  ;;  %v5790_v4 = vld [vmem:[%s5928_s28 + $0x28] sm:$0xff] }
 0x363   : > { %v4255_v33 = vmax.f32 %v4223_v45, 0.0 }
 0x364   : > { %v4253_v61 = vmax.f32 %v4221_v20, 0.0  ;;  %v5406_v49 = vpop.f32.mrb[16].mxu1 }
 0x365   : > { %v4273_v62 = vpack.c.bf16 %v4255_v33, %v4254_v43  ;;  %v5472_v11 = vadd.f32 %v5406_v49, %v8675_v54  ;;  %v4142_v1 = vpop.f32.mrb[17].mxu1 }
 0x366   : > { %v4272_v40 = vpack.c.bf16 %v4253_v61, %v4252_v42  ;;  %v5473_v51 = vadd.f32 %v4142_v1, %v8677_v24  ;;  %v5407_v28 = vpop.f32.mrb[18].mxu1 }
 0x367   : > { %v4226_v14 = vadd.f32 %v5472_v11, %v8686_v53  ;;  %v5474_v18 = vadd.f32 %v5407_v28, %v8679_v8  ;;  %v4145_v60 = vpop.f32.mrb[19].mxu1  ;;  %v5791_v11 = vld [vmem:[%s5928_s28 + $0x50] sm:$0xff]  ;;  %v5792_v28 = vld [vmem:[%s5928_s28 + $0x40] sm:$0xff] }
 0x368   : > { %v4224_v55 = vadd.f32 %v5473_v51, %v8686_v53  ;;  %v5475_v13 = vadd.f32 %v4145_v60, %v8681_v58  ;;  %5434 = vmatprep.mubr.msk.bf16.mxu0 %vm1133_vm3, %v4272_v40  ;;  %v8759_v58 = vld [vmem:[%s8905_s6] ss:$0 sm:$0xff] }
 0x369   : > { %v4227_v19 = vadd.f32 %v5474_v18, %v8686_v53  ;;  %5435 = vmatmul.mubr.msk.bf16.gmra.mrb[88].mxu0 %vm1133_vm3, %v4273_v62  ;;  %v4258_v24 = vmax.f32 %v4226_v14, 0.0 }
 0x36a   : > { %v4225_v54 = vadd.f32 %v5475_v13, %v8686_v53  ;;  %v4256_v48 = vmax.f32 %v4224_v55, 0.0  ;;  %v5793_v55 = vld [vmem:[%s5928_s28 + $0x58] sm:$0xff] }
 0x36b   : > { %v4259_v56 = vmax.f32 %v4227_v19, 0.0 }
 0x36c   : > { %v4257_v35 = vmax.f32 %v4225_v54, 0.0  ;;  %v5794_v54 = vld [vmem:[%s5928_s28 + $0x48] sm:$0xff] }
 0x36d   : > { %v4275_v8 = vpack.c.bf16 %v4259_v56, %v4258_v24 }
 0x36e   : > { %v4274_v23 = vpack.c.bf16 %v4257_v35, %v4256_v48 }
 0x370   : > { %5438 = vmatprep.mubr.msk.bf16.mxu0 %vm1133_vm3, %v4274_v23 }
 0x371   : > { %5439 = vmatmul.mubr.msk.bf16.gmra.mrb[92].mxu0 %vm1133_vm3, %v4275_v8 }
 0x40c   : > { %v5412_v39 = vpop.f32.mrb[64].mxu0 }
 0x40d   : > { %v4382_v53 = vadd.f32 %v5412_v39, %v8759_v58  ;;  %v4373_v5 = vpop.f32.mrb[65].mxu0 }
 0x40e   : > { %v4374_v59 = vadd.f32 %v8759_v58, %v4373_v5  ;;  %v5413_v30 = vpop.f32.mrb[66].mxu0  ;;  %v5795_v5 = vld [vmem:[%s5928_s28 + $0x70] sm:$0xff] }
 0x40f   : > { %v4502_v22 = vadd.f32 %v5783_v16, %v4382_v53  ;;  %v4385_v26 = vadd.f32 %v5413_v30, %v8759_v58  ;;  %v4376_v46 = vpop.f32.mrb[67].mxu0 }
 0x410   : > { %v4500_v27 = vadd.f32 %v5784_v12, %v4374_v59  ;;  %v4377_v57 = vadd.f32 %v8759_v58, %v4376_v46 }
 0x411   : > { %v4534_v44 = vmax.f32 %v4502_v22, 0.0  ;;  %v4503_v0 = vadd.f32 %v5785_v52, %v4385_v26  ;;  %v5796_v22 = vld [vmem:[%s5928_s28 + $0x60] sm:$0xff]  ;;  %v5798_v52 = vld [vmem:[%s5928_s28 + $0x68] sm:$0xff] }
 0x412   : > { %v4532_v17 = vmax.f32 %v4500_v27, 0.0  ;;  %v4501_v15 = vadd.f32 %v5786_v37, %v4377_v57  ;;  %v5797_v27 = vld [vmem:[%s5928_s28 + $0x78] sm:$0xff] }
 0x413   : > { %4566 = vst.msk [vmem:[%s8770_s25 + $0x10] sm:$0xff] %vm397_vm0, %v4534_v44  ;;  %v4535_v7 = vmax.f32 %v4503_v0, 0.0 }
 0x414   : > { %4564 = vst.msk [vmem:[%s8770_s25] sm:$0xff] %vm397_vm0, %v4532_v17  ;;  %v4533_v25 = vmax.f32 %v4501_v15, 0.0  ;;  %v5416_v2 = vpop.f32.mrb[68].mxu0 }
 0x415   : > { %4567 = vst.msk [vmem:[%s8770_s25 + $0x18] sm:$0xff] %vm397_vm0, %v4535_v7  ;;  %v4398_v10 = vadd.f32 %v5416_v2, %v8759_v58  ;;  %v4389_v6 = vpop.f32.mrb[69].mxu0 }
 0x416   : > { %4565 = vst.msk [vmem:[%s8770_s25 + $0x8] sm:$0xff] %vm397_vm0, %v4533_v25  ;;  %v4390_v38 = vadd.f32 %v8759_v58, %v4389_v6  ;;  %v5417_v9 = vpop.f32.mrb[70].mxu0  ;;  %v5799_v6 = vld [vmem:[%s5928_s28 + $0x90] sm:$0xff] }
 0x417   : > { %v4506_v34 = vadd.f32 %v5787_v21, %v4398_v10  ;;  %v4401_v47 = vadd.f32 %v5417_v9, %v8759_v58  ;;  %v4392_v63 = vpop.f32.mrb[71].mxu0 }
 0x418   : > { %v4504_v3 = vadd.f32 %v5788_v32, %v4390_v38  ;;  %v4393_v41 = vadd.f32 %v8759_v58, %v4392_v63 }
 0x419   : > { %v4538_v36 = vmax.f32 %v4506_v34, 0.0  ;;  %v4507_v29 = vadd.f32 %v5789_v50, %v4401_v47  ;;  %v5800_v34 = vld [vmem:[%s5928_s28 + $0x80] sm:$0xff]  ;;  %v5802_v50 = vld [vmem:[%s5928_s28 + $0x88] sm:$0xff] }
 0x41a   : > { %v4536_v31 = vmax.f32 %v4504_v3, 0.0  ;;  %v4505_v45 = vadd.f32 %v5790_v4, %v4393_v41  ;;  %v5801_v3 = vld [vmem:[%s5928_s28 + $0x98] sm:$0xff] }
 0x41b   : > { %4570 = vst.msk [vmem:[%s8770_s25 + $0x30] sm:$0xff] %vm397_vm0, %v4538_v36  ;;  %v4539_v20 = vmax.f32 %v4507_v29, 0.0 }
 0x41c   : > { %4568 = vst.msk [vmem:[%s8770_s25 + $0x20] sm:$0xff] %vm397_vm0, %v4536_v31  ;;  %v4537_v43 = vmax.f32 %v4505_v45, 0.0  ;;  %v5420_v33 = vpop.f32.mrb[72].mxu0 }
 0x41d   : > { %4571 = vst.msk [vmem:[%s8770_s25 + $0x38] sm:$0xff] %vm397_vm0, %v4539_v20  ;;  %v4414_v42 = vadd.f32 %v5420_v33, %v8759_v58  ;;  %v4405_v61 = vpop.f32.mrb[73].mxu0 }
 0x41e   : > { %4569 = vst.msk [vmem:[%s8770_s25 + $0x28] sm:$0xff] %vm397_vm0, %v4537_v43  ;;  %v4406_v49 = vadd.f32 %v8759_v58, %v4405_v61  ;;  %v5421_v62 = vpop.f32.mrb[74].mxu0  ;;  %v5803_v61 = vld [vmem:[%s5928_s28 + $0xb0] sm:$0xff] }
 0x41f   : > { %v4510_v1 = vadd.f32 %v5791_v11, %v4414_v42  ;;  %v4417_v40 = vadd.f32 %v5421_v62, %v8759_v58  ;;  %v4408_v51 = vpop.f32.mrb[75].mxu0 }
 0x420   : > { %v4508_v14 = vadd.f32 %v5792_v28, %v4406_v49  ;;  %v4409_v18 = vadd.f32 %v8759_v58, %v4408_v51 }
 0x421   : > { %v4542_v60 = vmax.f32 %v4510_v1, 0.0  ;;  %v4511_v13 = vadd.f32 %v5793_v55, %v4417_v40  ;;  %v5804_v1 = vld [vmem:[%s5928_s28 + $0xa0] sm:$0xff]  ;;  %v5806_v55 = vld [vmem:[%s5928_s28 + $0xa8] sm:$0xff] }
 0x422   : > { %v4540_v19 = vmax.f32 %v4508_v14, 0.0  ;;  %v4509_v24 = vadd.f32 %v5794_v54, %v4409_v18  ;;  %v5805_v14 = vld [vmem:[%s5928_s28 + $0xb8] sm:$0xff] }
 0x423   : > { %4574 = vst.msk [vmem:[%s8770_s25 + $0x50] sm:$0xff] %vm397_vm0, %v4542_v60  ;;  %v4543_v56 = vmax.f32 %v4511_v13, 0.0 }
 0x424   : > { %4572 = vst.msk [vmem:[%s8770_s25 + $0x40] sm:$0xff] %vm397_vm0, %v4540_v19  ;;  %v4541_v48 = vmax.f32 %v4509_v24, 0.0  ;;  %v5424_v35 = vpop.f32.mrb[76].mxu0 }
 0x425   : > { %4575 = vst.msk [vmem:[%s8770_s25 + $0x58] sm:$0xff] %vm397_vm0, %v4543_v56  ;;  %v4430_v8 = vadd.f32 %v5424_v35, %v8759_v58  ;;  %v4421_v23 = vpop.f32.mrb[77].mxu0 }
 0x426   : > { %4573 = vst.msk [vmem:[%s8770_s25 + $0x48] sm:$0xff] %vm397_vm0, %v4541_v48  ;;  %v4422_v39 = vadd.f32 %v8759_v58, %v4421_v23  ;;  %v5425_v53 = vpop.f32.mrb[78].mxu0  ;;  %v5807_v23 = vld [vmem:[%s5928_s28 + $0xd0] sm:$0xff] }
 0x427   : > { %v4514_v59 = vadd.f32 %v5795_v5, %v4430_v8  ;;  %v4433_v30 = vadd.f32 %v5425_v53, %v8759_v58  ;;  %v4424_v16 = vpop.f32.mrb[79].mxu0 }
 0x428   : > { %v4512_v26 = vadd.f32 %v5796_v22, %v4422_v39  ;;  %v4425_v46 = vadd.f32 %v8759_v58, %v4424_v16 }
 0x429   : > { %v4546_v12 = vmax.f32 %v4514_v59, 0.0  ;;  %v4515_v57 = vadd.f32 %v5797_v27, %v4433_v30  ;;  %v5808_v59 = vld [vmem:[%s5928_s28 + $0xc0] sm:$0xff]  ;;  %v5810_v27 = vld [vmem:[%s5928_s28 + $0xc8] sm:$0xff] }
 0x42a   : > { %v4544_v44 = vmax.f32 %v4512_v26, 0.0  ;;  %v4513_v0 = vadd.f32 %v5798_v52, %v4425_v46  ;;  %v5809_v26 = vld [vmem:[%s5928_s28 + $0xd8] sm:$0xff] }
 0x42b   : > { %4578 = vst.msk [vmem:[%s8770_s25 + $0x70] sm:$0xff] %vm397_vm0, %v4546_v12  ;;  %v4547_v17 = vmax.f32 %v4515_v57, 0.0 }
 0x42c   : > { %4576 = vst.msk [vmem:[%s8770_s25 + $0x60] sm:$0xff] %vm397_vm0, %v4544_v44  ;;  %v4545_v37 = vmax.f32 %v4513_v0, 0.0  ;;  %v5428_v15 = vpop.f32.mrb[80].mxu0 }
 0x42d   : > { %4579 = vst.msk [vmem:[%s8770_s25 + $0x78] sm:$0xff] %vm397_vm0, %v4547_v17  ;;  %v4446_v7 = vadd.f32 %v5428_v15, %v8759_v58  ;;  %v4437_v25 = vpop.f32.mrb[81].mxu0 }
 0x42e   : > { %4577 = vst.msk [vmem:[%s8770_s25 + $0x68] sm:$0xff] %vm397_vm0, %v4545_v37  ;;  %v4438_v2 = vadd.f32 %v8759_v58, %v4437_v25  ;;  %v5429_v10 = vpop.f32.mrb[82].mxu0  ;;  %v5811_v25 = vld [vmem:[%s5928_s28 + $0xf0] sm:$0xff] }
 0x42f   : > { %v4518_v38 = vadd.f32 %v5799_v6, %v4446_v7  ;;  %v4449_v9 = vadd.f32 %v5429_v10, %v8759_v58  ;;  %v4440_v21 = vpop.f32.mrb[83].mxu0 }
 0x430   : > { %v4516_v47 = vadd.f32 %v5800_v34, %v4438_v2  ;;  %v4441_v63 = vadd.f32 %v8759_v58, %v4440_v21 }
 0x431   : > { %v4550_v32 = vmax.f32 %v4518_v38, 0.0  ;;  %v4519_v41 = vadd.f32 %v5801_v3, %v4449_v9  ;;  %v5812_v38 = vld [vmem:[%s5928_s28 + $0xe0] sm:$0xff]  ;;  %v5814_v3 = vld [vmem:[%s5928_s28 + $0xe8] sm:$0xff] }
 0x432   : > { %v4548_v36 = vmax.f32 %v4516_v47, 0.0  ;;  %v4517_v29 = vadd.f32 %v5802_v50, %v4441_v63  ;;  %v5813_v47 = vld [vmem:[%s5928_s28 + $0xf8] sm:$0xff] }
 0x433   : > { %4582 = vst.msk [vmem:[%s8770_s25 + $0x90] sm:$0xff] %vm397_vm0, %v4550_v32  ;;  %v4551_v31 = vmax.f32 %v4519_v41, 0.0 }
 0x434   : > { %4580 = vst.msk [vmem:[%s8770_s25 + $0x80] sm:$0xff] %vm397_vm0, %v4548_v36  ;;  %v4549_v4 = vmax.f32 %v4517_v29, 0.0  ;;  %v5432_v45 = vpop.f32.mrb[84].mxu0 }
 0x435   : > { %4583 = vst.msk [vmem:[%s8770_s25 + $0x98] sm:$0xff] %vm397_vm0, %v4551_v31  ;;  %v4462_v20 = vadd.f32 %v5432_v45, %v8759_v58  ;;  %v4453_v43 = vpop.f32.mrb[85].mxu0 }
 0x436   : > { %4581 = vst.msk [vmem:[%s8770_s25 + $0x88] sm:$0xff] %vm397_vm0, %v4549_v4  ;;  %v4454_v33 = vadd.f32 %v8759_v58, %v4453_v43  ;;  %v5433_v42 = vpop.f32.mrb[86].mxu0 }
 0x437   : > { %v4522_v49 = vadd.f32 %v5803_v61, %v4462_v20  ;;  %v4465_v62 = vadd.f32 %v5433_v42, %v8759_v58  ;;  %v4456_v11 = vpop.f32.mrb[87].mxu0 }
 0x438   : > { %v4520_v40 = vadd.f32 %v5804_v1, %v4454_v33  ;;  %v4457_v51 = vadd.f32 %v8759_v58, %v4456_v11 }
 0x439   : > { %v4554_v28 = vmax.f32 %v4522_v49, 0.0  ;;  %v4523_v18 = vadd.f32 %v5805_v14, %v4465_v62 }
 0x43a   : > { %v4552_v60 = vmax.f32 %v4520_v40, 0.0  ;;  %v4521_v13 = vadd.f32 %v5806_v55, %v4457_v51 }
 0x43b   : > { %4586 = vst.msk [vmem:[%s8770_s25 + $0xb0] sm:$0xff] %vm397_vm0, %v4554_v28  ;;  %v4555_v19 = vmax.f32 %v4523_v18, 0.0 }
 0x43c   : > { %4584 = vst.msk [vmem:[%s8770_s25 + $0xa0] sm:$0xff] %vm397_vm0, %v4552_v60  ;;  %v4553_v54 = vmax.f32 %v4521_v13, 0.0  ;;  %v5436_v24 = vpop.f32.mrb[88].mxu0 }
 0x43d   : > { %4587 = vst.msk [vmem:[%s8770_s25 + $0xb8] sm:$0xff] %vm397_vm0, %v4555_v19  ;;  %v4478_v56 = vadd.f32 %v5436_v24, %v8759_v58  ;;  %v4469_v48 = vpop.f32.mrb[89].mxu0 }
 0x43e   : > { %4585 = vst.msk [vmem:[%s8770_s25 + $0xa8] sm:$0xff] %vm397_vm0, %v4553_v54  ;;  %v4470_v35 = vadd.f32 %v8759_v58, %v4469_v48  ;;  %v5437_v8 = vpop.f32.mrb[90].mxu0 }
 0x43f   : > { %v4526_v39 = vadd.f32 %v5807_v23, %v4478_v56  ;;  %v4481_v53 = vadd.f32 %v5437_v8, %v8759_v58  ;;  %v4472_v5 = vpop.f32.mrb[91].mxu0 }
 0x440   : > { %v4524_v30 = vadd.f32 %v5808_v59, %v4470_v35  ;;  %v4473_v16 = vadd.f32 %v8759_v58, %v4472_v5 }
 0x441   : > { %v4558_v22 = vmax.f32 %v4526_v39, 0.0  ;;  %v4527_v46 = vadd.f32 %v5809_v26, %v4481_v53 }
 0x442   : > { %v4556_v12 = vmax.f32 %v4524_v30, 0.0  ;;  %v4525_v57 = vadd.f32 %v5810_v27, %v4473_v16 }
 0x443   : > { %4590 = vst.msk [vmem:[%s8770_s25 + $0xd0] sm:$0xff] %vm397_vm0, %v4558_v22  ;;  %v4559_v44 = vmax.f32 %v4527_v46, 0.0 }
 0x444   : > { %4588 = vst.msk [vmem:[%s8770_s25 + $0xc0] sm:$0xff] %vm397_vm0, %v4556_v12  ;;  %v4557_v52 = vmax.f32 %v4525_v57, 0.0  ;;  %v5440_v0 = vpop.f32.mrb[92].mxu0 }
 0x445   : > { %4591 = vst.msk [vmem:[%s8770_s25 + $0xd8] sm:$0xff] %vm397_vm0, %v4559_v44  ;;  %v4494_v17 = vadd.f32 %v5440_v0, %v8759_v58  ;;  %v4485_v37 = vpop.f32.mrb[93].mxu0 }
 0x446   : > { %4589 = vst.msk [vmem:[%s8770_s25 + $0xc8] sm:$0xff] %vm397_vm0, %v4557_v52  ;;  %v4486_v15 = vadd.f32 %v8759_v58, %v4485_v37  ;;  %v5441_v7 = vpop.f32.mrb[94].mxu0 }
 0x447   : > { %v4530_v2 = vadd.f32 %v5811_v25, %v4494_v17  ;;  %v4497_v10 = vadd.f32 %v5441_v7, %v8759_v58  ;;  %v4488_v6 = vpop.f32.mrb[95].mxu0 }
 0x448   : > { %v4528_v9 = vadd.f32 %v5812_v38, %v4486_v15  ;;  %v4489_v21 = vadd.f32 %v8759_v58, %v4488_v6 }
 0x449   : > { %v4562_v34 = vmax.f32 %v4530_v2, 0.0  ;;  %v4531_v63 = vadd.f32 %v5813_v47, %v4497_v10 }
 0x44a   : > { %v4560_v32 = vmax.f32 %v4528_v9, 0.0  ;;  %v4529_v41 = vadd.f32 %v5814_v3, %v4489_v21 }
 0x44b   : > { %4594 = vst.msk [vmem:[%s8770_s25 + $0xf0] sm:$0xff] %vm397_vm0, %v4562_v34  ;;  %v4563_v36 = vmax.f32 %v4531_v63, 0.0 }
 0x44c   : > { %4592 = vst.msk [vmem:[%s8770_s25 + $0xe0] sm:$0xff] %vm397_vm0, %v4560_v32  ;;  %v4561_v50 = vmax.f32 %v4529_v41, 0.0 }
 0x44d   : > { %4595 = vst.msk [vmem:[%s8770_s25 + $0xf8] sm:$0xff] %vm397_vm0, %v4563_v36 }
 0x44e   : > { %4593 = vst.msk [vmem:[%s8770_s25 + $0xe8] sm:$0xff] %vm397_vm0, %v4561_v50 }
 0x44f PF: > { %s18_s27 = sadd.s32 1, %s5821_s27  }
 0x450   : > { %p15_p4 = scmp.ge.s32.totalorder %s18_s27, 4  }
 0x452   :  { %17 = sbr.rel (!%p15_p4) target bundleno = 1 (0x1), region = 90 }

</bundles_post_ra>
